<compile_context>
chip_gen: v6e
topology: v6e:2x2x1
jax: 0.10.0
libtpu: 0.0.40
codegen_flags: <defaults>
</compile_context>

<pallas_src>
import functools
import jax
import jax.numpy as jnp
from jax.experimental import pallas as pl
from jax.experimental.pallas import tpu as pltpu


def predict_kernel(x_ref,
                   w_in_ref, w_qkv_ref, b_qkv_ref, w_o_ref,
                   w1_ref, b1_ref, w2_ref, bias_ref,
                   o_ref, *, num_heads, compute_dtype):
    eps = 1e-5
    Nb, S, din = x_ref.shape
    dm = w_in_ref.shape[1]
    nh = num_heads
    hd = dm // nh
    R = Nb * S                                  # rows processed per grid step
    cd = compute_dtype

    # Packed (1, dm) bias/gain rows (single DMA'd array).
    b_in = bias_ref[0:1, :]
    b_o = bias_ref[1:2, :]
    g1 = bias_ref[2:3, :]
    be1 = bias_ref[3:4, :]
    b2 = bias_ref[4:5, :]
    g2 = bias_ref[5:6, :]
    be2 = bias_ref[6:7, :]

    # (Nb, S, din) -> (R, din): free leading-dim reshape (S is sublane-aligned).
    x_rows = x_ref[...].reshape(R, din)                                   # bf16

    # ---- input_fc: one (R, din) @ (din, dm) matmul --------------------------------
    h = jnp.dot(x_rows, w_in_ref[...],
                preferred_element_type=jnp.float32) + b_in                # (R, dm) f32

    # ---- packed QKV projection (1/sqrt(hd) pre-folded into W_q / b_q) -------------
    qkv = jnp.dot(h.astype(cd), w_qkv_ref[...],
                  preferred_element_type=jnp.float32) + b_qkv_ref[...]    # (R, 3dm) f32
    qkv_c = qkv.astype(cd)                                                # cast once

    def split_heads(off):
        # (R, dm) lane slab -> (nh*Nb, S, hd) with leading (head, batch) axis.
        parts = [qkv_c[:, off + i * hd: off + (i + 1) * hd] for i in range(nh)]
        return jnp.stack(parts, axis=0).reshape(nh * Nb, S, hd)

    q = split_heads(0)
    k = split_heads(dm)
    v = split_heads(2 * dm)

    # ---- batched attention over all (head, batch) pairs: two MXU pushes -----------
    s = jnp.einsum('bsd,btd->bst', q, k,
                   preferred_element_type=jnp.float32)                    # (nh*Nb, S, S)
    s = s - jnp.max(s, axis=-1, keepdims=True)
    p = jnp.exp(s)
    p = p * pl.reciprocal(jnp.sum(p, axis=-1, keepdims=True), approx=True)
    ctx = jnp.einsum('bst,btd->bsd', p.astype(cd), v,
                     preferred_element_type=jnp.float32)                  # (nh*Nb, S, hd)

    # ---- merge heads once, then ONE full-K (R, dm) @ (dm, dm) output projection ---
    ctx = ctx.reshape(nh, R, hd)
    ctx_rows = jnp.concatenate([ctx[i] for i in range(nh)], axis=-1)      # (R, dm)
    attn = jnp.dot(ctx_rows.astype(cd), w_o_ref[...],
                   preferred_element_type=jnp.float32) + b_o              # (R, dm)

    # ---- residual + LayerNorm 1 -----------------------------------------------------
    s1 = h + attn
    mu1 = jnp.mean(s1, axis=-1, keepdims=True)
    var1 = jnp.mean((s1 - mu1) ** 2, axis=-1, keepdims=True)
    n1 = (s1 - mu1) * jax.lax.rsqrt(var1 + eps) * g1 + be1

    # ---- feed-forward: linear2(relu(linear1(x))) -------------------------------------
    f = jnp.dot(n1.astype(cd), w1_ref[...],
                preferred_element_type=jnp.float32) + b1_ref[...]
    f = jnp.maximum(f, 0.0)
    f = jnp.dot(f.astype(cd), w2_ref[...],
                preferred_element_type=jnp.float32) + b2

    # ---- residual + LayerNorm 2 -------------------------------------------------------
    s2 = n1 + f
    mu2 = jnp.mean(s2, axis=-1, keepdims=True)
    var2 = jnp.mean((s2 - mu2) ** 2, axis=-1, keepdims=True)
    out = (s2 - mu2) * jax.lax.rsqrt(var2 + eps) * g2 + be2               # (R, dm)

    # ---- write back: (R, dm) -> (Nb, S, dm) is a free leading-dim reshape ------------
    o_ref[...] = out.reshape(Nb, S, dm)


def _vmem_limit_bytes():
    """Per-generation VMEM limit: <=48 MiB on v7x (64 MiB), <=96 MiB on v5e/v6e."""
    try:
        cap = pltpu.get_tpu_info().vmem_capacity_bytes
    except Exception:
        cap = 64 * 1024 * 1024
    return min((cap * 3) // 4, 96 * 1024 * 1024)


def _pick_batch_block(N, S, din, dm, ff, nh, vmem_budget):
    """Largest useful batch block under an explicit per-step VMEM budget."""
    def step_bytes(Nb):
        R = Nb * S
        act = R * (4 * dm * 4 + 3 * dm * 6 + ff * 6)     # h/attn/n1/out f32 + qkv, f (f32+bf16)
        scores = 2 * nh * Nb * S * S * 4                 # s + p, f32
        io = 2 * Nb * S * (din * 2 + dm * 4)             # double-buffered x (bf16) + out (f32)
        return act + scores + io

    w_bytes = 2 * (din * dm + 4 * dm * dm + 2 * dm * ff) + 4 * (3 * dm + ff + 7 * dm)
    budget = vmem_budget - 2 * w_bytes                   # worst case: double-buffered weights
    cands = [d for d in range(1, N + 1) if N % d == 0 and step_bytes(d) <= budget]
    if not cands:
        return 1

    def rank(Nb):
        R = Nb * S
        steps = N // Nb
        return (min(R, 256),        # fill the MXU M dim first (256 rows on v6e/v7x)
                R % 128 == 0,       # v5e M alignment
                min(steps, 4),      # then >= 4 grid steps for DMA overlap / both v7x cores
                R)                  # finally amortize per-step overhead
    return max(cands, key=rank)


def predict_forward(x, params, num_heads, *, batch_block=None,
                    compute_dtype=jnp.bfloat16, vmem_limit_bytes=None,
                    single_buffer_weights=True):
    """x: (S, N, input_dim) float32 (PyTorch batch_first=False). Returns (S, N, model_dim) f32."""
    S, N, din = x.shape
    dm = params["w_in"].shape[1]
    ff = params["w1"].shape[1]
    assert dm % num_heads == 0, "model_dim must be divisible by num_heads"
    hd = dm // num_heads
    cd = compute_dtype

    vmem_limit = _vmem_limit_bytes() if vmem_limit_bytes is None else vmem_limit_bytes
    Nb = (_pick_batch_block(N, S, din, dm, ff, num_heads, vmem_limit)
          if batch_block is None else batch_block)
    assert N % Nb == 0, "batch must be divisible by the batch block"
    n_blocks = N // Nb

    # ---- host-side (XLA) prep: layout, dtype, scale folding, bias packing ----------
    x_nsd = jnp.transpose(x, (1, 0, 2)).astype(cd)                 # (N, S, din) bf16
    scale = 1.0 / (hd ** 0.5)
    w_qkv = params["w_qkv"].at[:, :dm].multiply(scale).astype(cd)  # fold scale into W_q
    b_qkv = params["b_qkv"].at[:, :dm].multiply(scale)             # ... and b_q (f32)
    w_in = params["w_in"].astype(cd)
    w_o = params["w_o"].astype(cd)
    w1 = params["w1"].astype(cd)
    w2 = params["w2"].astype(cd)
    bias_pack = jnp.concatenate(
        [params["b_in"], params["b_o"], params["g1"], params["be1"],
         params["b2"], params["g2"], params["be2"]], axis=0)       # (7, dm) f32

    weights = [w_in, w_qkv, b_qkv, w_o, w1, params["b1"], w2, bias_pack]
    kern = functools.partial(predict_kernel, num_heads=num_heads, compute_dtype=cd)

    def weight_spec(a, mode):
        nd = a.ndim
        if mode is None:
            return pl.BlockSpec(a.shape, lambda b, _nd=nd: (0,) * _nd)
        return pl.BlockSpec(a.shape, lambda b, _nd=nd: (0,) * _nd, pipeline_mode=mode)

    def run(mode):
        return pl.pallas_call(
            kern,
            out_shape=jax.ShapeDtypeStruct((N, S, dm), jnp.float32),
            grid=(n_blocks,),
            in_specs=[pl.BlockSpec((Nb, S, din), lambda b: (b, 0, 0))]
                     + [weight_spec(w, mode) for w in weights],
            out_specs=pl.BlockSpec((Nb, S, dm), lambda b: (b, 0, 0)),
            compiler_params=pltpu.CompilerParams(
                dimension_semantics=("parallel",),
                vmem_limit_bytes=vmem_limit),
        )(x_nsd, *weights)

    if single_buffer_weights:
        try:
            out_nsd = run(pl.Buffered(1))   # constant index_map -> single weight buffer
        except Exception:
            out_nsd = run(None)             # fallback: default double-buffering
    else:
        out_nsd = run(None)

    return jnp.transpose(out_nsd, (1, 0, 2))                       # back to (S, N, dm)


def init_params(key, input_dim, model_dim, ff_dim):
    ks = jax.random.split(key, 8)
    std = 0.05
    f32 = jnp.float32
    return {
        # weights stored pre-transposed so the kernel computes  x @ W  (+ b)
        "w_in":  (std * jax.random.normal(ks[0], (input_dim, model_dim))).astype(f32),
        "b_in":  (std * jax.random.normal(ks[1], (1, model_dim))).astype(f32),
        "w_qkv": (std * jax.random.normal(ks[2], (model_dim, 3 * model_dim))).astype(f32),
        "b_qkv": jnp.zeros((1, 3 * model_dim), f32),
        "w_o":   (std * jax.random.normal(ks[3], (model_dim, model_dim))).astype(f32),
        "b_o":   jnp.zeros((1, model_dim), f32),
        "g1":    jnp.ones((1, model_dim), f32),
        "be1":   jnp.zeros((1, model_dim), f32),
        "w1":    (std * jax.random.normal(ks[4], (model_dim, ff_dim))).astype(f32),
        "b1":    (std * jax.random.normal(ks[5], (1, ff_dim))).astype(f32),
        "w2":    (std * jax.random.normal(ks[6], (ff_dim, model_dim))).astype(f32),
        "b2":    (std * jax.random.normal(ks[7], (1, model_dim))).astype(f32),
        "g2":    jnp.ones((1, model_dim), f32),
        "be2":   jnp.zeros((1, model_dim), f32),
    }


def predict_reference(x, p, num_heads):
    """Pure-JAX f32 reference of the same eval-mode forward (for sanity checking)."""
    eps = 1e-5
    h = x @ p["w_in"] + p["b_in"]
    S, N, dm = h.shape
    hd = dm // num_heads
    qkv = h @ p["w_qkv"] + p["b_qkv"]
    q, k, v = qkv[..., :dm], qkv[..., dm:2 * dm], qkv[..., 2 * dm:]

    def heads(t):  # (S, N, dm) -> (N, nh, S, hd)
        return jnp.transpose(t.reshape(S, N, num_heads, hd), (1, 2, 0, 3))

    qh, kh, vh = heads(q), heads(k), heads(v)
    s = jnp.einsum("bhsd,bhtd->bhst", qh, kh) / (hd ** 0.5)
    pmat = jax.nn.softmax(s, axis=-1)
    ctx = jnp.einsum("bhst,bhtd->bhsd", pmat, vh)
    ctx = jnp.transpose(ctx, (2, 0, 1, 3)).reshape(S, N, dm)
    attn = ctx @ p["w_o"] + p["b_o"]

    def ln(t, g, b):
        mu = jnp.mean(t, axis=-1, keepdims=True)
        var = jnp.mean((t - mu) ** 2, axis=-1, keepdims=True)
        return (t - mu) * jax.lax.rsqrt(var + eps) * g + b

    n1 = ln(h + attn, p["g1"], p["be1"])
    f = jnp.maximum(n1 @ p["w1"] + p["b1"], 0.0) @ p["w2"] + p["b2"]
    return ln(n1 + f, p["g2"], p["be2"])


if __name__ == "__main__":
    # Small shapes consistent with the module's forward (batch_first=False input).
    S, N = 8, 4                 # sequence length, batch
    input_dim, model_dim = 16, 32
    num_heads, ff_dim = 4, 64

    key = jax.random.PRNGKey(0)
    kx, kp = jax.random.split(key)
    x = jax.random.normal(kx, (S, N, input_dim), dtype=jnp.float32)
    params = init_params(kp, input_dim, model_dim, ff_dim)

    out = predict_forward(x, params, num_heads)
    out = jax.block_until_ready(out)
    assert out.shape == (S, N, model_dim)

    ref = predict_reference(x, params, num_heads)
    assert jnp.allclose(out, ref, rtol=2e-2, atol=2e-2), "mismatch vs reference"

    print("KERNEL_OK")
</pallas_src>

<mosaic_0001>
module attributes {stable_mosaic.version = 11 : i64} {
  func.func @predict_kernel(%arg0: i32, %arg1: memref<4x8x16xbf16, #tpu.memory_space<vmem>>, %arg2: memref<16x32xbf16, #tpu.memory_space<vmem>>, %arg3: memref<32x96xbf16, #tpu.memory_space<vmem>>, %arg4: memref<1x96xf32, #tpu.memory_space<vmem>>, %arg5: memref<32x32xbf16, #tpu.memory_space<vmem>>, %arg6: memref<32x64xbf16, #tpu.memory_space<vmem>>, %arg7: memref<1x64xf32, #tpu.memory_space<vmem>>, %arg8: memref<64x32xbf16, #tpu.memory_space<vmem>>, %arg9: memref<7x32xf32, #tpu.memory_space<vmem>>, %arg10: memref<4x8x32xf32, #tpu.memory_space<vmem>>) attributes {dimension_semantics = [#tpu.dimension_semantics<parallel>], iteration_bounds = array<i64: 1>, scalar_prefetch = 0 : i64, scratch_operands = 0 : i64, tpu.core_type = #tpu.core_type<tc>, window_params = [{transform_indices = @transform_0, window_bounds = array<i64: 4, 8, 16>}, {pipeline_mode = #tpu.pipeline_mode<synchronous>, transform_indices = @transform_1, window_bounds = array<i64: 16, 32>}, {pipeline_mode = #tpu.pipeline_mode<synchronous>, transform_indices = @transform_2, window_bounds = array<i64: 32, 96>}, {pipeline_mode = #tpu.pipeline_mode<synchronous>, transform_indices = @transform_3, window_bounds = array<i64: 1, 96>}, {pipeline_mode = #tpu.pipeline_mode<synchronous>, transform_indices = @transform_4, window_bounds = array<i64: 32, 32>}, {pipeline_mode = #tpu.pipeline_mode<synchronous>, transform_indices = @transform_5, window_bounds = array<i64: 32, 64>}, {pipeline_mode = #tpu.pipeline_mode<synchronous>, transform_indices = @transform_6, window_bounds = array<i64: 1, 64>}, {pipeline_mode = #tpu.pipeline_mode<synchronous>, transform_indices = @transform_7, window_bounds = array<i64: 64, 32>}, {pipeline_mode = #tpu.pipeline_mode<synchronous>, transform_indices = @transform_8, window_bounds = array<i64: 7, 32>}, {transform_indices = @transform_9, window_bounds = array<i64: 4, 8, 32>}]} {
    %c0 = arith.constant 0 : index
    %c0_0 = arith.constant 0 : index
    %0 = vector.load %arg9[%c0, %c0_0] : memref<7x32xf32, #tpu.memory_space<vmem>>, vector<1x32xf32>
    %c1 = arith.constant 1 : index
    %c0_1 = arith.constant 0 : index
    %1 = vector.load %arg9[%c1, %c0_1] : memref<7x32xf32, #tpu.memory_space<vmem>>, vector<1x32xf32>
    %c2 = arith.constant 2 : index
    %c0_2 = arith.constant 0 : index
    %2 = vector.load %arg9[%c2, %c0_2] : memref<7x32xf32, #tpu.memory_space<vmem>>, vector<1x32xf32>
    %c3 = arith.constant 3 : index
    %c0_3 = arith.constant 0 : index
    %3 = vector.load %arg9[%c3, %c0_3] : memref<7x32xf32, #tpu.memory_space<vmem>>, vector<1x32xf32>
    %c4 = arith.constant 4 : index
    %c0_4 = arith.constant 0 : index
    %4 = vector.load %arg9[%c4, %c0_4] : memref<7x32xf32, #tpu.memory_space<vmem>>, vector<1x32xf32>
    %c5 = arith.constant 5 : index
    %c0_5 = arith.constant 0 : index
    %5 = vector.load %arg9[%c5, %c0_5] : memref<7x32xf32, #tpu.memory_space<vmem>>, vector<1x32xf32>
    %c6 = arith.constant 6 : index
    %c0_6 = arith.constant 0 : index
    %6 = vector.load %arg9[%c6, %c0_6] : memref<7x32xf32, #tpu.memory_space<vmem>>, vector<1x32xf32>
    %c0_7 = arith.constant 0 : index
    %c0_8 = arith.constant 0 : index
    %c0_9 = arith.constant 0 : index
    %7 = vector.load %arg1[%c0_7, %c0_8, %c0_9] : memref<4x8x16xbf16, #tpu.memory_space<vmem>>, vector<4x8x16xbf16>
    %8 = vector.shape_cast %7 : vector<4x8x16xbf16> to vector<32x16xbf16>
    %c0_10 = arith.constant 0 : index
    %c0_11 = arith.constant 0 : index
    %9 = vector.load %arg2[%c0_10, %c0_11] : memref<16x32xbf16, #tpu.memory_space<vmem>>, vector<16x32xbf16>
    %cst = arith.constant dense<0.000000e+00> : vector<32x32xf32>
    %10 = tpu.matmul %8, %9, %cst {dimension_numbers = #tpu.dot_dimension_numbers<[1], [0], [0], [1], [0, 0, 1, 1], [], []>} : vector<32x16xbf16>, vector<16x32xbf16>, vector<32x32xf32> -> vector<32x32xf32>
    %11 = vector.broadcast %0 : vector<1x32xf32> to vector<32x32xf32>
    %12 = arith.addf %10, %11 : vector<32x32xf32>
    %13 = arith.truncf %12 : vector<32x32xf32> to vector<32x32xbf16>
    %c0_12 = arith.constant 0 : index
    %c0_13 = arith.constant 0 : index
    %14 = vector.load %arg3[%c0_12, %c0_13] : memref<32x96xbf16, #tpu.memory_space<vmem>>, vector<32x96xbf16>
    %cst_14 = arith.constant dense<0.000000e+00> : vector<32x96xf32>
    %15 = tpu.matmul %13, %14, %cst_14 {dimension_numbers = #tpu.dot_dimension_numbers<[1], [0], [0], [1], [0, 0, 1, 1], [], []>} : vector<32x32xbf16>, vector<32x96xbf16>, vector<32x96xf32> -> vector<32x96xf32>
    %c0_15 = arith.constant 0 : index
    %c0_16 = arith.constant 0 : index
    %16 = vector.load %arg4[%c0_15, %c0_16] : memref<1x96xf32, #tpu.memory_space<vmem>>, vector<1x96xf32>
    %17 = vector.broadcast %16 : vector<1x96xf32> to vector<32x96xf32>
    %18 = arith.addf %15, %17 : vector<32x96xf32>
    %19 = arith.truncf %18 : vector<32x96xf32> to vector<32x96xbf16>
    %20 = vector.extract_strided_slice %19 {offsets = [0, 0], sizes = [32, 8], strides = [1, 1]} : vector<32x96xbf16> to vector<32x8xbf16>
    %21 = vector.extract_strided_slice %19 {offsets = [0, 8], sizes = [32, 8], strides = [1, 1]} : vector<32x96xbf16> to vector<32x8xbf16>
    %22 = vector.extract_strided_slice %19 {offsets = [0, 16], sizes = [32, 8], strides = [1, 1]} : vector<32x96xbf16> to vector<32x8xbf16>
    %23 = vector.extract_strided_slice %19 {offsets = [0, 24], sizes = [32, 8], strides = [1, 1]} : vector<32x96xbf16> to vector<32x8xbf16>
    %24 = vector.shape_cast %20 : vector<32x8xbf16> to vector<1x32x8xbf16>
    %25 = vector.shape_cast %21 : vector<32x8xbf16> to vector<1x32x8xbf16>
    %26 = vector.shape_cast %22 : vector<32x8xbf16> to vector<1x32x8xbf16>
    %27 = vector.shape_cast %23 : vector<32x8xbf16> to vector<1x32x8xbf16>
    %28 = tpu.concatenate %24, %25, %26, %27 in 0 : vector<1x32x8xbf16>, vector<1x32x8xbf16>, vector<1x32x8xbf16>, vector<1x32x8xbf16> -> vector<4x32x8xbf16>
    %29 = vector.shape_cast %28 : vector<4x32x8xbf16> to vector<16x8x8xbf16>
    %30 = vector.extract_strided_slice %19 {offsets = [0, 32], sizes = [32, 8], strides = [1, 1]} : vector<32x96xbf16> to vector<32x8xbf16>
    %31 = vector.extract_strided_slice %19 {offsets = [0, 40], sizes = [32, 8], strides = [1, 1]} : vector<32x96xbf16> to vector<32x8xbf16>
    %32 = vector.extract_strided_slice %19 {offsets = [0, 48], sizes = [32, 8], strides = [1, 1]} : vector<32x96xbf16> to vector<32x8xbf16>
    %33 = vector.extract_strided_slice %19 {offsets = [0, 56], sizes = [32, 8], strides = [1, 1]} : vector<32x96xbf16> to vector<32x8xbf16>
    %34 = vector.shape_cast %30 : vector<32x8xbf16> to vector<1x32x8xbf16>
    %35 = vector.shape_cast %31 : vector<32x8xbf16> to vector<1x32x8xbf16>
    %36 = vector.shape_cast %32 : vector<32x8xbf16> to vector<1x32x8xbf16>
    %37 = vector.shape_cast %33 : vector<32x8xbf16> to vector<1x32x8xbf16>
    %38 = tpu.concatenate %34, %35, %36, %37 in 0 : vector<1x32x8xbf16>, vector<1x32x8xbf16>, vector<1x32x8xbf16>, vector<1x32x8xbf16> -> vector<4x32x8xbf16>
    %39 = vector.shape_cast %38 : vector<4x32x8xbf16> to vector<16x8x8xbf16>
    %40 = vector.extract_strided_slice %19 {offsets = [0, 64], sizes = [32, 8], strides = [1, 1]} : vector<32x96xbf16> to vector<32x8xbf16>
    %41 = vector.extract_strided_slice %19 {offsets = [0, 72], sizes = [32, 8], strides = [1, 1]} : vector<32x96xbf16> to vector<32x8xbf16>
    %42 = vector.extract_strided_slice %19 {offsets = [0, 80], sizes = [32, 8], strides = [1, 1]} : vector<32x96xbf16> to vector<32x8xbf16>
    %43 = vector.extract_strided_slice %19 {offsets = [0, 88], sizes = [32, 8], strides = [1, 1]} : vector<32x96xbf16> to vector<32x8xbf16>
    %44 = vector.shape_cast %40 : vector<32x8xbf16> to vector<1x32x8xbf16>
    %45 = vector.shape_cast %41 : vector<32x8xbf16> to vector<1x32x8xbf16>
    %46 = vector.shape_cast %42 : vector<32x8xbf16> to vector<1x32x8xbf16>
    %47 = vector.shape_cast %43 : vector<32x8xbf16> to vector<1x32x8xbf16>
    %48 = tpu.concatenate %44, %45, %46, %47 in 0 : vector<1x32x8xbf16>, vector<1x32x8xbf16>, vector<1x32x8xbf16>, vector<1x32x8xbf16> -> vector<4x32x8xbf16>
    %49 = vector.shape_cast %48 : vector<4x32x8xbf16> to vector<16x8x8xbf16>
    "tpu.trace_start"() <{level = 10 : i32, message = "bsd,btd->bst"}> : () -> ()
    %cst_17 = arith.constant dense<0.000000e+00> : vector<16x8x8xf32>
    %50 = tpu.matmul %29, %39, %cst_17 {dimension_numbers = #tpu.dot_dimension_numbers<[2], [2], [1], [1], [0, 0, 0, 1, 1, 1], [0], [0]>} : vector<16x8x8xbf16>, vector<16x8x8xbf16>, vector<16x8x8xf32> -> vector<16x8x8xf32>
    "tpu.trace_stop"() : () -> ()
    %cst_18 = arith.constant dense<0xFF800000> : vector<16x8xf32>
    %51 = vector.multi_reduction <maximumf>, %50, %cst_18 [2] : vector<16x8x8xf32> to vector<16x8xf32>
    %52 = vector.shape_cast %51 : vector<16x8xf32> to vector<16x8x1xf32>
    %53 = vector.broadcast %52 : vector<16x8x1xf32> to vector<16x8x8xf32>
    %54 = arith.subf %50, %53 : vector<16x8x8xf32>
    %55 = math.exp %54 : vector<16x8x8xf32>
    %cst_19 = arith.constant dense<0.000000e+00> : vector<16x8xf32>
    %56 = vector.multi_reduction <add>, %55, %cst_19 [2] : vector<16x8x8xf32> to vector<16x8xf32>
    %57 = vector.shape_cast %56 : vector<16x8xf32> to vector<16x8x1xf32>
    %58 = tpu.reciprocal %57 {approx = true} : vector<16x8x1xf32> -> vector<16x8x1xf32>
    %59 = vector.broadcast %58 : vector<16x8x1xf32> to vector<16x8x8xf32>
    %60 = arith.mulf %55, %59 : vector<16x8x8xf32>
    %61 = arith.truncf %60 : vector<16x8x8xf32> to vector<16x8x8xbf16>
    "tpu.trace_start"() <{level = 10 : i32, message = "bst,btd->bsd"}> : () -> ()
    %cst_20 = arith.constant dense<0.000000e+00> : vector<16x8x8xf32>
    %62 = tpu.matmul %61, %49, %cst_20 {dimension_numbers = #tpu.dot_dimension_numbers<[2], [1], [1], [2], [0, 0, 0, 1, 1, 2], [0], [0]>} : vector<16x8x8xbf16>, vector<16x8x8xbf16>, vector<16x8x8xf32> -> vector<16x8x8xf32>
    "tpu.trace_stop"() : () -> ()
    %63 = vector.shape_cast %62 : vector<16x8x8xf32> to vector<4x32x8xf32>
    %64 = vector.extract_strided_slice %63 {offsets = [0, 0, 0], sizes = [1, 32, 8], strides = [1, 1, 1]} : vector<4x32x8xf32> to vector<1x32x8xf32>
    %65 = vector.shape_cast %64 : vector<1x32x8xf32> to vector<32x8xf32>
    %66 = vector.extract_strided_slice %63 {offsets = [1, 0, 0], sizes = [1, 32, 8], strides = [1, 1, 1]} : vector<4x32x8xf32> to vector<1x32x8xf32>
    %67 = vector.shape_cast %66 : vector<1x32x8xf32> to vector<32x8xf32>
    %68 = vector.extract_strided_slice %63 {offsets = [2, 0, 0], sizes = [1, 32, 8], strides = [1, 1, 1]} : vector<4x32x8xf32> to vector<1x32x8xf32>
    %69 = vector.shape_cast %68 : vector<1x32x8xf32> to vector<32x8xf32>
    %70 = vector.extract_strided_slice %63 {offsets = [3, 0, 0], sizes = [1, 32, 8], strides = [1, 1, 1]} : vector<4x32x8xf32> to vector<1x32x8xf32>
    %71 = vector.shape_cast %70 : vector<1x32x8xf32> to vector<32x8xf32>
    %72 = tpu.concatenate %65, %67, %69, %71 in 1 : vector<32x8xf32>, vector<32x8xf32>, vector<32x8xf32>, vector<32x8xf32> -> vector<32x32xf32>
    %73 = arith.truncf %72 : vector<32x32xf32> to vector<32x32xbf16>
    %c0_21 = arith.constant 0 : index
    %c0_22 = arith.constant 0 : index
    %74 = vector.load %arg5[%c0_21, %c0_22] : memref<32x32xbf16, #tpu.memory_space<vmem>>, vector<32x32xbf16>
    %cst_23 = arith.constant dense<0.000000e+00> : vector<32x32xf32>
    %75 = tpu.matmul %73, %74, %cst_23 {dimension_numbers = #tpu.dot_dimension_numbers<[1], [0], [0], [1], [0, 0, 1, 1], [], []>} : vector<32x32xbf16>, vector<32x32xbf16>, vector<32x32xf32> -> vector<32x32xf32>
    %76 = vector.broadcast %1 : vector<1x32xf32> to vector<32x32xf32>
    %77 = arith.addf %75, %76 : vector<32x32xf32>
    %78 = arith.addf %12, %77 : vector<32x32xf32>
    %cst_24 = arith.constant dense<0.000000e+00> : vector<32xf32>
    %79 = vector.multi_reduction <add>, %78, %cst_24 [1] : vector<32x32xf32> to vector<32xf32>
    %80 = vector.shape_cast %79 : vector<32xf32> to vector<32x1xf32>
    %cst_25 = arith.constant 3.200000e+01 : f32
    %81 = vector.broadcast %cst_25 : f32 to vector<32x1xf32>
    %82 = arith.divf %80, %81 : vector<32x1xf32>
    %83 = vector.broadcast %82 : vector<32x1xf32> to vector<32x32xf32>
    %84 = arith.subf %78, %83 : vector<32x32xf32>
    %85 = arith.mulf %84, %84 : vector<32x32xf32>
    %cst_26 = arith.constant dense<0.000000e+00> : vector<32xf32>
    %86 = vector.multi_reduction <add>, %85, %cst_26 [1] : vector<32x32xf32> to vector<32xf32>
    %87 = vector.shape_cast %86 : vector<32xf32> to vector<32x1xf32>
    %cst_27 = arith.constant 3.200000e+01 : f32
    %88 = vector.broadcast %cst_27 : f32 to vector<32x1xf32>
    %89 = arith.divf %87, %88 : vector<32x1xf32>
    %90 = vector.broadcast %82 : vector<32x1xf32> to vector<32x32xf32>
    %91 = arith.subf %78, %90 : vector<32x32xf32>
    %cst_28 = arith.constant 9.99999974E-6 : f32
    %92 = vector.broadcast %cst_28 : f32 to vector<32x1xf32>
    %93 = arith.addf %89, %92 : vector<32x1xf32>
    %94 = math.rsqrt %93 : vector<32x1xf32>
    %95 = vector.broadcast %94 : vector<32x1xf32> to vector<32x32xf32>
    %96 = arith.mulf %91, %95 : vector<32x32xf32>
    %97 = vector.broadcast %2 : vector<1x32xf32> to vector<32x32xf32>
    %98 = arith.mulf %96, %97 : vector<32x32xf32>
    %99 = vector.broadcast %3 : vector<1x32xf32> to vector<32x32xf32>
    %100 = arith.addf %98, %99 : vector<32x32xf32>
    %101 = arith.truncf %100 : vector<32x32xf32> to vector<32x32xbf16>
    %c0_29 = arith.constant 0 : index
    %c0_30 = arith.constant 0 : index
    %102 = vector.load %arg6[%c0_29, %c0_30] : memref<32x64xbf16, #tpu.memory_space<vmem>>, vector<32x64xbf16>
    %cst_31 = arith.constant dense<0.000000e+00> : vector<32x64xf32>
    %103 = tpu.matmul %101, %102, %cst_31 {dimension_numbers = #tpu.dot_dimension_numbers<[1], [0], [0], [1], [0, 0, 1, 1], [], []>} : vector<32x32xbf16>, vector<32x64xbf16>, vector<32x64xf32> -> vector<32x64xf32>
    %c0_32 = arith.constant 0 : index
    %c0_33 = arith.constant 0 : index
    %104 = vector.load %arg7[%c0_32, %c0_33] : memref<1x64xf32, #tpu.memory_space<vmem>>, vector<1x64xf32>
    %105 = vector.broadcast %104 : vector<1x64xf32> to vector<32x64xf32>
    %106 = arith.addf %103, %105 : vector<32x64xf32>
    %cst_34 = arith.constant 0.000000e+00 : f32
    %107 = vector.broadcast %cst_34 : f32 to vector<32x64xf32>
    %108 = arith.maximumf %106, %107 : vector<32x64xf32>
    %109 = arith.truncf %108 : vector<32x64xf32> to vector<32x64xbf16>
    %c0_35 = arith.constant 0 : index
    %c0_36 = arith.constant 0 : index
    %110 = vector.load %arg8[%c0_35, %c0_36] : memref<64x32xbf16, #tpu.memory_space<vmem>>, vector<64x32xbf16>
    %cst_37 = arith.constant dense<0.000000e+00> : vector<32x32xf32>
    %111 = tpu.matmul %109, %110, %cst_37 {dimension_numbers = #tpu.dot_dimension_numbers<[1], [0], [0], [1], [0, 0, 1, 1], [], []>} : vector<32x64xbf16>, vector<64x32xbf16>, vector<32x32xf32> -> vector<32x32xf32>
    %112 = vector.broadcast %4 : vector<1x32xf32> to vector<32x32xf32>
    %113 = arith.addf %111, %112 : vector<32x32xf32>
    %114 = arith.addf %100, %113 : vector<32x32xf32>
    %cst_38 = arith.constant dense<0.000000e+00> : vector<32xf32>
    %115 = vector.multi_reduction <add>, %114, %cst_38 [1] : vector<32x32xf32> to vector<32xf32>
    %116 = vector.shape_cast %115 : vector<32xf32> to vector<32x1xf32>
    %cst_39 = arith.constant 3.200000e+01 : f32
    %117 = vector.broadcast %cst_39 : f32 to vector<32x1xf32>
    %118 = arith.divf %116, %117 : vector<32x1xf32>
    %119 = vector.broadcast %118 : vector<32x1xf32> to vector<32x32xf32>
    %120 = arith.subf %114, %119 : vector<32x32xf32>
    %121 = arith.mulf %120, %120 : vector<32x32xf32>
    %cst_40 = arith.constant dense<0.000000e+00> : vector<32xf32>
    %122 = vector.multi_reduction <add>, %121, %cst_40 [1] : vector<32x32xf32> to vector<32xf32>
    %123 = vector.shape_cast %122 : vector<32xf32> to vector<32x1xf32>
    %cst_41 = arith.constant 3.200000e+01 : f32
    %124 = vector.broadcast %cst_41 : f32 to vector<32x1xf32>
    %125 = arith.divf %123, %124 : vector<32x1xf32>
    %126 = vector.broadcast %118 : vector<32x1xf32> to vector<32x32xf32>
    %127 = arith.subf %114, %126 : vector<32x32xf32>
    %cst_42 = arith.constant 9.99999974E-6 : f32
    %128 = vector.broadcast %cst_42 : f32 to vector<32x1xf32>
    %129 = arith.addf %125, %128 : vector<32x1xf32>
    %130 = math.rsqrt %129 : vector<32x1xf32>
    %131 = vector.broadcast %130 : vector<32x1xf32> to vector<32x32xf32>
    %132 = arith.mulf %127, %131 : vector<32x32xf32>
    %133 = vector.broadcast %5 : vector<1x32xf32> to vector<32x32xf32>
    %134 = arith.mulf %132, %133 : vector<32x32xf32>
    %135 = vector.broadcast %6 : vector<1x32xf32> to vector<32x32xf32>
    %136 = arith.addf %134, %135 : vector<32x32xf32>
    %137 = vector.shape_cast %136 : vector<32x32xf32> to vector<4x8x32xf32>
    %c0_43 = arith.constant 0 : index
    %c0_44 = arith.constant 0 : index
    %c0_45 = arith.constant 0 : index
    %138 = vector.load %arg10[%c0_43, %c0_44, %c0_45] : memref<4x8x32xf32, #tpu.memory_space<vmem>>, vector<4x8x32xf32>
    tpu.vector_store %arg10[%c0_43, %c0_44, %c0_45], %137 {strides = array<i32>} : memref<4x8x32xf32, #tpu.memory_space<vmem>>, vector<4x8x32xf32>,
    return
  }
  func.func @transform_0(%arg0: i32) -> (i32, i32, i32) {
    %c0_i32 = arith.constant 0 : i32
    %c0_i32_0 = arith.constant 0 : i32
    %c0_i32_1 = arith.constant 0 : i32
    return %arg0, %c0_i32, %c0_i32_0 : i32, i32, i32
  }
  func.func @transform_1(%arg0: i32) -> (i32, i32) {
    %c0_i32 = arith.constant 0 : i32
    %c0_i32_0 = arith.constant 0 : i32
    %c0_i32_1 = arith.constant 0 : i32
    return %c0_i32, %c0_i32_0 : i32, i32
  }
  func.func @transform_2(%arg0: i32) -> (i32, i32) {
    %c0_i32 = arith.constant 0 : i32
    %c0_i32_0 = arith.constant 0 : i32
    %c0_i32_1 = arith.constant 0 : i32
    return %c0_i32, %c0_i32_0 : i32, i32
  }
  func.func @transform_3(%arg0: i32) -> (i32, i32) {
    %c0_i32 = arith.constant 0 : i32
    %c0_i32_0 = arith.constant 0 : i32
    %c0_i32_1 = arith.constant 0 : i32
    return %c0_i32, %c0_i32_0 : i32, i32
  }
  func.func @transform_4(%arg0: i32) -> (i32, i32) {
    %c0_i32 = arith.constant 0 : i32
    %c0_i32_0 = arith.constant 0 : i32
    %c0_i32_1 = arith.constant 0 : i32
    return %c0_i32, %c0_i32_0 : i32, i32
  }
  func.func @transform_5(%arg0: i32) -> (i32, i32) {
    %c0_i32 = arith.constant 0 : i32
    %c0_i32_0 = arith.constant 0 : i32
    %c0_i32_1 = arith.constant 0 : i32
    return %c0_i32, %c0_i32_0 : i32, i32
  }
  func.func @transform_6(%arg0: i32) -> (i32, i32) {
    %c0_i32 = arith.constant 0 : i32
    %c0_i32_0 = arith.constant 0 : i32
    %c0_i32_1 = arith.constant 0 : i32
    return %c0_i32, %c0_i32_0 : i32, i32
  }
  func.func @transform_7(%arg0: i32) -> (i32, i32) {
    %c0_i32 = arith.constant 0 : i32
    %c0_i32_0 = arith.constant 0 : i32
    %c0_i32_1 = arith.constant 0 : i32
    return %c0_i32, %c0_i32_0 : i32, i32
  }
  func.func @transform_8(%arg0: i32) -> (i32, i32) {
    %c0_i32 = arith.constant 0 : i32
    %c0_i32_0 = arith.constant 0 : i32
    %c0_i32_1 = arith.constant 0 : i32
    return %c0_i32, %c0_i32_0 : i32, i32
  }
  func.func @transform_9(%arg0: i32) -> (i32, i32, i32) {
    %c0_i32 = arith.constant 0 : i32
    %c0_i32_0 = arith.constant 0 : i32
    %c0_i32_1 = arith.constant 0 : i32
    return %arg0, %c0_i32, %c0_i32_0 : i32, i32, i32
  }
}

module attributes {stable_mosaic.version = 11 : i64} {
  func.func @predict_kernel(%arg0: i32, %arg1: memref<4x8x16xbf16, #tpu.memory_space<vmem>>, %arg2: memref<16x32xbf16, #tpu.memory_space<vmem>>, %arg3: memref<32x96xbf16, #tpu.memory_space<vmem>>, %arg4: memref<1x96xf32, #tpu.memory_space<vmem>>, %arg5: memref<32x32xbf16, #tpu.memory_space<vmem>>, %arg6: memref<32x64xbf16, #tpu.memory_space<vmem>>, %arg7: memref<1x64xf32, #tpu.memory_space<vmem>>, %arg8: memref<64x32xbf16, #tpu.memory_space<vmem>>, %arg9: memref<7x32xf32, #tpu.memory_space<vmem>>, %arg10: memref<4x8x32xf32, #tpu.memory_space<vmem>>) attributes {dimension_semantics = [#tpu.dimension_semantics<parallel>], iteration_bounds = array<i64: 1>, scalar_prefetch = 0 : i64, scratch_operands = 0 : i64, tpu.core_type = #tpu.core_type<tc>, window_params = [{transform_indices = @transform_0, window_bounds = array<i64: 4, 8, 16>}, {pipeline_mode = #tpu.pipeline_mode<synchronous>, transform_indices = @transform_1, window_bounds = array<i64: 16, 32>}, {pipeline_mode = #tpu.pipeline_mode<synchronous>, transform_indices = @transform_2, window_bounds = array<i64: 32, 96>}, {pipeline_mode = #tpu.pipeline_mode<synchronous>, transform_indices = @transform_3, window_bounds = array<i64: 1, 96>}, {pipeline_mode = #tpu.pipeline_mode<synchronous>, transform_indices = @transform_4, window_bounds = array<i64: 32, 32>}, {pipeline_mode = #tpu.pipeline_mode<synchronous>, transform_indices = @transform_5, window_bounds = array<i64: 32, 64>}, {pipeline_mode = #tpu.pipeline_mode<synchronous>, transform_indices = @transform_6, window_bounds = array<i64: 1, 64>}, {pipeline_mode = #tpu.pipeline_mode<synchronous>, transform_indices = @transform_7, window_bounds = array<i64: 64, 32>}, {pipeline_mode = #tpu.pipeline_mode<synchronous>, transform_indices = @transform_8, window_bounds = array<i64: 7, 32>}, {transform_indices = @transform_9, window_bounds = array<i64: 4, 8, 32>}]} {
    %c0 = arith.constant 0 : index
    %c0_0 = arith.constant 0 : index
    %0 = vector.load %arg9[%c0, %c0_0] : memref<7x32xf32, #tpu.memory_space<vmem>>, vector<1x32xf32>
    %c1 = arith.constant 1 : index
    %c0_1 = arith.constant 0 : index
    %1 = vector.load %arg9[%c1, %c0_1] : memref<7x32xf32, #tpu.memory_space<vmem>>, vector<1x32xf32>
    %c2 = arith.constant 2 : index
    %c0_2 = arith.constant 0 : index
    %2 = vector.load %arg9[%c2, %c0_2] : memref<7x32xf32, #tpu.memory_space<vmem>>, vector<1x32xf32>
    %c3 = arith.constant 3 : index
    %c0_3 = arith.constant 0 : index
    %3 = vector.load %arg9[%c3, %c0_3] : memref<7x32xf32, #tpu.memory_space<vmem>>, vector<1x32xf32>
    %c4 = arith.constant 4 : index
    %c0_4 = arith.constant 0 : index
    %4 = vector.load %arg9[%c4, %c0_4] : memref<7x32xf32, #tpu.memory_space<vmem>>, vector<1x32xf32>
    %c5 = arith.constant 5 : index
    %c0_5 = arith.constant 0 : index
    %5 = vector.load %arg9[%c5, %c0_5] : memref<7x32xf32, #tpu.memory_space<vmem>>, vector<1x32xf32>
    %c6 = arith.constant 6 : index
    %c0_6 = arith.constant 0 : index
    %6 = vector.load %arg9[%c6, %c0_6] : memref<7x32xf32, #tpu.memory_space<vmem>>, vector<1x32xf32>
    %c0_7 = arith.constant 0 : index
    %c0_8 = arith.constant 0 : index
    %c0_9 = arith.constant 0 : index
    %7 = vector.load %arg1[%c0_7, %c0_8, %c0_9] : memref<4x8x16xbf16, #tpu.memory_space<vmem>>, vector<4x8x16xbf16>
    %8 = vector.shape_cast %7 : vector<4x8x16xbf16> to vector<32x16xbf16>
    %c0_10 = arith.constant 0 : index
    %c0_11 = arith.constant 0 : index
    %9 = vector.load %arg2[%c0_10, %c0_11] : memref<16x32xbf16, #tpu.memory_space<vmem>>, vector<16x32xbf16>
    %cst = arith.constant dense<0.000000e+00> : vector<32x32xf32>
    %10 = tpu.matmul %8, %9, %cst {dimension_numbers = #tpu.dot_dimension_numbers<[1], [0], [0], [1], [0, 0, 1, 1], [], []>} : vector<32x16xbf16>, vector<16x32xbf16>, vector<32x32xf32> -> vector<32x32xf32>
    %11 = vector.broadcast %0 : vector<1x32xf32> to vector<32x32xf32>
    %12 = arith.addf %10, %11 : vector<32x32xf32>
    %13 = arith.truncf %12 : vector<32x32xf32> to vector<32x32xbf16>
    %c0_12 = arith.constant 0 : index
    %c0_13 = arith.constant 0 : index
    %14 = vector.load %arg3[%c0_12, %c0_13] : memref<32x96xbf16, #tpu.memory_space<vmem>>, vector<32x96xbf16>
    %cst_14 = arith.constant dense<0.000000e+00> : vector<32x96xf32>
    %15 = tpu.matmul %13, %14, %cst_14 {dimension_numbers = #tpu.dot_dimension_numbers<[1], [0], [0], [1], [0, 0, 1, 1], [], []>} : vector<32x32xbf16>, vector<32x96xbf16>, vector<32x96xf32> -> vector<32x96xf32>
    %c0_15 = arith.constant 0 : index
    %c0_16 = arith.constant 0 : index
    %16 = vector.load %arg4[%c0_15, %c0_16] : memref<1x96xf32, #tpu.memory_space<vmem>>, vector<1x96xf32>
    %17 = vector.broadcast %16 : vector<1x96xf32> to vector<32x96xf32>
    %18 = arith.addf %15, %17 : vector<32x96xf32>
    %19 = arith.truncf %18 : vector<32x96xf32> to vector<32x96xbf16>
    %20 = vector.extract_strided_slice %19 {offsets = [0, 0], sizes = [32, 8], strides = [1, 1]} : vector<32x96xbf16> to vector<32x8xbf16>
    %21 = vector.extract_strided_slice %19 {offsets = [0, 8], sizes = [32, 8], strides = [1, 1]} : vector<32x96xbf16> to vector<32x8xbf16>
    %22 = vector.extract_strided_slice %19 {offsets = [0, 16], sizes = [32, 8], strides = [1, 1]} : vector<32x96xbf16> to vector<32x8xbf16>
    %23 = vector.extract_strided_slice %19 {offsets = [0, 24], sizes = [32, 8], strides = [1, 1]} : vector<32x96xbf16> to vector<32x8xbf16>
    %24 = vector.shape_cast %20 : vector<32x8xbf16> to vector<1x32x8xbf16>
    %25 = vector.shape_cast %21 : vector<32x8xbf16> to vector<1x32x8xbf16>
    %26 = vector.shape_cast %22 : vector<32x8xbf16> to vector<1x32x8xbf16>
    %27 = vector.shape_cast %23 : vector<32x8xbf16> to vector<1x32x8xbf16>
    %28 = tpu.concatenate %24, %25, %26, %27 in 0 : vector<1x32x8xbf16>, vector<1x32x8xbf16>, vector<1x32x8xbf16>, vector<1x32x8xbf16> -> vector<4x32x8xbf16>
    %29 = vector.shape_cast %28 : vector<4x32x8xbf16> to vector<16x8x8xbf16>
    %30 = vector.extract_strided_slice %19 {offsets = [0, 32], sizes = [32, 8], strides = [1, 1]} : vector<32x96xbf16> to vector<32x8xbf16>
    %31 = vector.extract_strided_slice %19 {offsets = [0, 40], sizes = [32, 8], strides = [1, 1]} : vector<32x96xbf16> to vector<32x8xbf16>
    %32 = vector.extract_strided_slice %19 {offsets = [0, 48], sizes = [32, 8], strides = [1, 1]} : vector<32x96xbf16> to vector<32x8xbf16>
    %33 = vector.extract_strided_slice %19 {offsets = [0, 56], sizes = [32, 8], strides = [1, 1]} : vector<32x96xbf16> to vector<32x8xbf16>
    %34 = vector.shape_cast %30 : vector<32x8xbf16> to vector<1x32x8xbf16>
    %35 = vector.shape_cast %31 : vector<32x8xbf16> to vector<1x32x8xbf16>
    %36 = vector.shape_cast %32 : vector<32x8xbf16> to vector<1x32x8xbf16>
    %37 = vector.shape_cast %33 : vector<32x8xbf16> to vector<1x32x8xbf16>
    %38 = tpu.concatenate %34, %35, %36, %37 in 0 : vector<1x32x8xbf16>, vector<1x32x8xbf16>, vector<1x32x8xbf16>, vector<1x32x8xbf16> -> vector<4x32x8xbf16>
    %39 = vector.shape_cast %38 : vector<4x32x8xbf16> to vector<16x8x8xbf16>
    %40 = vector.extract_strided_slice %19 {offsets = [0, 64], sizes = [32, 8], strides = [1, 1]} : vector<32x96xbf16> to vector<32x8xbf16>
    %41 = vector.extract_strided_slice %19 {offsets = [0, 72], sizes = [32, 8], strides = [1, 1]} : vector<32x96xbf16> to vector<32x8xbf16>
    %42 = vector.extract_strided_slice %19 {offsets = [0, 80], sizes = [32, 8], strides = [1, 1]} : vector<32x96xbf16> to vector<32x8xbf16>
    %43 = vector.extract_strided_slice %19 {offsets = [0, 88], sizes = [32, 8], strides = [1, 1]} : vector<32x96xbf16> to vector<32x8xbf16>
    %44 = vector.shape_cast %40 : vector<32x8xbf16> to vector<1x32x8xbf16>
    %45 = vector.shape_cast %41 : vector<32x8xbf16> to vector<1x32x8xbf16>
    %46 = vector.shape_cast %42 : vector<32x8xbf16> to vector<1x32x8xbf16>
    %47 = vector.shape_cast %43 : vector<32x8xbf16> to vector<1x32x8xbf16>
    %48 = tpu.concatenate %44, %45, %46, %47 in 0 : vector<1x32x8xbf16>, vector<1x32x8xbf16>, vector<1x32x8xbf16>, vector<1x32x8xbf16> -> vector<4x32x8xbf16>
    %49 = vector.shape_cast %48 : vector<4x32x8xbf16> to vector<16x8x8xbf16>
    "tpu.trace_start"() <{level = 10 : i32, message = "bsd,btd->bst"}> : () -> ()
    %cst_17 = arith.constant dense<0.000000e+00> : vector<16x8x8xf32>
    %50 = tpu.matmul %29, %39, %cst_17 {dimension_numbers = #tpu.dot_dimension_numbers<[2], [2], [1], [1], [0, 0, 0, 1, 1, 1], [0], [0]>} : vector<16x8x8xbf16>, vector<16x8x8xbf16>, vector<16x8x8xf32> -> vector<16x8x8xf32>
    "tpu.trace_stop"() : () -> ()
    %cst_18 = arith.constant dense<0xFF800000> : vector<16x8xf32>
    %51 = vector.multi_reduction <maximumf>, %50, %cst_18 [2] : vector<16x8x8xf32> to vector<16x8xf32>
    %52 = vector.shape_cast %51 : vector<16x8xf32> to vector<16x8x1xf32>
    %53 = vector.broadcast %52 : vector<16x8x1xf32> to vector<16x8x8xf32>
    %54 = arith.subf %50, %53 : vector<16x8x8xf32>
    %55 = math.exp %54 : vector<16x8x8xf32>
    %cst_19 = arith.constant dense<0.000000e+00> : vector<16x8xf32>
    %56 = vector.multi_reduction <add>, %55, %cst_19 [2] : vector<16x8x8xf32> to vector<16x8xf32>
    %57 = vector.shape_cast %56 : vector<16x8xf32> to vector<16x8x1xf32>
    %58 = tpu.reciprocal %57 {approx = true} : vector<16x8x1xf32> -> vector<16x8x1xf32>
    %59 = vector.broadcast %58 : vector<16x8x1xf32> to vector<16x8x8xf32>
    %60 = arith.mulf %55, %59 : vector<16x8x8xf32>
    %61 = arith.truncf %60 : vector<16x8x8xf32> to vector<16x8x8xbf16>
    "tpu.trace_start"() <{level = 10 : i32, message = "bst,btd->bsd"}> : () -> ()
    %cst_20 = arith.constant dense<0.000000e+00> : vector<16x8x8xf32>
    %62 = tpu.matmul %61, %49, %cst_20 {dimension_numbers = #tpu.dot_dimension_numbers<[2], [1], [1], [2], [0, 0, 0, 1, 1, 2], [0], [0]>} : vector<16x8x8xbf16>, vector<16x8x8xbf16>, vector<16x8x8xf32> -> vector<16x8x8xf32>
    "tpu.trace_stop"() : () -> ()
    %63 = vector.shape_cast %62 : vector<16x8x8xf32> to vector<4x32x8xf32>
    %64 = vector.extract_strided_slice %63 {offsets = [0, 0, 0], sizes = [1, 32, 8], strides = [1, 1, 1]} : vector<4x32x8xf32> to vector<1x32x8xf32>
    %65 = vector.shape_cast %64 : vector<1x32x8xf32> to vector<32x8xf32>
    %66 = vector.extract_strided_slice %63 {offsets = [1, 0, 0], sizes = [1, 32, 8], strides = [1, 1, 1]} : vector<4x32x8xf32> to vector<1x32x8xf32>
    %67 = vector.shape_cast %66 : vector<1x32x8xf32> to vector<32x8xf32>
    %68 = vector.extract_strided_slice %63 {offsets = [2, 0, 0], sizes = [1, 32, 8], strides = [1, 1, 1]} : vector<4x32x8xf32> to vector<1x32x8xf32>
    %69 = vector.shape_cast %68 : vector<1x32x8xf32> to vector<32x8xf32>
    %70 = vector.extract_strided_slice %63 {offsets = [3, 0, 0], sizes = [1, 32, 8], strides = [1, 1, 1]} : vector<4x32x8xf32> to vector<1x32x8xf32>
    %71 = vector.shape_cast %70 : vector<1x32x8xf32> to vector<32x8xf32>
    %72 = tpu.concatenate %65, %67, %69, %71 in 1 : vector<32x8xf32>, vector<32x8xf32>, vector<32x8xf32>, vector<32x8xf32> -> vector<32x32xf32>
    %73 = arith.truncf %72 : vector<32x32xf32> to vector<32x32xbf16>
    %c0_21 = arith.constant 0 : index
    %c0_22 = arith.constant 0 : index
    %74 = vector.load %arg5[%c0_21, %c0_22] : memref<32x32xbf16, #tpu.memory_space<vmem>>, vector<32x32xbf16>
    %cst_23 = arith.constant dense<0.000000e+00> : vector<32x32xf32>
    %75 = tpu.matmul %73, %74, %cst_23 {dimension_numbers = #tpu.dot_dimension_numbers<[1], [0], [0], [1], [0, 0, 1, 1], [], []>} : vector<32x32xbf16>, vector<32x32xbf16>, vector<32x32xf32> -> vector<32x32xf32>
    %76 = vector.broadcast %1 : vector<1x32xf32> to vector<32x32xf32>
    %77 = arith.addf %75, %76 : vector<32x32xf32>
    %78 = arith.addf %12, %77 : vector<32x32xf32>
    %cst_24 = arith.constant dense<0.000000e+00> : vector<32xf32>
    %79 = vector.multi_reduction <add>, %78, %cst_24 [1] : vector<32x32xf32> to vector<32xf32>
    %80 = vector.shape_cast %79 : vector<32xf32> to vector<32x1xf32>
    %cst_25 = arith.constant 3.200000e+01 : f32
    %81 = vector.broadcast %cst_25 : f32 to vector<32x1xf32>
    %82 = arith.divf %80, %81 : vector<32x1xf32>
    %83 = vector.broadcast %82 : vector<32x1xf32> to vector<32x32xf32>
    %84 = arith.subf %78, %83 : vector<32x32xf32>
    %85 = arith.mulf %84, %84 : vector<32x32xf32>
    %cst_26 = arith.constant dense<0.000000e+00> : vector<32xf32>
    %86 = vector.multi_reduction <add>, %85, %cst_26 [1] : vector<32x32xf32> to vector<32xf32>
    %87 = vector.shape_cast %86 : vector<32xf32> to vector<32x1xf32>
    %cst_27 = arith.constant 3.200000e+01 : f32
    %88 = vector.broadcast %cst_27 : f32 to vector<32x1xf32>
    %89 = arith.divf %87, %88 : vector<32x1xf32>
    %90 = vector.broadcast %82 : vector<32x1xf32> to vector<32x32xf32>
    %91 = arith.subf %78, %90 : vector<32x32xf32>
    %cst_28 = arith.constant 9.99999974E-6 : f32
    %92 = vector.broadcast %cst_28 : f32 to vector<32x1xf32>
    %93 = arith.addf %89, %92 : vector<32x1xf32>
    %94 = math.rsqrt %93 : vector<32x1xf32>
    %95 = vector.broadcast %94 : vector<32x1xf32> to vector<32x32xf32>
    %96 = arith.mulf %91, %95 : vector<32x32xf32>
    %97 = vector.broadcast %2 : vector<1x32xf32> to vector<32x32xf32>
    %98 = arith.mulf %96, %97 : vector<32x32xf32>
    %99 = vector.broadcast %3 : vector<1x32xf32> to vector<32x32xf32>
    %100 = arith.addf %98, %99 : vector<32x32xf32>
    %101 = arith.truncf %100 : vector<32x32xf32> to vector<32x32xbf16>
    %c0_29 = arith.constant 0 : index
    %c0_30 = arith.constant 0 : index
    %102 = vector.load %arg6[%c0_29, %c0_30] : memref<32x64xbf16, #tpu.memory_space<vmem>>, vector<32x64xbf16>
    %cst_31 = arith.constant dense<0.000000e+00> : vector<32x64xf32>
    %103 = tpu.matmul %101, %102, %cst_31 {dimension_numbers = #tpu.dot_dimension_numbers<[1], [0], [0], [1], [0, 0, 1, 1], [], []>} : vector<32x32xbf16>, vector<32x64xbf16>, vector<32x64xf32> -> vector<32x64xf32>
    %c0_32 = arith.constant 0 : index
    %c0_33 = arith.constant 0 : index
    %104 = vector.load %arg7[%c0_32, %c0_33] : memref<1x64xf32, #tpu.memory_space<vmem>>, vector<1x64xf32>
    %105 = vector.broadcast %104 : vector<1x64xf32> to vector<32x64xf32>
    %106 = arith.addf %103, %105 : vector<32x64xf32>
    %cst_34 = arith.constant 0.000000e+00 : f32
    %107 = vector.broadcast %cst_34 : f32 to vector<32x64xf32>
    %108 = arith.maximumf %106, %107 : vector<32x64xf32>
    %109 = arith.truncf %108 : vector<32x64xf32> to vector<32x64xbf16>
    %c0_35 = arith.constant 0 : index
    %c0_36 = arith.constant 0 : index
    %110 = vector.load %arg8[%c0_35, %c0_36] : memref<64x32xbf16, #tpu.memory_space<vmem>>, vector<64x32xbf16>
    %cst_37 = arith.constant dense<0.000000e+00> : vector<32x32xf32>
    %111 = tpu.matmul %109, %110, %cst_37 {dimension_numbers = #tpu.dot_dimension_numbers<[1], [0], [0], [1], [0, 0, 1, 1], [], []>} : vector<32x64xbf16>, vector<64x32xbf16>, vector<32x32xf32> -> vector<32x32xf32>
    %112 = vector.broadcast %4 : vector<1x32xf32> to vector<32x32xf32>
    %113 = arith.addf %111, %112 : vector<32x32xf32>
    %114 = arith.addf %100, %113 : vector<32x32xf32>
    %cst_38 = arith.constant dense<0.000000e+00> : vector<32xf32>
    %115 = vector.multi_reduction <add>, %114, %cst_38 [1] : vector<32x32xf32> to vector<32xf32>
    %116 = vector.shape_cast %115 : vector<32xf32> to vector<32x1xf32>
    %cst_39 = arith.constant 3.200000e+01 : f32
    %117 = vector.broadcast %cst_39 : f32 to vector<32x1xf32>
    %118 = arith.divf %116, %117 : vector<32x1xf32>
    %119 = vector.broadcast %118 : vector<32x1xf32> to vector<32x32xf32>
    %120 = arith.subf %114, %119 : vector<32x32xf32>
    %121 = arith.mulf %120, %120 : vector<32x32xf32>
    %cst_40 = arith.constant dense<0.000000e+00> : vector<32xf32>
    %122 = vector.multi_reduction <add>, %121, %cst_40 [1] : vector<32x32xf32> to vector<32xf32>
    %123 = vector.shape_cast %122 : vector<32xf32> to vector<32x1xf32>
    %cst_41 = arith.constant 3.200000e+01 : f32
    %124 = vector.broadcast %cst_41 : f32 to vector<32x1xf32>
    %125 = arith.divf %123, %124 : vector<32x1xf32>
    %126 = vector.broadcast %118 : vector<32x1xf32> to vector<32x32xf32>
    %127 = arith.subf %114, %126 : vector<32x32xf32>
    %cst_42 = arith.constant 9.99999974E-6 : f32
    %128 = vector.broadcast %cst_42 : f32 to vector<32x1xf32>
    %129 = arith.addf %125, %128 : vector<32x1xf32>
    %130 = math.rsqrt %129 : vector<32x1xf32>
    %131 = vector.broadcast %130 : vector<32x1xf32> to vector<32x32xf32>
    %132 = arith.mulf %127, %131 : vector<32x32xf32>
    %133 = vector.broadcast %5 : vector<1x32xf32> to vector<32x32xf32>
    %134 = arith.mulf %132, %133 : vector<32x32xf32>
    %135 = vector.broadcast %6 : vector<1x32xf32> to vector<32x32xf32>
    %136 = arith.addf %134, %135 : vector<32x32xf32>
    %137 = vector.shape_cast %136 : vector<32x32xf32> to vector<4x8x32xf32>
    %c0_43 = arith.constant 0 : index
    %c0_44 = arith.constant 0 : index
    %c0_45 = arith.constant 0 : index
    %138 = vector.load %arg10[%c0_43, %c0_44, %c0_45] : memref<4x8x32xf32, #tpu.memory_space<vmem>>, vector<4x8x32xf32>
    tpu.vector_store %arg10[%c0_43, %c0_44, %c0_45], %137 {strides = array<i32>} : memref<4x8x32xf32, #tpu.memory_space<vmem>>, vector<4x8x32xf32>,
    return
  }
  func.func @transform_0(%arg0: i32) -> (i32, i32, i32) {
    %c0_i32 = arith.constant 0 : i32
    %c0_i32_0 = arith.constant 0 : i32
    %c0_i32_1 = arith.constant 0 : i32
    return %arg0, %c0_i32, %c0_i32_0 : i32, i32, i32
  }
  func.func @transform_1(%arg0: i32) -> (i32, i32) {
    %c0_i32 = arith.constant 0 : i32
    %c0_i32_0 = arith.constant 0 : i32
    %c0_i32_1 = arith.constant 0 : i32
    return %c0_i32, %c0_i32_0 : i32, i32
  }
  func.func @transform_2(%arg0: i32) -> (i32, i32) {
    %c0_i32 = arith.constant 0 : i32
    %c0_i32_0 = arith.constant 0 : i32
    %c0_i32_1 = arith.constant 0 : i32
    return %c0_i32, %c0_i32_0 : i32, i32
  }
  func.func @transform_3(%arg0: i32) -> (i32, i32) {
    %c0_i32 = arith.constant 0 : i32
    %c0_i32_0 = arith.constant 0 : i32
    %c0_i32_1 = arith.constant 0 : i32
    return %c0_i32, %c0_i32_0 : i32, i32
  }
  func.func @transform_4(%arg0: i32) -> (i32, i32) {
    %c0_i32 = arith.constant 0 : i32
    %c0_i32_0 = arith.constant 0 : i32
    %c0_i32_1 = arith.constant 0 : i32
    return %c0_i32, %c0_i32_0 : i32, i32
  }
  func.func @transform_5(%arg0: i32) -> (i32, i32) {
    %c0_i32 = arith.constant 0 : i32
    %c0_i32_0 = arith.constant 0 : i32
    %c0_i32_1 = arith.constant 0 : i32
    return %c0_i32, %c0_i32_0 : i32, i32
  }
  func.func @transform_6(%arg0: i32) -> (i32, i32) {
    %c0_i32 = arith.constant 0 : i32
    %c0_i32_0 = arith.constant 0 : i32
    %c0_i32_1 = arith.constant 0 : i32
    return %c0_i32, %c0_i32_0 : i32, i32
  }
  func.func @transform_7(%arg0: i32) -> (i32, i32) {
    %c0_i32 = arith.constant 0 : i32
    %c0_i32_0 = arith.constant 0 : i32
    %c0_i32_1 = arith.constant 0 : i32
    return %c0_i32, %c0_i32_0 : i32, i32
  }
  func.func @transform_8(%arg0: i32) -> (i32, i32) {
    %c0_i32 = arith.constant 0 : i32
    %c0_i32_0 = arith.constant 0 : i32
    %c0_i32_1 = arith.constant 0 : i32
    return %c0_i32, %c0_i32_0 : i32, i32
  }
  func.func @transform_9(%arg0: i32) -> (i32, i32, i32) {
    %c0_i32 = arith.constant 0 : i32
    %c0_i32_0 = arith.constant 0 : i32
    %c0_i32_1 = arith.constant 0 : i32
    return %arg0, %c0_i32, %c0_i32_0 : i32, i32, i32
  }
}

</mosaic_0001>

<bundles_post_ra>
// kernel: tpu_custom_call.1
= control target key start
LH: loop header
LB: loop body
LE: loop exit
PB: predicated region body
PF: predicated region fallthrough
CT: control target
= control target key end

     0   :  { %14 = vsyncpa [#allocation3], 0  ;;  %s3748_s0 = inlined_call_operand.vmem [shape: bf16[4,8,16], index: 0, kind: input, shape index: {}]   ;;  %s3749_s1 = inlined_call_operand.hbm [shape: bf16[16,32], index: 1, kind: input, shape index: {}]   ;;  %s3750_s2 = inlined_call_operand.vmem [shape: bf16[32,96], index: 2, kind: input, shape index: {}]   ;;  %s3751_s3 = inlined_call_operand.vmem [shape: f32[1,96], index: 3, kind: input, shape index: {}]   ;;  %s3752_s4 = inlined_call_operand.vmem [shape: bf16[32,32], index: 4, kind: input, shape index: {}]   ;;  %s3753_s5 = inlined_call_operand.hbm [shape: bf16[32,64], index: 5, kind: input, shape index: {}]   ;;  %s3754_s6 = inlined_call_operand.vmem [shape: f32[1,64], index: 6, kind: input, shape index: {}]   ;;  %s3755_s7 = inlined_call_operand.vmem [shape: bf16[64,32], index: 7, kind: input, shape index: {}]   ;;  %s3756_s8 = inlined_call_operand.vmem [shape: f32[7,32], index: 8, kind: input, shape index: {}]   ;;  %s3757_s9 = inlined_call_operand.hbm [shape: f32[4,8,32], index: 9, kind: output, shape index: {}]  }
   0x1   :  { %15 = vsyncpa [#allocation6], 0 }
   0x2   :  { %16 = vsyncpa [#allocation4], 0  ;;  %s3100_s30 = smov [#allocation2]  }
   0x3   :  { %s24_s10 = sshll.u32 %s3100_s30, 4  ;;  %s25_s10 = int_to_ptr.vmem [resolvable:$true] %s24_s10 }
   0x4   :  { %s3042_s11 = scalar_lea.vmem %s25_s10, 128  ;;  %p3047_p1 = scmp.lt.s32.totalorder %s25_s10, %s25_s10 }
   0x5   :  { %p3043_p0 = scmp.ne.s32.totalorder %s25_s10, %s3042_s11  ;;  %p3048_p2 = scmp.lt.s32.totalorder %s3042_s11, %s3042_s11 }
   0x7   :  { %p3049_p3 = por %p3048_p2, %p3047_p1 }
   0x9   :  { %p3050_p4 = pnand %p3049_p3, %p3043_p0 }
   0xb   :  { %3053 = shalt.err (!%p3050_p4)
}
   0xc   :  { %s3101_s12 = smov 64   ;;  %s3102_s13 = smov 4  }
   0xd   :  { %30 = dma.hbm_to_vmem [thread:$0]  %s3749_s1, 128, %s25_s10, [#allocation3], %s3101_s12, %s3101_s12, %s3102_s13  }
   0xe   :  { %s3103_s16 = smov [#allocation5]  }
   0xf   :  { %s42_s17 = sshll.u32 %s3103_s16, 4  ;;  %s43_s17 = int_to_ptr.vmem [resolvable:$true] %s42_s17 }
  0x10   :  { %s3062_s18 = scalar_lea.vmem %s43_s17, 256  ;;  %p3067_p6 = scmp.lt.s32.totalorder %s43_s17, %s43_s17 }
  0x11   :  { %p3063_p5 = scmp.ne.s32.totalorder %s43_s17, %s3062_s18  ;;  %p3068_p7 = scmp.lt.s32.totalorder %s3062_s18, %s3062_s18 }
  0x13   :  { %p3069_p8 = por %p3068_p7, %p3067_p6 }
  0x15   :  { %p3070_p9 = pnand %p3069_p8, %p3063_p5 }
  0x17   :  { %3073 = shalt.err (!%p3070_p9)
}
  0x18   :  { %48 = dma.hbm_to_vmem [thread:$0]  %s3753_s5, 256, %s43_s17, [#allocation6], %s3101_s12, %s3101_s12, %s3102_s13  }
  0x19   :  { %3094 = dma.done.wait [#allocation3], 128  }
  0x1a   :  { %3095 = vsyncadd [#allocation3], 4294967168 }
  0x1b   :  { %3096 = dma.done.wait [#allocation6], 256  }
  0x1c   :  { %3097 = vsyncadd [#allocation6], 4294967040  ;;  %v2941_v0 = vld [vmem:[#allocation2] sm:$0xff]   ;;  %vm95_vm0 = vcmask 130048   ;;  %v2943_v2 = vld [vmem:[%s3748_s0 + $0x8] sm:$0xff]   ;;  %vm176_vm1 = vcmask 261120  }
  0x1d   :  { %v2942_v1 = vld [vmem:[%s3748_s0] sm:$0xff]   ;;  %2662 = vmatprep.subr.bf16.mxu1 %v2941_v0  ;;  %v2944_v3 = vld [vmem:[%s3750_s2 + $0x8] sm:$0xff]   ;;  %v3104_v25 = vmov 0.0   ;;  %s3105_s29 = smov 112   ;;  %s3106_s30 = smov 120   ;;  %vm3107_vm2 = vmmov 0  }
  0x1e   :  { %2663 = vmatpush3.bf16.msra.mxu1 %v2941_v0  ;;  %2664 = vmatprep.mubr.msk.bf16.mxu1 %vm95_vm0, %v2942_v1  ;;  %v2945_v4 = vld [vmem:[%s3750_s2] sm:$0xff]   ;;  %s3109_s10 = smov 96   ;;  %vm282_vm3 = vcmask 64512   ;;  %vm1246_vm4 = vcmask 1043456   ;;  %s3110_s11 = smov 8   ;;  %vm2066_vm5 = vcmask 195584  }
  0x1f   :  { %2668 = vmatprep.subr.bf16.mxu1 %v2944_v3  ;;  %v2493_v8 = vld [vmem:[%s3756_s8] ss:$0 sm:$0xff]  ;;  %2676 = vmatprep.subr.bf16.mxu0 %v3104_v25  ;;  %s3112_s17 = smov 24   ;;  %vm2343_vm6 = vcmask 523264  }
  0x20   :  { %v2499_v19 = vld [vmem:[%s3751_s3] ss:$0 sm:$0xff]  ;;  %2678 = vmatprep.mubr.msk.bf16.mxu0 %vm3107_vm2, %v3104_v25  ;;  %s3108_s3 = smov 104  }
  0x21   :  { %2665 = vmatmul.mubr.msk.bf16.vlgmr.msra.gmra.mxu1 %vm95_vm0, %v2943_v2 }
  0x22   :  { %2669 = vmatpush3.bf16.msra.mxu1 %v2944_v3 }
  0x23   :  { %2670 = vmatprep.subr.bf16.mxu1 %v2945_v4 }
  0x26   :  { %2671 = vmatpush3.bf16.msra.mxu1 %v2945_v4 }
  0x27   :  { %2682 = vmatprep.subr.bf16.mxu1 %v3104_v25 }
  0xe1   :  { %v2666_v5 = vpop.f32.mrf.mxu1 }
  0xe2   :  { %v3198_v13 = vadd.f32 %v2666_v5, %v2493_v8 }
  0xe3   :  { %v136_v6 = vpop.f32.mrf.mxu1 }
  0xe4   :  { %v3194_v11 = vadd.f32 %v2493_v8, %v136_v6 }
  0xe5   :  { %v2667_v7 = vpop.f32.mrf.mxu1 }
  0xe6   :  { %v3192_v9 = vadd.f32 %v2667_v7, %v2493_v8 }
  0xe7   :  { %v139_v10 = vpop.f32.mrf.mxu1 }
  0xe8   :  { %v3196_v12 = vadd.f32 %v2493_v8, %v139_v10  ;;  %v152_v15 = vpack.c.bf16 %v3192_v9, %v3198_v13 }
  0xea   :  { %v151_v14 = vpack.c.bf16 %v3196_v12, %v3194_v11 }
  0xec   :  { %2672 = vmatprep.mubr.msk.bf16.mxu1 %vm176_vm1, %v151_v14 }
  0xed   :  { %2673 = vmatmul.mubr.msk.bf16.vlgmr.msra.gmra.mxu1 %vm176_vm1, %v152_v15 }
  0xee   :  { %2684 = vmatprep.mubr.msk.bf16.mxu1 %vm3107_vm2, %v3104_v25 }
 0x1ad   :  { %v2674_v16 = vpop.f32.mrf.mxu1 }
 0x1ae   :  { %v226_v26 = vadd.f32 %v2674_v16, %v2499_v19 }
 0x1af   :  { %v217_v17 = vpop.f32.mrf.mxu1 }
 0x1b0   :  { %v218_v21 = vadd.f32 %v2499_v19, %v217_v17  ;;  %v2575_v30 = vpack.c.bf16 %v226_v26, %v226_v26 }
 0x1b1   :  { %v2675_v18 = vpop.f32.mrf.mxu1 }
 0x1b2   :  { %v229_v23 = vadd.f32 %v2675_v18, %v2499_v19  ;;  %v2573_v28 = vpack.c.bf16 %v218_v21, %v218_v21 }
 0x1b3   :  { %v220_v20 = vpop.f32.mrf.mxu1 }
 0x1b4   :  { %v221_v22 = vadd.f32 %v2499_v19, %v220_v20  ;;  %v233_v27 = vpack.c.bf16 %v229_v23, %v226_v26  ;;  %v2576_v31 = vpack.c.bf16 %v229_v23, %v229_v23 }
 0x1b6   :  { %v232_v24 = vpack.c.bf16 %v221_v22, %v218_v21  ;;  %v2574_v29 = vpack.c.bf16 %v221_v22, %v221_v22 }
 0x1b8   :  { %240 = vrot.lane.b32.xlu1 %v232_v24, %s3105_s29  ;;  %236 = vrot.lane.b32.xlu0 %v232_v24, %s3106_s30 }
 0x1bc   :  { %242 = vrot.lane.b32.xlu1 %v233_v27, %s3105_s29  ;;  %238 = vrot.lane.b32.xlu0 %v233_v27, %s3106_s30 }
 0x1c0   :  { %246 = vrot.lane.b32.xlu1 %v233_v27, %s3108_s3  ;;  %244 = vrot.lane.b32.xlu0 %v232_v24, %s3108_s3 }
 0x1c4   :  { %329 = vrot.lane.b32.xlu1 %v2574_v29, %s3109_s10  ;;  %280 = vrot.lane.b32.xlu0 %v2573_v28, %s3109_s10 }
 0x1c8   :  { %425 = vrot.lane.b32.xlu1 %v2576_v31, %s3109_s10  ;;  %377 = vrot.lane.b32.xlu0 %v2575_v30, %s3109_s10 }
 0x22a   :  { %v241_v32 = vpop.permute.xlu1 %240  ;;  %v237_v33 = vpop.permute.xlu0 %236 }
 0x22b   :  { %v3219_v34 = vcombine.low %v237_v33, %v237_v33  ;;  %v3221_v35 = vcombine.high %v237_v33, %v237_v33  ;;  %v3235_v42 = vcombine.low %v241_v32, %v241_v32  ;;  %v3237_v43 = vcombine.high %v241_v32, %v241_v32 }
 0x22d   :  { %521 = vrot.lane.b32.xlu1 %v3221_v35, %s3109_s10  ;;  %473 = vrot.lane.b32.xlu0 %v3219_v34, %s3109_s10 }
 0x22e   :  { %v243_v36 = vpop.permute.xlu1 %242  ;;  %v239_v37 = vpop.permute.xlu0 %238 }
 0x22f   :  { %v3227_v38 = vcombine.low %v239_v37, %v239_v37  ;;  %v3229_v39 = vcombine.high %v239_v37, %v239_v37  ;;  %v3243_v46 = vcombine.low %v243_v36, %v243_v36  ;;  %v3245_v47 = vcombine.high %v243_v36, %v243_v36 }
 0x231   :  { %617 = vrot.lane.b32.xlu1 %v3229_v39, %s3109_s10  ;;  %569 = vrot.lane.b32.xlu0 %v3227_v38, %s3109_s10 }
 0x232   :  { %v247_v40 = vpop.permute.xlu1 %246  ;;  %v245_v41 = vpop.permute.xlu0 %244 }
 0x233   :  { %v3255_v50 = vcombine.low %v245_v41, %v245_v41  ;;  %v3257_v51 = vcombine.high %v245_v41, %v245_v41  ;;  %v3263_v54 = vcombine.low %v247_v40, %v247_v40  ;;  %v3265_v55 = vcombine.high %v247_v40, %v247_v40 }
 0x235   :  { %713 = vrot.lane.b32.xlu1 %v3237_v43, %s3109_s10  ;;  %665 = vrot.lane.b32.xlu0 %v3235_v42, %s3109_s10 }
 0x236   :  { %v330_v44 = vpop.permute.xlu1 %329  ;;  %v281_v45 = vpop.permute.xlu0 %280 }
 0x237   :  { %v335_v48 = vsel %vm282_vm3, %v330_v44, 0  ;;  %v287_v49 = vsel %vm282_vm3, %v281_v45, 0 }
 0x238   :  { %2677 = vmatpush3.bf16.xpose.msra.mxu0 %v287_v49  ;;  %2683 = vmatpush3.bf16.xpose.msra.mxu1 %v335_v48 }
 0x239   :  { %809 = vrot.lane.b32.xlu1 %v3245_v47, %s3109_s10  ;;  %761 = vrot.lane.b32.xlu0 %v3243_v46, %s3109_s10 }
 0x23a   :  { %2688 = vmatprep.subr.bf16.mxu0 %v3104_v25  ;;  %2694 = vmatprep.subr.bf16.mxu1 %v3104_v25  ;;  %v426_v52 = vpop.permute.xlu1 %425  ;;  %v378_v53 = vpop.permute.xlu0 %377 }
 0x23b   :  { %v431_v56 = vsel %vm282_vm3, %v426_v52, 0  ;;  %v383_v57 = vsel %vm282_vm3, %v378_v53, 0 }
 0x23d   :  { %905 = vrot.lane.b32.xlu1 %v3257_v51, %s3109_s10  ;;  %857 = vrot.lane.b32.xlu0 %v3255_v50, %s3109_s10 }
 0x23f   :  { %2679 = vmatmul.mubr.msk.bf16.vlgmr.msra.gmra.mxu0 %vm282_vm3, %v2573_v28  ;;  %2685 = vmatmul.mubr.msk.bf16.vlgmr.msra.gmra.mxu1 %vm282_vm3, %v2574_v29 }
 0x240   :  { %2689 = vmatpush3.bf16.xpose.msra.mxu0 %v383_v57  ;;  %2695 = vmatpush3.bf16.xpose.msra.mxu1 %v431_v56 }
 0x241   :  { %1001 = vrot.lane.b32.xlu1 %v3265_v55, %s3109_s10  ;;  %953 = vrot.lane.b32.xlu0 %v3263_v54, %s3109_s10 }
 0x242   :  { %2690 = vmatprep.mubr.msk.bf16.mxu0 %vm3107_vm2, %v3104_v25  ;;  %2696 = vmatprep.mubr.msk.bf16.mxu1 %vm3107_vm2, %v3104_v25 }
 0x243   :  { %2700 = vmatprep.subr.bf16.mxu0 %v3104_v25  ;;  %2706 = vmatprep.subr.bf16.mxu1 %v3104_v25 }
 0x245   :  { %1241 = vrot.lane.b32.xlu1 %v2573_v28, %s3101_s12  ;;  %1290 = vrot.lane.b32.xlu0 %v2574_v29, %s3101_s12 }
 0x247   :  { %2691 = vmatmul.mubr.msk.bf16.vlgmr.msra.gmra.mxu0 %vm282_vm3, %v2575_v30  ;;  %2697 = vmatmul.mubr.msk.bf16.vlgmr.msra.gmra.mxu1 %vm282_vm3, %v2576_v31 }
 0x248   :  { %2708 = vmatprep.mubr.msk.bf16.mxu1 %vm3107_vm2, %v3104_v25  ;;  %2702 = vmatprep.mubr.msk.bf16.mxu0 %vm3107_vm2, %v3104_v25 }
 0x249   :  { %1338 = vrot.lane.b32.xlu1 %v2575_v30, %s3101_s12  ;;  %1386 = vrot.lane.b32.xlu0 %v2576_v31, %s3101_s12 }
 0x24d   :  { %1530 = vrot.lane.b32.xlu1 %v3227_v38, %s3101_s12  ;;  %1578 = vrot.lane.b32.xlu0 %v3229_v39, %s3101_s12 }
 0x251   :  { %1434 = vrot.lane.b32.xlu1 %v3219_v34, %s3101_s12  ;;  %1482 = vrot.lane.b32.xlu0 %v3221_v35, %s3101_s12 }
 0x255   :  { %1626 = vrot.lane.b32.xlu1 %v3235_v42, %s3101_s12 }
 0x29f   :  { %v522_v58 = vpop.permute.xlu1 %521  ;;  %v474_v59 = vpop.permute.xlu0 %473 }
 0x2a0   :  { %v527_v60 = vsel %vm282_vm3, %v522_v58, 0  ;;  %v479_v61 = vsel %vm282_vm3, %v474_v59, 0 }
 0x2a1   :  { %2701 = vmatpush3.bf16.xpose.msra.mxu0 %v479_v61  ;;  %2707 = vmatpush3.bf16.xpose.msra.mxu1 %v527_v60 }
 0x2a2   :  { %2712 = vmatprep.subr.bf16.mxu0 %v3104_v25  ;;  %2718 = vmatprep.subr.bf16.mxu1 %v3104_v25 }
 0x2a3   :  { %v618_v62 = vpop.permute.xlu1 %617  ;;  %v570_v63 = vpop.permute.xlu0 %569 }
 0x2a4   :  { %v623_v0 = vsel %vm282_vm3, %v618_v62, 0  ;;  %v575_v1 = vsel %vm282_vm3, %v570_v63, 0 }
 0x2a7   :  { %v714_v2 = vpop.permute.xlu1 %713  ;;  %v666_v3 = vpop.permute.xlu0 %665 }
 0x2a8   :  { %2703 = vmatmul.mubr.msk.bf16.vlgmr.msra.gmra.mxu0 %vm282_vm3, %v3219_v34  ;;  %2709 = vmatmul.mubr.msk.bf16.vlgmr.msra.gmra.mxu1 %vm282_vm3, %v3221_v35  ;;  %v719_v4 = vsel %vm282_vm3, %v714_v2, 0  ;;  %v671_v5 = vsel %vm282_vm3, %v666_v3, 0 }
 0x2a9   :  { %2713 = vmatpush3.bf16.xpose.msra.mxu0 %v575_v1  ;;  %2719 = vmatpush3.bf16.xpose.msra.mxu1 %v623_v0 }
 0x2aa   :  { %2720 = vmatprep.mubr.msk.bf16.mxu1 %vm3107_vm2, %v3104_v25  ;;  %2714 = vmatprep.mubr.msk.bf16.mxu0 %vm3107_vm2, %v3104_v25 }
 0x2ab   :  { %2724 = vmatprep.subr.bf16.mxu0 %v3104_v25  ;;  %2730 = vmatprep.subr.bf16.mxu1 %v3104_v25  ;;  %v810_v6 = vpop.permute.xlu1 %809  ;;  %v762_v7 = vpop.permute.xlu0 %761 }
 0x2ac   :  { %v815_v8 = vsel %vm282_vm3, %v810_v6, 0  ;;  %v767_v10 = vsel %vm282_vm3, %v762_v7, 0 }
 0x2af   :  { %v906_v14 = vpop.permute.xlu1 %905  ;;  %v858_v15 = vpop.permute.xlu0 %857 }
 0x2b0   :  { %2715 = vmatmul.mubr.msk.bf16.vlgmr.msra.gmra.mxu0 %vm282_vm3, %v3227_v38  ;;  %2721 = vmatmul.mubr.msk.bf16.vlgmr.msra.gmra.mxu1 %vm282_vm3, %v3229_v39  ;;  %v911_v16 = vsel %vm282_vm3, %v906_v14, 0  ;;  %v863_v17 = vsel %vm282_vm3, %v858_v15, 0 }
 0x2b1   :  { %2725 = vmatpush3.bf16.xpose.msra.mxu0 %v671_v5  ;;  %2731 = vmatpush3.bf16.xpose.msra.mxu1 %v719_v4 }
 0x2b2   :  { %2732 = vmatprep.mubr.msk.bf16.mxu1 %vm3107_vm2, %v3104_v25  ;;  %2726 = vmatprep.mubr.msk.bf16.mxu0 %vm3107_vm2, %v3104_v25 }
 0x2b3   :  { %2736 = vmatprep.subr.bf16.mxu0 %v3104_v25  ;;  %2742 = vmatprep.subr.bf16.mxu1 %v3104_v25  ;;  %v1002_v18 = vpop.permute.xlu1 %1001  ;;  %v954_v19 = vpop.permute.xlu0 %953 }
 0x2b4   :  { %v1007_v20 = vsel %vm282_vm3, %v1002_v18, 0  ;;  %v959_v21 = vsel %vm282_vm3, %v954_v19, 0 }
 0x2b7   :  { %v1242_v22 = vpop.permute.xlu1 %1241  ;;  %v1291_v23 = vpop.permute.xlu0 %1290 }
 0x2b8   :  { %2727 = vmatmul.mubr.msk.bf16.vlgmr.msra.gmra.mxu0 %vm282_vm3, %v3235_v42  ;;  %2733 = vmatmul.mubr.msk.bf16.vlgmr.msra.gmra.mxu1 %vm282_vm3, %v3237_v43  ;;  %v1248_v24 = vsel %vm1246_vm4, %v1242_v22, 0  ;;  %v1296_v26 = vsel %vm1246_vm4, %v1291_v23, 0 }
 0x2b9   :  { %2737 = vmatpush3.bf16.xpose.msra.mxu0 %v767_v10  ;;  %2743 = vmatpush3.bf16.xpose.msra.mxu1 %v815_v8 }
 0x2ba   :  { %2744 = vmatprep.mubr.msk.bf16.mxu1 %vm3107_vm2, %v3104_v25  ;;  %2738 = vmatprep.mubr.msk.bf16.mxu0 %vm3107_vm2, %v3104_v25 }
 0x2bb   :  { %2748 = vmatprep.subr.bf16.mxu0 %v3104_v25  ;;  %2754 = vmatprep.subr.bf16.mxu1 %v3104_v25 }
 0x2c0   :  { %2739 = vmatmul.mubr.msk.bf16.vlgmr.msra.gmra.mxu0 %vm282_vm3, %v3243_v46  ;;  %2745 = vmatmul.mubr.msk.bf16.vlgmr.msra.gmra.mxu1 %vm282_vm3, %v3245_v47 }
 0x2c1   :  { %2749 = vmatpush3.bf16.xpose.msra.mxu0 %v863_v17  ;;  %2755 = vmatpush3.bf16.xpose.msra.mxu1 %v911_v16 }
 0x2c2   :  { %2756 = vmatprep.mubr.msk.bf16.mxu1 %vm3107_vm2, %v3104_v25  ;;  %2750 = vmatprep.mubr.msk.bf16.mxu0 %vm3107_vm2, %v3104_v25 }
 0x2c3   :  { %2760 = vmatprep.subr.bf16.mxu0 %v3104_v25  ;;  %2766 = vmatprep.subr.bf16.mxu1 %v3104_v25 }
 0x2c8   :  { %2751 = vmatmul.mubr.msk.bf16.vlgmr.msra.gmra.mxu0 %vm282_vm3, %v3255_v50  ;;  %2757 = vmatmul.mubr.msk.bf16.vlgmr.msra.gmra.mxu1 %vm282_vm3, %v3257_v51 }
 0x2c9   :  { %2761 = vmatpush3.bf16.xpose.msra.mxu0 %v959_v21  ;;  %2767 = vmatpush3.bf16.xpose.msra.mxu1 %v1007_v20  ;;  %v3417_v20 = vpop.permute.xlu0 %1386 }
 0x2ca   :  { %2762 = vmatprep.mubr.msk.bf16.mxu0 %vm3107_vm2, %v3104_v25  ;;  %2768 = vmatprep.mubr.msk.bf16.mxu1 %vm3107_vm2, %v3104_v25 }
 0x2cb   :  { %2772 = vmatprep.subr.bf16.mxu0 %v3104_v25  ;;  %2778 = vmatprep.subr.bf16.mxu1 %v3104_v25 }
 0x2d0   :  { %2763 = vmatmul.mubr.msk.bf16.vlgmr.msra.gmra.mxu0 %vm282_vm3, %v3263_v54  ;;  %2769 = vmatmul.mubr.msk.bf16.vlgmr.msra.gmra.mxu1 %vm282_vm3, %v3265_v55 }
 0x2d1   :  { %2773 = vmatpush3.bf16.msra.mxu0 %v1248_v24  ;;  %2779 = vmatpush3.bf16.msra.mxu1 %v1296_v26 }
 0x2d2   :  { %2774 = vmatprep.mubr.msk.bf16.mxu0 %vm3107_vm2, %v3104_v25  ;;  %2784 = vmatprep.subr.bf16.mxu0 %v3104_v25 }
 0x2d3   :  { %2780 = vmatprep.mubr.msk.bf16.mxu1 %vm3107_vm2, %v3104_v25  ;;  %2790 = vmatprep.subr.bf16.mxu1 %v3104_v25 }
 0x2ff   :  { %v3377_v27 = vpop.f32.mrf.mxu0  ;;  %v3379_v28 = vpop.f32.mrf.mxu1 }
 0x300   :  { %v1052_v29 = vsel %vm282_vm3, %v3379_v28, -inf  ;;  %v1049_v30 = vsel %vm282_vm3, %v3377_v27, -inf }
 0x301   :  { %v2686_v31 = vpop.f32.mrf.mxu1  ;;  %1053 = vmax.xlane.f32.xlu1 %v1052_v29  ;;  %1050 = vmax.xlane.f32.xlu0 %v1049_v30  ;;  %v2680_v32 = vpop.f32.mrf.mxu0 }
 0x302   :  { %v3423_v30 = vpop.permute.xlu0 %1578 }
 0x303   :  { %v326_v33 = vpop.f32.mrf.mxu0  ;;  %v374_v34 = vpop.f32.mrf.mxu1 }
 0x305   :  { %v2681_v35 = vpop.f32.mrf.mxu0  ;;  %v2687_v36 = vpop.f32.mrf.mxu1 }
 0x307   :  { %v3385_v37 = vpop.f32.mrf.mxu0  ;;  %v3387_v38 = vpop.f32.mrf.mxu1 }
 0x308   :  { %v1055_v39 = vsel %vm282_vm3, %v3385_v37, -inf  ;;  %v1058_v45 = vsel %vm282_vm3, %v3387_v38, -inf }
 0x309   :  { %v2698_v40 = vpop.f32.mrf.mxu1  ;;  %1056 = vmax.xlane.f32.xlu0 %v1055_v39  ;;  %v2692_v41 = vpop.f32.mrf.mxu0 }
 0x30a   :  { %v3429_v41 = vpop.permute.xlu0 %1482 }
 0x30b   :  { %v422_v42 = vpop.f32.mrf.mxu0  ;;  %v470_v44 = vpop.f32.mrf.mxu1 }
 0x30d   :  { %v2699_v48 = vpop.f32.mrf.mxu1  ;;  %1059 = vmax.xlane.f32.xlu0 %v1058_v45  ;;  %v2693_v49 = vpop.f32.mrf.mxu0 }
 0x368   :  { %v3393_v52 = vpop.f32.mrf.mxu0  ;;  %v3395_v53 = vpop.f32.mrf.mxu1 }
 0x369   :  { %v1064_v56 = vsel %vm282_vm3, %v3395_v53, -inf  ;;  %v1061_v57 = vsel %vm282_vm3, %v3393_v52, -inf }
 0x36a   :  { %v2710_v58 = vpop.f32.mrf.mxu1  ;;  %1065 = vmax.xlane.f32.xlu0 %v1064_v56  ;;  %1062 = vmax.xlane.f32.xlu1 %v1061_v57  ;;  %v2704_v59 = vpop.f32.mrf.mxu0 }
 0x36c   :  { %v518_v60 = vpop.f32.mrf.mxu0  ;;  %v566_v61 = vpop.f32.mrf.mxu1 }
 0x36e   :  { %v2705_v62 = vpop.f32.mrf.mxu0  ;;  %v2711_v63 = vpop.f32.mrf.mxu1 }
 0x370   :  { %v3401_v0 = vpop.f32.mrf.mxu0  ;;  %v3403_v1 = vpop.f32.mrf.mxu1 }
 0x371   :  { %v1070_v2 = vsel %vm282_vm3, %v3403_v1, -inf  ;;  %v1067_v3 = vsel %vm282_vm3, %v3401_v0, -inf }
 0x372   :  { %v2722_v4 = vpop.f32.mrf.mxu1  ;;  %1071 = vmax.xlane.f32.xlu0 %v1070_v2  ;;  %1068 = vmax.xlane.f32.xlu1 %v1067_v3  ;;  %v2716_v5 = vpop.f32.mrf.mxu0 }
 0x374   :  { %v614_v6 = vpop.f32.mrf.mxu0  ;;  %v662_v7 = vpop.f32.mrf.mxu1 }
 0x376   :  { %v2717_v8 = vpop.f32.mrf.mxu0  ;;  %v2723_v10 = vpop.f32.mrf.mxu1 }
 0x377   :  { %v3446_v8 = vpop.permute.xlu1 %1338 }
 0x378   :  { %v3409_v14 = vpop.f32.mrf.mxu0  ;;  %v3411_v15 = vpop.f32.mrf.mxu1 }
 0x379   :  { %v1076_v16 = vsel %vm282_vm3, %v3411_v15, -inf  ;;  %v1073_v17 = vsel %vm282_vm3, %v3409_v14, -inf }
 0x37a   :  { %v2734_v18 = vpop.f32.mrf.mxu1  ;;  %1077 = vmax.xlane.f32.xlu0 %v1076_v16  ;;  %1074 = vmax.xlane.f32.xlu1 %v1073_v17  ;;  %v2728_v19 = vpop.f32.mrf.mxu0 }
 0x37b   :  { %v3448_v17 = vpop.permute.xlu1 %1530 }
 0x37c   :  { %v710_v21 = vpop.f32.mrf.mxu0  ;;  %v758_v22 = vpop.f32.mrf.mxu1 }
 0x37e   :  { %v2729_v23 = vpop.f32.mrf.mxu0  ;;  %v2735_v24 = vpop.f32.mrf.mxu1 }
 0x37f   :  { %v3454_v21 = vpop.permute.xlu1 %1434 }
 0x380   :  { %v3419_v26 = vpop.f32.mrf.mxu0  ;;  %v3421_v29 = vpop.f32.mrf.mxu1 }
 0x381   :  { %v1082_v31 = vsel %vm282_vm3, %v3421_v29, -inf  ;;  %v1079_v32 = vsel %vm282_vm3, %v3419_v26, -inf }
 0x382   :  { %v2746_v33 = vpop.f32.mrf.mxu1  ;;  %1083 = vmax.xlane.f32.xlu0 %v1082_v31  ;;  %1080 = vmax.xlane.f32.xlu1 %v1079_v32  ;;  %v2740_v34 = vpop.f32.mrf.mxu0 }
 0x383   :  { %v3458_v23 = vpop.permute.xlu1 %1626 }
 0x384   :  { %v806_v35 = vpop.f32.mrf.mxu0  ;;  %v854_v36 = vpop.f32.mrf.mxu1 }
 0x386   :  { %v2741_v39 = vpop.f32.mrf.mxu0  ;;  %v2747_v40 = vpop.f32.mrf.mxu1 }
 0x388   :  { %v3431_v42 = vpop.f32.mrf.mxu0  ;;  %v3433_v44 = vpop.f32.mrf.mxu1 }
 0x389   :  { %v1088_v45 = vsel %vm282_vm3, %v3433_v44, -inf  ;;  %v1085_v48 = vsel %vm282_vm3, %v3431_v42, -inf }
 0x38a   :  { %v2758_v49 = vpop.f32.mrf.mxu1  ;;  %1089 = vmax.xlane.f32.xlu0 %v1088_v45  ;;  %1086 = vmax.xlane.f32.xlu1 %v1085_v48  ;;  %v2752_v56 = vpop.f32.mrf.mxu0 }
 0x38b   :  { %v1051_v57 = vpop.xlane.xlu0 %1050  ;;  %v1054_v31 = vpop.xlane.xlu1 %1053 }
 0x38c   :  { %v1097_v58 = vsub.f32 %v3377_v27, %v1051_v57  ;;  %v950_v59 = vpop.f32.mrf.mxu1  ;;  %v902_v60 = vpop.f32.mrf.mxu0  ;;  %v1098_v32 = vsub.f32 %v3379_v28, %v1054_v31 }
 0x38e   :  { %v1113_v61 = vmul.f32 1.442695, %v1097_v58  ;;  %v2759_v62 = vpop.f32.mrf.mxu1  ;;  %v2753_v63 = vpop.f32.mrf.mxu0  ;;  %v1115_v34 = vmul.f32 1.442695, %v1098_v32 }
 0x390   :  { %2954 = vpow2.f32 %v1113_v61  ;;  %v3440_v2 = vpop.f32.mrf.mxu1  ;;  %v3442_v3 = vpop.f32.mrf.mxu0 }
 0x391   :  { %v1094_v4 = vsel %vm282_vm3, %v3440_v2, -inf  ;;  %v1091_v22 = vsel %vm282_vm3, %v3442_v3, -inf  ;;  %2956 = vpow2.f32 %v1115_v34 }
 0x392   :  { %v2770_v5 = vpop.f32.mrf.mxu1  ;;  %1095 = vmax.xlane.f32.xlu0 %v1094_v4  ;;  %v2764_v6 = vpop.f32.mrf.mxu0 }
 0x393   :  { %v1057_v24 = vpop.xlane.xlu0 %1056 }
 0x394   :  { %v1046_v7 = vpop.f32.mrf.mxu1  ;;  %v998_v27 = vpop.f32.mrf.mxu0 }
 0x396   :  { %v2771_v10 = vpop.f32.mrf.mxu1  ;;  %v2765_v16 = vpop.f32.mrf.mxu0 }
 0x397   :  { %v1060_v33 = vpop.xlane.xlu0 %1059 }
 0x398   :  { %v1100_v35 = vsub.f32 %v3387_v38, %v1060_v33 }
 0x39a   :  { %v1119_v36 = vmul.f32 1.442695, %v1100_v35 }
 0x39c   :  { %2958 = vpow2.f32 %v1119_v36 }
 0x39d   :  { %v3450_v18 = vpop.eup %2954 }
 0x39e   :  { %v1145_v19 = vsel %vm282_vm3, %v3450_v18, 0.0  ;;  %v3468_v39 = vpop.eup %2956 }
 0x39f   :  { %1146 = vadd.xlane.f32.xlu1 %v1145_v19  ;;  %v1148_v28 = vsel %vm282_vm3, %v3468_v39, 0.0 }
 0x3a3   :  { %1092 = vmax.xlane.f32.xlu1 %v1091_v22 }
 0x3a8   :  { %1674 = vrot.lane.b32.xlu0 %v3237_v43, %s3101_s12  ;;  %v1099_v43 = vsub.f32 %v3385_v37, %v1057_v24 }
 0x3a9   :  { %v3473_v40 = vpop.eup %2958 }
 0x3aa   :  { %v1117_v45 = vmul.f32 1.442695, %v1099_v43 }
 0x3ac   :  { %2960 = vpow2.f32 %v1117_v45 }
 0x3b4   :  { %1722 = vrot.lane.b32.xlu1 %v3243_v46, %s3101_s12  ;;  %v1154_v46 = vsel %vm282_vm3, %v3473_v40, 0.0 }
 0x3b8   :  { %1770 = vrot.lane.b32.xlu1 %v3245_v47, %s3101_s12 }
 0x3b9   :  { %v3477_v38 = vpop.eup %2960 }
 0x3ba   :  { %v1151_v47 = vsel %vm282_vm3, %v3477_v38, 0.0 }
 0x3c7   :  { %1149 = vadd.xlane.f32.xlu0 %v1148_v28 }
 0x3cb   :  { %1155 = vadd.xlane.f32.xlu0 %v1154_v46 }
 0x3dc   :  { %1152 = vadd.xlane.f32.xlu1 %v1151_v47 }
 0x3f3   :  { %v1063_v48 = vpop.xlane.xlu1 %1062  ;;  %v1066_v37 = vpop.xlane.xlu0 %1065 }
 0x3f4   :  { %v1101_v49 = vsub.f32 %v3393_v52, %v1063_v48  ;;  %v1102_v56 = vsub.f32 %v3395_v53, %v1066_v37 }
 0x3f6   :  { %v1121_v57 = vmul.f32 1.442695, %v1101_v49  ;;  %v1123_v58 = vmul.f32 1.442695, %v1102_v56 }
 0x3f8   :  { %2962 = vpow2.f32 %v1121_v57 }
 0x3f9   :  { %2964 = vpow2.f32 %v1123_v58 }
 0x3fb   :  { %v1069_v59 = vpop.xlane.xlu1 %1068  ;;  %v1072_v60 = vpop.xlane.xlu0 %1071 }
 0x3fc   :  { %v1103_v61 = vsub.f32 %v3401_v0, %v1069_v59  ;;  %v1104_v62 = vsub.f32 %v3403_v1, %v1072_v60  ;;  %v1344_v59 = vsel %vm1246_vm4, %v3446_v8, 0 }
 0x3fe   :  { %v1125_v63 = vmul.f32 1.442695, %v1103_v61  ;;  %v1127_v4 = vmul.f32 1.442695, %v1104_v62 }
 0x400   :  { %2966 = vpow2.f32 %v1125_v63 }
 0x401   :  { %2968 = vpow2.f32 %v1127_v4 }
 0x403   :  { %v1075_v5 = vpop.xlane.xlu1 %1074  ;;  %v1078_v6 = vpop.xlane.xlu0 %1077 }
 0x404   :  { %v1105_v52 = vsub.f32 %v3409_v14, %v1075_v5  ;;  %v1106_v53 = vsub.f32 %v3411_v15, %v1078_v6 }
 0x405   :  { %v3487_v7 = vpop.eup %2962 }
 0x406   :  { %v3489_v27 = vpop.eup %2964  ;;  %v1129_v10 = vmul.f32 1.442695, %v1105_v52  ;;  %v1131_v16 = vmul.f32 1.442695, %v1106_v53  ;;  %v1157_v0 = vsel %vm282_vm3, %v3487_v7, 0.0 }
 0x407   :  { %1158 = vadd.xlane.f32.xlu1 %v1157_v0  ;;  %v1160_v1 = vsel %vm282_vm3, %v3489_v27, 0.0 }
 0x408   :  { %2970 = vpow2.f32 %v1129_v10  ;;  %1161 = vadd.xlane.f32.xlu0 %v1160_v1 }
 0x409   :  { %2972 = vpow2.f32 %v1131_v16 }
 0x40b   :  { %v1081_v19 = vpop.xlane.xlu1 %1080  ;;  %v1084_v14 = vpop.xlane.xlu0 %1083 }
 0x40c   :  { %v1107_v15 = vsub.f32 %v3419_v26, %v1081_v19  ;;  %v1108_v22 = vsub.f32 %v3421_v29, %v1084_v14 }
 0x40d   :  { %v3497_v24 = vpop.eup %2966 }
 0x40e   :  { %v3499_v31 = vpop.eup %2968  ;;  %v1133_v32 = vmul.f32 1.442695, %v1107_v15  ;;  %v1135_v33 = vmul.f32 1.442695, %v1108_v22  ;;  %v1163_v34 = vsel %vm282_vm3, %v3497_v24, 0.0 }
 0x40f   :  { %1164 = vadd.xlane.f32.xlu1 %v1163_v34  ;;  %v1166_v35 = vsel %vm282_vm3, %v3499_v31, 0.0  ;;  %v1392_v34 = vsel %vm1246_vm4, %v3417_v20, 0 }
 0x410   :  { %2974 = vpow2.f32 %v1133_v32  ;;  %1167 = vadd.xlane.f32.xlu0 %v1166_v35 }
 0x411   :  { %2976 = vpow2.f32 %v1135_v33 }
 0x413   :  { %v1087_v48 = vpop.xlane.xlu1 %1086  ;;  %v1090_v57 = vpop.xlane.xlu0 %1089 }
 0x414   :  { %v1109_v60 = vsub.f32 %v3431_v42, %v1087_v48  ;;  %v1110_v61 = vsub.f32 %v3433_v44, %v1090_v57 }
 0x415   :  { %v3505_v36 = vpop.eup %2970 }
 0x416   :  { %v3507_v26 = vpop.eup %2972  ;;  %v1169_v29 = vsel %vm282_vm3, %v3505_v36, 0.0  ;;  %v1139_v63 = vmul.f32 1.442695, %v1110_v61  ;;  %v1584_v61 = vsel %vm1246_vm4, %v3423_v30, 0 }
 0x417   :  { %1170 = vadd.xlane.f32.xlu1 %v1169_v29  ;;  %v1172_v43 = vsel %vm282_vm3, %v3507_v26, 0.0 }
 0x418   :  { %1173 = vadd.xlane.f32.xlu0 %v1172_v43  ;;  %v1488_v43 = vsel %vm1246_vm4, %v3429_v41, 0 }
 0x41d   :  { %v3513_v28 = vpop.eup %2974 }
 0x41e   :  { %v3515_v45 = vpop.eup %2976  ;;  %v1175_v46 = vsel %vm282_vm3, %v3513_v28, 0.0 }
 0x41f   :  { %1176 = vadd.xlane.f32.xlu1 %v1175_v46  ;;  %v1178_v47 = vsel %vm282_vm3, %v3515_v45, 0.0 }
 0x420   :  { %1179 = vadd.xlane.f32.xlu0 %v1178_v47 }
 0x428   :  { %v1147_v37 = vpop.xlane.xlu1 %1146 }
 0x429   :  { %2978 = vrcp.f32 %v1147_v37 }
 0x42c   :  { %v1093_v62 = vpop.xlane.xlu1 %1092 }
 0x430   :  { %1866 = vrot.lane.b32.xlu1 %v3257_v51, %s3101_s12  ;;  %v1096_v51 = vpop.xlane.xlu0 %1095  ;;  %v3554_v19 = vpop.permute.xlu1 %1722 }
 0x431   :  { %v1112_v8 = vsub.f32 %v3440_v2, %v1096_v51 }
 0x433   :  { %v1143_v4 = vmul.f32 1.442695, %v1112_v8 }
 0x434   :  { %v3536_v44 = vpop.permute.xlu0 %1674  ;;  %v3557_v22 = vpop.permute.xlu1 %1770 }
 0x435   :  { %v1680_v8 = vsel %vm1246_vm4, %v3536_v44, 0 }
 0x436   :  { %v2979_v49 = vpop.eup %2978  ;;  %1818 = vrot.lane.b32.xlu0 %v3255_v50, %s3101_s12  ;;  %v1137_v50 = vmul.f32 1.442695, %v1109_v60  ;;  %v1536_v60 = vsel %vm1246_vm4, %v3448_v17, 0 }
 0x437   :  { %v1209_v56 = vmul.f32 %v2979_v49, %v3450_v18  ;;  %v1111_v18 = vsub.f32 %v3442_v3, %v1093_v62 }
 0x438   :  { %2980 = vpow2.f32 %v1137_v50 }
 0x439   :  { %v1225_v58 = vpack.c.bf16 %v1209_v56, %v1209_v56  ;;  %v1141_v42 = vmul.f32 1.442695, %v1111_v18  ;;  %2982 = vpow2.f32 %v1139_v63  ;;  %v1632_v63 = vsel %vm1246_vm4, %v3458_v23, 0 }
 0x43b   :  { %2775 = vmatmul.mubr.msk.bf16.vlgmr.msra.gmra.mxu0 %vm282_vm3, %v1225_v58  ;;  %2984 = vpow2.f32 %v1141_v42 }
 0x43c   :  { %2785 = vmatpush3.bf16.msra.mxu0 %v1344_v59  ;;  %2786 = vmatprep.mubr.msk.bf16.mxu0 %vm3107_vm2, %v3104_v25  ;;  %2986 = vpow2.f32 %v1143_v4 }
 0x43d   :  { %2796 = vmatprep.subr.bf16.mxu0 %v3104_v25 }
 0x445   :  { %v3538_v5 = vpop.eup %2980 }
 0x446   :  { %v3540_v52 = vpop.eup %2982  ;;  %v1181_v3 = vsel %vm282_vm3, %v3538_v5, 0.0 }
 0x447   :  { %v1184_v2 = vsel %vm282_vm3, %v3540_v52, 0.0 }
 0x448   :  { %v3544_v53 = vpop.eup %2984 }
 0x449   :  { %v3548_v16 = vpop.eup %2986  ;;  %v1187_v0 = vsel %vm282_vm3, %v3544_v53, 0.0 }
 0x44a   :  { %v1190_v1 = vsel %vm282_vm3, %v3548_v16, 0.0 }
 0x450   :  { %v1150_v6 = vpop.xlane.xlu0 %1149 }
 0x451   :  { %2988 = vrcp.f32 %v1150_v6  ;;  %v1728_v6 = vsel %vm1246_vm4, %v3554_v19, 0 }
 0x454   :  { %1182 = vadd.xlane.f32.xlu1 %v1181_v3  ;;  %v1156_v10 = vpop.xlane.xlu0 %1155  ;;  %v1776_v3 = vsel %vm1246_vm4, %v3557_v22, 0 }
 0x455   :  { %1185 = vadd.xlane.f32.xlu0 %v1184_v2  ;;  %2990 = vrcp.f32 %v1156_v10 }
 0x458   :  { %1188 = vadd.xlane.f32.xlu1 %v1187_v0 }
 0x459   :  { %1191 = vadd.xlane.f32.xlu0 %v1190_v1 }
 0x45e   :  { %v2989_v14 = vpop.eup %2988 }
 0x45f   :  { %v1210_v15 = vmul.f32 %v2989_v14, %v3468_v39 }
 0x461   :  { %v1226_v32 = vpack.c.bf16 %v1210_v15, %v1210_v15 }
 0x462   :  { %v2991_v33 = vpop.eup %2990 }
 0x463   :  { %2781 = vmatmul.mubr.msk.bf16.vlgmr.msra.gmra.mxu1 %vm282_vm3, %v1226_v32  ;;  %v1212_v29 = vmul.f32 %v2991_v33, %v3473_v40 }
 0x464   :  { %2791 = vmatpush3.bf16.msra.mxu1 %v1392_v34  ;;  %2792 = vmatprep.mubr.msk.bf16.mxu1 %vm3107_vm2, %v3104_v25 }
 0x465   :  { %v1153_v35 = vpop.xlane.xlu1 %1152  ;;  %2802 = vmatprep.subr.bf16.mxu1 %v3104_v25  ;;  %v1228_v39 = vpack.c.bf16 %v1212_v29, %v1212_v29 }
 0x466   :  { %2992 = vrcp.f32 %v1153_v35 }
 0x469   :  { %1962 = vrot.lane.b32.xlu1 %v3265_v55, %s3101_s12  ;;  %v1440_v55 = vsel %vm1246_vm4, %v3454_v21, 0 }
 0x46b   :  { %2793 = vmatmul.mubr.msk.bf16.vlgmr.msra.gmra.mxu1 %vm282_vm3, %v1228_v39 }
 0x46c   :  { %2803 = vmatpush3.bf16.msra.mxu1 %v1488_v43  ;;  %2804 = vmatprep.mubr.msk.bf16.mxu1 %vm3107_vm2, %v3104_v25 }
 0x46d   :  { %2814 = vmatprep.subr.bf16.mxu1 %v3104_v25 }
 0x46f   :  { %1914 = vrot.lane.b32.xlu0 %v3263_v54, %s3101_s12  ;;  %s3111_s12 = smov 16  }
 0x473   :  { %v2993_v20 = vpop.eup %2992 }
 0x474   :  { %v1211_v40 = vmul.f32 %v2993_v20, %v3477_v38 }
 0x476   :  { %v1227_v46 = vpack.c.bf16 %v1211_v40, %v1211_v40 }
 0x478   :  { %2787 = vmatmul.mubr.msk.bf16.vlgmr.msra.gmra.mxu0 %vm282_vm3, %v1227_v46 }
 0x479   :  { %2797 = vmatpush3.bf16.msra.mxu0 %v1440_v55  ;;  %2798 = vmatprep.mubr.msk.bf16.mxu0 %vm3107_vm2, %v3104_v25 }
 0x47a   :  { %2808 = vmatprep.subr.bf16.mxu0 %v3104_v25 }
 0x490   :  { %v1159_v41 = vpop.xlane.xlu1 %1158 }
 0x491   :  { %2994 = vrcp.f32 %v1159_v41  ;;  %v1162_v47 = vpop.xlane.xlu0 %1161 }
 0x492   :  { %2996 = vrcp.f32 %v1162_v47 }
 0x498   :  { %v1165_v54 = vpop.xlane.xlu1 %1164 }
 0x499   :  { %2998 = vrcp.f32 %v1165_v54  ;;  %v1168_v48 = vpop.xlane.xlu0 %1167 }
 0x49a   :  { %3000 = vrcp.f32 %v1168_v48 }
 0x49e   :  { %v2995_v38 = vpop.eup %2994 }
 0x49f   :  { %v2997_v37 = vpop.eup %2996  ;;  %v1213_v21 = vmul.f32 %v2995_v38, %v3487_v7 }
 0x4a0   :  { %v1171_v49 = vpop.xlane.xlu1 %1170  ;;  %v1214_v56 = vmul.f32 %v2997_v37, %v3489_v27 }
 0x4a1   :  { %3002 = vrcp.f32 %v1171_v49  ;;  %v1174_v57 = vpop.xlane.xlu0 %1173  ;;  %v1229_v58 = vpack.c.bf16 %v1213_v21, %v1213_v21 }
 0x4a2   :  { %3004 = vrcp.f32 %v1174_v57  ;;  %v1230_v59 = vpack.c.bf16 %v1214_v56, %v1214_v56 }
 0x4a3   :  { %2799 = vmatmul.mubr.msk.bf16.vlgmr.msra.gmra.mxu0 %vm282_vm3, %v1229_v58 }
 0x4a4   :  { %2805 = vmatmul.mubr.msk.bf16.vlgmr.msra.gmra.mxu1 %vm282_vm3, %v1230_v59  ;;  %2809 = vmatpush3.bf16.msra.mxu0 %v1536_v60 }
 0x4a5   :  { %2815 = vmatpush3.bf16.msra.mxu1 %v1584_v61  ;;  %2810 = vmatprep.mubr.msk.bf16.mxu0 %vm3107_vm2, %v3104_v25 }
 0x4a6   :  { %v2999_v7 = vpop.eup %2998  ;;  %2816 = vmatprep.mubr.msk.bf16.mxu1 %vm3107_vm2, %v3104_v25  ;;  %2820 = vmatprep.subr.bf16.mxu0 %v3104_v25 }
 0x4a7   :  { %v3001_v27 = vpop.eup %3000  ;;  %2826 = vmatprep.subr.bf16.mxu1 %v3104_v25  ;;  %v1215_v17 = vmul.f32 %v2999_v7, %v3497_v24 }
 0x4a8   :  { %v1177_v62 = vpop.xlane.xlu1 %1176  ;;  %v1216_v30 = vmul.f32 %v3001_v27, %v3499_v31 }
 0x4a9   :  { %3006 = vrcp.f32 %v1177_v62  ;;  %v1180_v51 = vpop.xlane.xlu0 %1179  ;;  %v1231_v50 = vpack.c.bf16 %v1215_v17, %v1215_v17 }
 0x4aa   :  { %3008 = vrcp.f32 %v1180_v51  ;;  %v1232_v18 = vpack.c.bf16 %v1216_v30, %v1216_v30 }
 0x4ab   :  { %2811 = vmatmul.mubr.msk.bf16.vlgmr.msra.gmra.mxu0 %vm282_vm3, %v1231_v50 }
 0x4ac   :  { %2817 = vmatmul.mubr.msk.bf16.vlgmr.msra.gmra.mxu1 %vm282_vm3, %v1232_v18  ;;  %2821 = vmatpush3.bf16.msra.mxu0 %v1632_v63  ;;  %v1867_v1 = vpop.permute.xlu1 %1866 }
 0x4ad   :  { %2827 = vmatpush3.bf16.msra.mxu1 %v1680_v8  ;;  %2822 = vmatprep.mubr.msk.bf16.mxu0 %vm3107_vm2, %v3104_v25  ;;  %v1819_v10 = vpop.permute.xlu0 %1818  ;;  %v1872_v22 = vsel %vm1246_vm4, %v1867_v1, 0 }
 0x4ae   :  { %v3003_v24 = vpop.eup %3002  ;;  %2828 = vmatprep.mubr.msk.bf16.mxu1 %vm3107_vm2, %v3104_v25  ;;  %2832 = vmatprep.subr.bf16.mxu0 %v3104_v25  ;;  %v1824_v15 = vsel %vm1246_vm4, %v1819_v10, 0 }
 0x4af   :  { %v3005_v31 = vpop.eup %3004  ;;  %2838 = vmatprep.subr.bf16.mxu1 %v3104_v25  ;;  %v1217_v23 = vmul.f32 %v3003_v24, %v3505_v36 }
 0x4b0   :  { %v1218_v42 = vmul.f32 %v3005_v31, %v3507_v26 }
 0x4b1   :  { %v1233_v4 = vpack.c.bf16 %v1217_v23, %v1217_v23 }
 0x4b2   :  { %v1234_v44 = vpack.c.bf16 %v1218_v42, %v1218_v42 }
 0x4b3   :  { %2823 = vmatmul.mubr.msk.bf16.vlgmr.msra.gmra.mxu0 %vm282_vm3, %v1233_v4 }
 0x4b4   :  { %2829 = vmatmul.mubr.msk.bf16.vlgmr.msra.gmra.mxu1 %vm282_vm3, %v1234_v44  ;;  %2833 = vmatpush3.bf16.msra.mxu0 %v1728_v6 }
 0x4b5   :  { %2839 = vmatpush3.bf16.msra.mxu1 %v1776_v3  ;;  %2834 = vmatprep.mubr.msk.bf16.mxu0 %vm3107_vm2, %v3104_v25 }
 0x4b6   :  { %v3007_v36 = vpop.eup %3006  ;;  %2840 = vmatprep.mubr.msk.bf16.mxu1 %vm3107_vm2, %v3104_v25  ;;  %2844 = vmatprep.subr.bf16.mxu0 %v3104_v25 }
 0x4b7   :  { %v3009_v26 = vpop.eup %3008  ;;  %2850 = vmatprep.subr.bf16.mxu1 %v3104_v25  ;;  %v1219_v2 = vmul.f32 %v3007_v36, %v3513_v28 }
 0x4b8   :  { %v1220_v0 = vmul.f32 %v3009_v26, %v3515_v45 }
 0x4b9   :  { %v1235_v19 = vpack.c.bf16 %v1219_v2, %v1219_v2 }
 0x4ba   :  { %v1236_v14 = vpack.c.bf16 %v1220_v0, %v1220_v0 }
 0x4bb   :  { %2835 = vmatmul.mubr.msk.bf16.vlgmr.msra.gmra.mxu0 %vm282_vm3, %v1235_v19 }
 0x4bc   :  { %2841 = vmatmul.mubr.msk.bf16.vlgmr.msra.gmra.mxu1 %vm282_vm3, %v1236_v14  ;;  %2845 = vmatpush3.bf16.msra.mxu0 %v1824_v15 }
 0x4bd   :  { %2851 = vmatpush3.bf16.msra.mxu1 %v1872_v22  ;;  %2846 = vmatprep.mubr.msk.bf16.mxu0 %vm3107_vm2, %v3104_v25 }
 0x4be   :  { %2852 = vmatprep.mubr.msk.bf16.mxu1 %vm3107_vm2, %v3104_v25  ;;  %2856 = vmatprep.subr.bf16.mxu0 %v3104_v25 }
 0x4bf   :  { %2862 = vmatprep.subr.bf16.mxu1 %v3104_v25 }
 0x4dd   :  { %v1183_v28 = vpop.xlane.xlu1 %1182 }
 0x4de   :  { %3010 = vrcp.f32 %v1183_v28  ;;  %v1186_v45 = vpop.xlane.xlu0 %1185 }
 0x4df   :  { %3012 = vrcp.f32 %v1186_v45 }
 0x4e1   :  { %v1189_v32 = vpop.xlane.xlu1 %1188 }
 0x4e2   :  { %3014 = vrcp.f32 %v1189_v32  ;;  %v1192_v33 = vpop.xlane.xlu0 %1191 }
 0x4e3   :  { %3016 = vrcp.f32 %v1192_v33 }
 0x4e5   :  { %v1963_v20 = vpop.permute.xlu1 %1962 }
 0x4e6   :  { %v1915_v39 = vpop.permute.xlu0 %1914  ;;  %v1968_v54 = vsel %vm1246_vm4, %v1963_v20, 0 }
 0x4e7   :  { %v1920_v47 = vsel %vm1246_vm4, %v1915_v39, 0 }
 0x4eb   :  { %v3011_v34 = vpop.eup %3010 }
 0x4ec   :  { %v3013_v35 = vpop.eup %3012  ;;  %v1221_v29 = vmul.f32 %v3011_v34, %v3538_v5 }
 0x4ed   :  { %v1222_v43 = vmul.f32 %v3013_v35, %v3540_v52 }
 0x4ee   :  { %v1237_v40 = vpack.c.bf16 %v1221_v29, %v1221_v29 }
 0x4ef   :  { %v3015_v46 = vpop.eup %3014  ;;  %v1238_v55 = vpack.c.bf16 %v1222_v43, %v1222_v43 }
 0x4f0   :  { %v3017_v41 = vpop.eup %3016  ;;  %2847 = vmatmul.mubr.msk.bf16.vlgmr.msra.gmra.mxu0 %vm282_vm3, %v1237_v40  ;;  %v1223_v5 = vmul.f32 %v3015_v46, %v3544_v53 }
 0x4f1   :  { %2853 = vmatmul.mubr.msk.bf16.vlgmr.msra.gmra.mxu1 %vm282_vm3, %v1238_v55  ;;  %2857 = vmatpush3.bf16.msra.mxu0 %v1920_v47  ;;  %v1224_v52 = vmul.f32 %v3017_v41, %v3548_v16  ;;  %v2946_v55 = vld [vmem:[%s3752_s4 + $0x8] sm:$0xff]   ;;  %v2947_v41 = vld [vmem:[%s3752_s4] sm:$0xff]  }
 0x4f2   :  { %2863 = vmatpush3.bf16.msra.mxu1 %v1968_v54  ;;  %2858 = vmatprep.mubr.msk.bf16.mxu0 %vm3107_vm2, %v3104_v25  ;;  %v1239_v48 = vpack.c.bf16 %v1223_v5, %v1223_v5 }
 0x4f3   :  { %2864 = vmatprep.mubr.msk.bf16.mxu1 %vm3107_vm2, %v3104_v25  ;;  %v1240_v38 = vpack.c.bf16 %v1224_v52, %v1224_v52  ;;  %2868 = vmatprep.subr.bf16.mxu0 %v2946_v55 }
 0x4f8   :  { %2859 = vmatmul.mubr.msk.bf16.vlgmr.msra.gmra.mxu0 %vm282_vm3, %v1239_v48 }
 0x4f9   :  { %2865 = vmatmul.mubr.msk.bf16.vlgmr.msra.gmra.mxu1 %vm282_vm3, %v1240_v38  ;;  %2869 = vmatpush3.bf16.msra.mxu0 %v2946_v55 }
 0x4fa   :  { %2870 = vmatprep.subr.bf16.mxu0 %v2947_v41 }
 0x4fb   :  { %v3651_v37 = vpop.f32.mrf.mxu0 }
 0x4fd   :  { %v2776_v21 = vpop.f32.mrf.mxu0  ;;  %2871 = vmatpush3.bf16.msra.mxu0 %v2947_v41 }
 0x4ff   :  { %v1287_v49 = vpop.f32.mrf.mxu0 }
 0x501   :  { %v2777_v56 = vpop.f32.mrf.mxu0 }
 0x523   :  { %v3653_v57 = vpop.f32.mrf.mxu1 }
 0x525   :  { %v2782_v58 = vpop.f32.mrf.mxu1 }
 0x527   :  { %v1335_v53 = vpop.f32.mrf.mxu1 }
 0x529   :  { %v2783_v59 = vpop.f32.mrf.mxu1 }
 0x52b   :  { %v3655_v60 = vpop.f32.mrf.mxu1 }
 0x52d   :  { %v2794_v25 = vpop.f32.mrf.mxu1 }
 0x52f   :  { %v1431_v16 = vpop.f32.mrf.mxu1 }
 0x531   :  { %v2795_v61 = vpop.f32.mrf.mxu1 }
 0x538   :  { %v3657_v7 = vpop.f32.mrf.mxu0 }
 0x53a   :  { %v2788_v27 = vpop.f32.mrf.mxu0 }
 0x53c   :  { %v1383_v17 = vpop.f32.mrf.mxu0 }
 0x53e   :  { %v2789_v62 = vpop.f32.mrf.mxu0 }
 0x563   :  { %v1476_v30 = vpop.f32.mrf.mxu0 }
 0x564   :  { %v1524_v51 = vpop.f32.mrf.mxu1 }
 0x565   :  { %v2911_v50 = vpack.i.bf16 %v1524_v51, %v1476_v30  ;;  %v2800_v18 = vpop.f32.mrf.mxu0 }
 0x566   :  { %v2806_v63 = vpop.f32.mrf.mxu1 }
 0x567   :  { %2912 = vrot.lane.b32.xlu0 %v2911_v50, %s3110_s11  ;;  %v1479_v8 = vpop.f32.mrf.mxu0 }
 0x568   :  { %v1527_v24 = vpop.f32.mrf.mxu1 }
 0x569   :  { %v2801_v31 = vpop.f32.mrf.mxu0 }
 0x56a   :  { %v2807_v23 = vpop.f32.mrf.mxu1 }
 0x56b   :  { %v1572_v42 = vpop.f32.mrf.mxu0 }
 0x56c   :  { %v1620_v4 = vpop.f32.mrf.mxu1 }
 0x56d   :  { %v2916_v44 = vpack.i.bf16 %v1620_v4, %v1572_v42  ;;  %v2812_v6 = vpop.f32.mrf.mxu0 }
 0x56e   :  { %v2818_v3 = vpop.f32.mrf.mxu1 }
 0x56f   :  { %2917 = vrot.lane.b32.xlu1 %v2916_v44, %s3110_s11  ;;  %v1575_v36 = vpop.f32.mrf.mxu0 }
 0x570   :  { %v1623_v26 = vpop.f32.mrf.mxu1 }
 0x571   :  { %v2813_v2 = vpop.f32.mrf.mxu0 }
 0x572   :  { %v2819_v10 = vpop.f32.mrf.mxu1 }
 0x573   :  { %v1668_v0 = vpop.f32.mrf.mxu0 }
 0x574   :  { %v1716_v1 = vpop.f32.mrf.mxu1 }
 0x575   :  { %v2921_v19 = vpack.i.bf16 %v1716_v1, %v1668_v0  ;;  %v2824_v14 = vpop.f32.mrf.mxu0 }
 0x576   :  { %v2830_v15 = vpop.f32.mrf.mxu1 }
 0x577   :  { %2922 = vrot.lane.b32.xlu0 %v2921_v19, %s3111_s12  ;;  %v1671_v22 = vpop.f32.mrf.mxu0 }
 0x578   :  { %v1719_v28 = vpop.f32.mrf.mxu1 }
 0x579   :  { %v2825_v45 = vpop.f32.mrf.mxu0 }
 0x57a   :  { %v2831_v32 = vpop.f32.mrf.mxu1 }
 0x57b   :  { %v1764_v33 = vpop.f32.mrf.mxu0 }
 0x57c   :  { %v1812_v34 = vpop.f32.mrf.mxu1 }
 0x57d   :  { %v2926_v35 = vpack.i.bf16 %v1812_v34, %v1764_v33  ;;  %v2836_v29 = vpop.f32.mrf.mxu0 }
 0x57e   :  { %v2842_v39 = vpop.f32.mrf.mxu1 }
 0x57f   :  { %2927 = vrot.lane.b32.xlu1 %v2926_v35, %s3111_s12  ;;  %v1767_v43 = vpop.f32.mrf.mxu0  ;;  %s3113_s12 = smov [#allocation7]  }
 0x580   :  { %v1815_v20 = vpop.f32.mrf.mxu1  ;;  %s2480_s13 = sshll.u32 %s3113_s12, 4  ;;  %s2481_s13 = int_to_ptr.vmem [resolvable:$true] %s2480_s13 }
 0x581   :  { %v2837_v40 = vpop.f32.mrf.mxu0  ;;  %p3079_p11 = scmp.lt.s32.totalorder %s2481_s13, %s2481_s13 }
 0x582   :  { %v2843_v46 = vpop.f32.mrf.mxu1 }
 0x5b0   :  { %v1860_v47 = vpop.f32.mrf.mxu0 }
 0x5b1   :  { %v1908_v54 = vpop.f32.mrf.mxu1 }
 0x5b2   :  { %v2931_v5 = vpack.i.bf16 %v1908_v54, %v1860_v47  ;;  %v2848_v52 = vpop.f32.mrf.mxu0 }
 0x5b3   :  { %v2854_v48 = vpop.f32.mrf.mxu1 }
 0x5b4   :  { %2932 = vrot.lane.b32.xlu0 %v2931_v5, %s3112_s17  ;;  %v1863_v38 = vpop.f32.mrf.mxu0 }
 0x5b5   :  { %v1911_v21 = vpop.f32.mrf.mxu1 }
 0x5b6   :  { %v2849_v49 = vpop.f32.mrf.mxu0 }
 0x5b7   :  { %v2855_v56 = vpop.f32.mrf.mxu1 }
 0x5b8   :  { %v1956_v58 = vpop.f32.mrf.mxu0 }
 0x5b9   :  { %v2004_v53 = vpop.f32.mrf.mxu1 }
 0x5ba   :  { %v2936_v59 = vpack.i.bf16 %v2004_v53, %v1956_v58  ;;  %v2860_v25 = vpop.f32.mrf.mxu0 }
 0x5bb   :  { %v2866_v16 = vpop.f32.mrf.mxu1 }
 0x5bc   :  { %2937 = vrot.lane.b32.xlu1 %v2936_v59, %s3112_s17  ;;  %v1959_v61 = vpop.f32.mrf.mxu0 }
 0x5bd   :  { %v2007_v27 = vpop.f32.mrf.mxu1 }
 0x5be   :  { %v2861_v17 = vpop.f32.mrf.mxu0 }
 0x5bf   :  { %v2867_v62 = vpop.f32.mrf.mxu1 }
 0x5d9   :  { %v2913_v30 = vpop.permute.xlu0 %2912 }
 0x5da   :  { %v2915_v50 = vunpack.i.h.bf16 %v2913_v30  ;;  %v2914_v18 = vunpack.i.l.bf16 %v2913_v30 }
 0x5dc   :  { %v2059_v23 = vsel %vm282_vm3, %v3653_v57, %v2915_v50  ;;  %v2058_v42 = vsel %vm282_vm3, %v3651_v37, %v2914_v18 }
 0x5e1   :  { %v2918_v24 = vpop.permute.xlu1 %2917 }
 0x5e2   :  { %v2920_v0 = vunpack.i.h.bf16 %v2918_v24  ;;  %v2919_v1 = vunpack.i.l.bf16 %v2918_v24  ;;  %v2949_v24 = vld [vmem:[#allocation5] sm:$0xff]  }
 0x5e4   :  { %v2061_v37 = vsel %vm282_vm3, %v3655_v60, %v2920_v0  ;;  %v2060_v15 = vsel %vm282_vm3, %v3657_v7, %v2919_v1  ;;  %v2552_v60 = vld [vmem:[%s3756_s8 + $0x1] ss:$0 sm:$0xff] }
 0x5e9   :  { %v2923_v51 = vpop.permute.xlu0 %2922 }
 0x5ea   :  { %v2925_v63 = vunpack.i.h.bf16 %v2923_v51  ;;  %v2924_v8 = vunpack.i.l.bf16 %v2923_v51 }
 0x5ec   :  { %v2062_v6 = vsel %vm95_vm0, %v2058_v42, %v2924_v8  ;;  %v2063_v3 = vsel %vm95_vm0, %v2059_v23, %v2925_v63  ;;  %v2948_v8 = vld [vmem:[#allocation5 + $0x8] sm:$0xff]  }
 0x5ed   :  { %2876 = vmatprep.subr.bf16.mxu1 %v2948_v8 }
 0x5ee   :  { %2877 = vmatpush3.bf16.msra.mxu1 %v2948_v8 }
 0x5ef   :  { %2878 = vmatprep.subr.bf16.mxu1 %v2949_v24 }
 0x5f1   :  { %v2928_v36 = vpop.permute.xlu1 %2927 }
 0x5f2   :  { %v2930_v19 = vunpack.i.h.bf16 %v2928_v36  ;;  %v2929_v14 = vunpack.i.l.bf16 %v2928_v36  ;;  %2879 = vmatpush3.bf16.msra.mxu1 %v2949_v24 }
 0x5f4   :  { %v2065_v45 = vsel %vm95_vm0, %v2061_v37, %v2930_v19  ;;  %v2064_v32 = vsel %vm95_vm0, %v2060_v15, %v2929_v14 }
 0x626   :  { %v2933_v31 = vpop.permute.xlu0 %2932 }
 0x627   :  { %v2935_v4 = vunpack.i.h.bf16 %v2933_v31  ;;  %v2934_v44 = vunpack.i.l.bf16 %v2933_v31  ;;  %v2950_v31 = vld [vmem:[%s3755_s7 + $0x18] sm:$0xff]  }
 0x628   :  { %2884 = vmatprep.subr.bf16.mxu0 %v2950_v31 }
 0x629   :  { %v2067_v26 = vsel %vm2066_vm5, %v2062_v6, %v2934_v44  ;;  %v2068_v2 = vsel %vm2066_vm5, %v2063_v3, %v2935_v4 }
 0x62a   :  { %v2071_v10 = vpack.c.bf16 %v2068_v2, %v2067_v26 }
 0x62c   :  { %2872 = vmatprep.mubr.msk.bf16.mxu0 %vm176_vm1, %v2071_v10 }
 0x62e   :  { %v2938_v57 = vpop.permute.xlu1 %2937 }
 0x62f   :  { %v2940_v22 = vunpack.i.h.bf16 %v2938_v57  ;;  %v2939_v28 = vunpack.i.l.bf16 %v2938_v57  ;;  %v2557_v57 = vld [vmem:[%s3756_s8 + $0x2] ss:$0 sm:$0xff] }
 0x631   :  { %v2070_v33 = vsel %vm2066_vm5, %v2065_v45, %v2940_v22  ;;  %v2069_v34 = vsel %vm2066_vm5, %v2064_v32, %v2939_v28  ;;  %v2558_v32 = vld [vmem:[%s3756_s8 + $0x3] ss:$0 sm:$0xff] }
 0x632   :  { %v2072_v35 = vpack.c.bf16 %v2070_v33, %v2069_v34 }
 0x634   :  { %2873 = vmatmul.mubr.msk.bf16.vlgmr.msra.gmra.mxu0 %vm176_vm1, %v2072_v35 }
 0x635   :  { %2885 = vmatpush3.bf16.msra.mxu0 %v2950_v31 }
 0x6f4   :  { %v2874_v29 = vpop.f32.mrf.mxu0 }
 0x6f5   :  { %v2142_v7 = vadd.f32 %v2874_v29, %v2552_v60 }
 0x6f6   :  { %v2133_v39 = vpop.f32.mrf.mxu0 }
 0x6f7   :  { %v2134_v43 = vadd.f32 %v2552_v60, %v2133_v39  ;;  %v2150_v54 = vadd.f32 %v2142_v7, %v3198_v13 }
 0x6f8   :  { %v2875_v20 = vpop.f32.mrf.mxu0 }
 0x6f9   :  { %v2148_v40 = vadd.f32 %v2134_v43, %v3194_v11  ;;  %v2145_v55 = vadd.f32 %v2875_v20, %v2552_v60  ;;  %v2158_v48 = vsel %vm176_vm1, %v2150_v54, 0.0 }
 0x6fa   :  { %v2136_v46 = vpop.f32.mrf.mxu0 }
 0x6fb   :  { %v2137_v41 = vadd.f32 %v2552_v60, %v2136_v46  ;;  %v2152_v47 = vsel %vm176_vm1, %v2148_v40, 0.0  ;;  %v2151_v38 = vadd.f32 %v2145_v55, %v3192_v9  ;;  %v2951_v55 = vld [vmem:[%s3755_s7 + $0x10] sm:$0xff]  }
 0x6fc   :  { %2153 = vadd.xlane.f32.xlu0 %v2152_v47  ;;  %2886 = vmatprep.subr.bf16.mxu0 %v2951_v55  ;;  %v2953_v47 = vld [vmem:[%s3755_s7] sm:$0xff]  }
 0x6fd   :  { %v2149_v5 = vadd.f32 %v2137_v41, %v3196_v12  ;;  %v2161_v11 = vsel %vm176_vm1, %v2151_v38, 0.0  ;;  %2887 = vmatpush3.bf16.msra.mxu0 %v2951_v55  ;;  %v2952_v41 = vld [vmem:[%s3755_s7 + $0x8] sm:$0xff]  }
 0x6fe   :  { %2888 = vmatprep.subr.bf16.mxu0 %v2952_v41 }
 0x6ff   :  { %v2155_v52 = vsel %vm176_vm1, %v2149_v5, 0.0 }
 0x700   :  { %2156 = vadd.xlane.f32.xlu1 %v2155_v52  ;;  %2159 = vadd.xlane.f32.xlu0 %v2158_v48  ;;  %v2559_v52 = vld [vmem:[%s3754_s6] ss:$0 sm:$0xff] }
 0x701   :  { %2889 = vmatpush3.bf16.msra.mxu0 %v2952_v41 }
 0x702   :  { %2890 = vmatprep.subr.bf16.mxu0 %v2953_v47 }
 0x704   :  { %2162 = vadd.xlane.f32.xlu0 %v2161_v11 }
 0x705   :  { %2891 = vmatpush3.bf16.msra.mxu0 %v2953_v47 }
 0x785   :  { %v2154_v21 = vpop.xlane.xlu0 %2153 }
 0x786   :  { %v2165_v49 = vmul.f32 0.03125, %v2154_v21 }
 0x788   :  { %v2169_v56 = vsub.f32 %v2148_v40, %v2165_v49 }
 0x789   :  { %v2157_v58 = vpop.xlane.xlu1 %2156  ;;  %v2160_v53 = vpop.xlane.xlu0 %2159 }
 0x78a   :  { %v2166_v13 = vmul.f32 0.03125, %v2157_v58  ;;  %v2167_v59 = vmul.f32 0.03125, %v2160_v53  ;;  %v2173_v25 = vmul.f32 %v2169_v56, %v2169_v56 }
 0x78c   :  { %v2170_v12 = vsub.f32 %v2149_v5, %v2166_v13  ;;  %v2171_v16 = vsub.f32 %v2150_v54, %v2167_v59  ;;  %v2177_v61 = vsel %vm176_vm1, %v2173_v25, 0.0 }
 0x78d   :  { %2178 = vadd.xlane.f32.xlu1 %v2177_v61  ;;  %v2163_v27 = vpop.xlane.xlu0 %2162  ;;  %v2564_v61 = vld [vmem:[%s3756_s8 + $0x4] ss:$0 sm:$0xff] }
 0x78e   :  { %v2168_v9 = vmul.f32 0.03125, %v2163_v27  ;;  %v2174_v17 = vmul.f32 %v2170_v12, %v2170_v12  ;;  %v2175_v62 = vmul.f32 %v2171_v16, %v2171_v16 }
 0x790   :  { %v2172_v30 = vsub.f32 %v2151_v38, %v2168_v9  ;;  %v2180_v51 = vsel %vm176_vm1, %v2174_v17, 0.0  ;;  %v2183_v50 = vsel %vm176_vm1, %v2175_v62, 0.0 }
 0x791   :  { %2181 = vadd.xlane.f32.xlu0 %v2180_v51  ;;  %2184 = vadd.xlane.f32.xlu1 %v2183_v50 }
 0x792   :  { %v2176_v18 = vmul.f32 %v2172_v30, %v2172_v30 }
 0x794   :  { %v2186_v63 = vsel %vm176_vm1, %v2176_v18, 0.0 }
 0x795   :  { %2187 = vadd.xlane.f32.xlu0 %v2186_v63 }
 0x816   :  { %v2179_v23 = vpop.xlane.xlu1 %2178 }
 0x817   :  { %v2189_v42 = vmul.f32 0.03125, %v2179_v23 }
 0x819   :  { %v2193_v4 = vadd.f32 1e-05, %v2189_v42 }
 0x81a   :  { %v2185_v44 = vpop.xlane.xlu1 %2184  ;;  %v2182_v6 = vpop.xlane.xlu0 %2181 }
 0x81b   :  { %3018 = vrsqrt.f32 %v2193_v4  ;;  %v2191_v3 = vmul.f32 0.03125, %v2185_v44  ;;  %v2190_v36 = vmul.f32 0.03125, %v2182_v6 }
 0x81d   :  { %v2195_v26 = vadd.f32 1e-05, %v2191_v3  ;;  %v2194_v2 = vadd.f32 1e-05, %v2190_v36 }
 0x81e   :  { %v2188_v10 = vpop.xlane.xlu0 %2187 }
 0x81f   :  { %3020 = vrsqrt.f32 %v2195_v26  ;;  %v2192_v0 = vmul.f32 0.03125, %v2188_v10 }
 0x820   :  { %3022 = vrsqrt.f32 %v2194_v2 }
 0x821   :  { %v2196_v1 = vadd.f32 1e-05, %v2192_v0 }
 0x823   :  { %3024 = vrsqrt.f32 %v2196_v1 }
 0x828   :  { %v3019_v19 = vpop.eup %3018 }
 0x829   :  { %v2201_v14 = vmul.f32 %v3019_v19, %v2169_v56 }
 0x82b   :  { %v2209_v45 = vmul.f32 %v2557_v57, %v2201_v14 }
 0x82c   :  { %v3021_v37 = vpop.eup %3020 }
 0x82d   :  { %v3023_v15 = vpop.eup %3022  ;;  %v2203_v22 = vmul.f32 %v3021_v37, %v2171_v16  ;;  %v2217_v60 = vadd.f32 %v2558_v32, %v2209_v45 }
 0x82e   :  { %v2202_v28 = vmul.f32 %v3023_v15, %v2170_v12 }
 0x82f   :  { %v2211_v29 = vmul.f32 %v2557_v57, %v2203_v22 }
 0x830   :  { %v3025_v33 = vpop.eup %3024  ;;  %v2210_v34 = vmul.f32 %v2557_v57, %v2202_v28 }
 0x831   :  { %v2204_v35 = vmul.f32 %v3025_v33, %v2172_v30  ;;  %v2219_v20 = vadd.f32 %v2558_v32, %v2211_v29 }
 0x832   :  { %v2218_v39 = vadd.f32 %v2558_v32, %v2210_v34 }
 0x833   :  { %v2212_v7 = vmul.f32 %v2557_v57, %v2204_v35 }
 0x834   :  { %v2221_v43 = vpack.c.bf16 %v2218_v39, %v2217_v60 }
 0x835   :  { %v2220_v40 = vadd.f32 %v2558_v32, %v2212_v7 }
 0x836   :  { %2880 = vmatprep.mubr.msk.bf16.mxu1 %vm176_vm1, %v2221_v43 }
 0x837   :  { %v2222_v46 = vpack.c.bf16 %v2220_v40, %v2219_v20 }
 0x839   :  { %2881 = vmatmul.mubr.msk.bf16.vlgmr.msra.gmra.mxu1 %vm176_vm1, %v2222_v46 }
 0x8f9   :  { %v2882_v54 = vpop.f32.mrf.mxu1 }
 0x8fa   :  { %v2295_v21 = vadd.f32 %v2882_v54, %v2559_v52 }
 0x8fb   :  { %v2286_v5 = vpop.f32.mrf.mxu1 }
 0x8fc   :  { %v2287_v38 = vadd.f32 %v2559_v52, %v2286_v5  ;;  %v2303_v59 = vmax.f32 %v2295_v21, 0.0  ;;  %v2571_v5 = vld [vmem:[%s3756_s8 + $0x5] ss:$0 sm:$0xff] }
 0x8fd   :  { %v2883_v48 = vpop.f32.mrf.mxu1 }
 0x8fe   :  { %v2298_v11 = vadd.f32 %v2883_v48, %v2559_v52  ;;  %v2301_v53 = vmax.f32 %v2287_v38, 0.0  ;;  %v2572_v48 = vld [vmem:[%s3756_s8 + $0x6] ss:$0 sm:$0xff]  ;;  %s3074_s8 = scalar_lea.vmem %s2481_s13, 512 }
 0x8ff   :  { %v2289_v49 = vpop.f32.mrf.mxu1  ;;  %p3075_p10 = scmp.ne.s32.totalorder %s2481_s13, %s3074_s8  ;;  %p3080_p12 = scmp.lt.s32.totalorder %s3074_s8, %s3074_s8 }
 0x900   :  { %v2290_v56 = vadd.f32 %v2559_v52, %v2289_v49  ;;  %v2304_v58 = vmax.f32 %v2298_v11, 0.0 }
 0x901   :  { %p3081_p13 = por %p3080_p12, %p3079_p11 }
 0x902   :  { %v2302_v13 = vmax.f32 %v2290_v56, 0.0  ;;  %v2306_v12 = vpack.c.bf16 %v2304_v58, %v2303_v59 }
 0x903   :  { %p3082_p0 = pnand %p3081_p13, %p3075_p10 }
 0x904   :  { %v2305_v25 = vpack.c.bf16 %v2302_v13, %v2301_v53 }
 0x906   :  { %2892 = vmatprep.mubr.msk.bf16.mxu0 %vm2343_vm6, %v2305_v25 }
 0x907   :  { %2893 = vmatmul.mubr.msk.bf16.vlgmr.msra.gmra.mxu0 %vm2343_vm6, %v2306_v12 }
 0x9c7   :  { %v2894_v16 = vpop.f32.mrf.mxu0 }
 0x9c8   :  { %v2393_v9 = vadd.f32 %v2894_v16, %v2564_v61 }
 0x9c9   :  { %v2384_v27 = vpop.f32.mrf.mxu0 }
 0x9ca   :  { %v2385_v17 = vadd.f32 %v2564_v61, %v2384_v27  ;;  %v2401_v8 = vadd.f32 %v2393_v9, %v2219_v20 }
 0x9cb   :  { %v2895_v62 = vpop.f32.mrf.mxu0 }
 0x9cc   :  { %v2399_v30 = vadd.f32 %v2385_v17, %v2217_v60  ;;  %v2396_v50 = vadd.f32 %v2895_v62, %v2564_v61  ;;  %v2409_v23 = vsel %vm176_vm1, %v2401_v8, 0.0 }
 0x9cd   :  { %v2387_v51 = vpop.f32.mrf.mxu0 }
 0x9ce   :  { %v2388_v18 = vadd.f32 %v2564_v61, %v2387_v51  ;;  %v2403_v63 = vsel %vm176_vm1, %v2399_v30, 0.0  ;;  %v2402_v42 = vadd.f32 %v2396_v50, %v2220_v40 }
 0x9cf   :  { %2404 = vadd.xlane.f32.xlu1 %v2403_v63 }
 0x9d0   :  { %v2400_v24 = vadd.f32 %v2388_v18, %v2218_v39  ;;  %v2412_v4 = vsel %vm176_vm1, %v2402_v42, 0.0 }
 0x9d2   :  { %v2406_v31 = vsel %vm176_vm1, %v2400_v24, 0.0 }
 0x9d3   :  { %2407 = vadd.xlane.f32.xlu0 %v2406_v31  ;;  %2410 = vadd.xlane.f32.xlu1 %v2409_v23 }
 0x9d7   :  { %2413 = vadd.xlane.f32.xlu0 %v2412_v4 }
 0xa58   :  { %v2405_v44 = vpop.xlane.xlu1 %2404 }
 0xa59   :  { %v2415_v6 = vmul.f32 0.03125, %v2405_v44 }
 0xa5b   :  { %v2419_v3 = vsub.f32 %v2399_v30, %v2415_v6 }
 0xa5c   :  { %v2408_v36 = vpop.xlane.xlu0 %2407  ;;  %v2411_v26 = vpop.xlane.xlu1 %2410 }
 0xa5d   :  { %v2416_v2 = vmul.f32 0.03125, %v2408_v36  ;;  %v2417_v10 = vmul.f32 0.03125, %v2411_v26  ;;  %v2423_v0 = vmul.f32 %v2419_v3, %v2419_v3 }
 0xa5f   :  { %v2420_v1 = vsub.f32 %v2400_v24, %v2416_v2  ;;  %v2421_v19 = vsub.f32 %v2401_v8, %v2417_v10  ;;  %v2427_v14 = vsel %vm176_vm1, %v2423_v0, 0.0 }
 0xa60   :  { %v2414_v57 = vpop.xlane.xlu0 %2413  ;;  %2428 = vadd.xlane.f32.xlu1 %v2427_v14 }
 0xa61   :  { %v2418_v37 = vmul.f32 0.03125, %v2414_v57  ;;  %v2424_v15 = vmul.f32 %v2420_v1, %v2420_v1  ;;  %v2425_v22 = vmul.f32 %v2421_v19, %v2421_v19 }
 0xa63   :  { %v2422_v28 = vsub.f32 %v2402_v42, %v2418_v37  ;;  %v2430_v45 = vsel %vm176_vm1, %v2424_v15, 0.0  ;;  %v2433_v32 = vsel %vm176_vm1, %v2425_v22, 0.0 }
 0xa64   :  { %2431 = vadd.xlane.f32.xlu0 %v2430_v45  ;;  %2434 = vadd.xlane.f32.xlu1 %v2433_v32 }
 0xa65   :  { %v2426_v33 = vmul.f32 %v2422_v28, %v2422_v28 }
 0xa67   :  { %v2436_v34 = vsel %vm176_vm1, %v2426_v33, 0.0 }
 0xa68   :  { %2437 = vadd.xlane.f32.xlu0 %v2436_v34 }
 0xae9   :  { %v2429_v35 = vpop.xlane.xlu1 %2428 }
 0xaea   :  { %v2439_v29 = vmul.f32 0.03125, %v2429_v35 }
 0xaec   :  { %v2443_v60 = vadd.f32 1e-05, %v2439_v29 }
 0xaed   :  { %v2432_v39 = vpop.xlane.xlu0 %2431  ;;  %v2435_v7 = vpop.xlane.xlu1 %2434 }
 0xaee   :  { %3026 = vrsqrt.f32 %v2443_v60  ;;  %v2440_v43 = vmul.f32 0.03125, %v2432_v39  ;;  %v2441_v20 = vmul.f32 0.03125, %v2435_v7 }
 0xaf0   :  { %v2444_v40 = vadd.f32 1e-05, %v2440_v43  ;;  %v2445_v46 = vadd.f32 1e-05, %v2441_v20 }
 0xaf1   :  { %v2438_v55 = vpop.xlane.xlu0 %2437 }
 0xaf2   :  { %3028 = vrsqrt.f32 %v2444_v40  ;;  %v2442_v41 = vmul.f32 0.03125, %v2438_v55 }
 0xaf3   :  { %3030 = vrsqrt.f32 %v2445_v46 }
 0xaf4   :  { %v2446_v47 = vadd.f32 1e-05, %v2442_v41 }
 0xaf6   :  { %3032 = vrsqrt.f32 %v2446_v47 }
 0xafb   :  { %v3027_v54 = vpop.eup %3026 }
 0xafc   :  { %v2451_v52 = vmul.f32 %v3027_v54, %v2419_v3 }
 0xafe   :  { %v2459_v38 = vmul.f32 %v2571_v5, %v2451_v52 }
 0xaff   :  { %v3029_v11 = vpop.eup %3028 }
 0xb00   :  { %v3031_v21 = vpop.eup %3030  ;;  %v2467_v49 = vadd.f32 %v2572_v48, %v2459_v38  ;;  %v2452_v56 = vmul.f32 %v3029_v11, %v2420_v1 }
 0xb01   :  { %v2453_v58 = vmul.f32 %v3031_v21, %v2421_v19 }
 0xb02   :  { %2471 = vst.msk [vmem:[#allocation7] sm:$0xff] %vm176_vm1, %v2467_v49  ;;  %v2460_v53 = vmul.f32 %v2571_v5, %v2452_v56 }
 0xb03   :  { %v3033_v13 = vpop.eup %3032  ;;  %v2461_v59 = vmul.f32 %v2571_v5, %v2453_v58 }
 0xb04   :  { %v2468_v25 = vadd.f32 %v2572_v48, %v2460_v53  ;;  %v2454_v12 = vmul.f32 %v3033_v13, %v2422_v28 }
 0xb05   :  { %v2469_v16 = vadd.f32 %v2572_v48, %v2461_v59 }
 0xb06   :  { %2472 = vst.msk [vmem:[#allocation7 + $0x8] sm:$0xff] %vm176_vm1, %v2468_v25  ;;  %v2462_v61 = vmul.f32 %v2571_v5, %v2454_v12 }
 0xb07   :  { %2473 = vst.msk [vmem:[#allocation7 + $0x10] sm:$0xff] %vm176_vm1, %v2469_v16 }
 0xb08   :  { %v2470_v27 = vadd.f32 %v2572_v48, %v2462_v61 }
 0xb0a   :  { %2474 = vst.msk [vmem:[#allocation7 + $0x18] sm:$0xff] %vm176_vm1, %v2470_v27 }
 0xb0b   :  { %3085 = shalt.err (!%p3082_p0)
}
 0xb0c   :  { %s3114_s14 = smov 128  }
 0xb0d   :  { %2486 = dma.vmem_to_hbm [thread:$0]  %s2481_s13, 512, %s3757_s9, [#allocation4], %s3114_s14, %s3114_s14, %s3110_s11  }
 0xb0e   :  { %3098 = dma.done.wait [#allocation4], 512  }
 0xb0f   :  { %3099 = vsyncadd [#allocation4], 4294966784 }
 0xb10   :  { %2490 = vsyncpa [#allocation3], 1 }
 0xb11   :  { %2491 = vsyncpa [#allocation6], 1 }
 0xb12   :  { %2492 = vsyncpa [#allocation4], 1 }

// kernel: tpu_custom_call.1
= control target key start
LH: loop header
LB: loop body
LE: loop exit
PB: predicated region body
PF: predicated region fallthrough
CT: control target
= control target key end

     0   :  { %14 = vsyncpa [#allocation3], 0  ;;  %s3748_s0 = inlined_call_operand.vmem [shape: bf16[4,8,16], index: 0, kind: input, shape index: {}]   ;;  %s3749_s1 = inlined_call_operand.hbm [shape: bf16[16,32], index: 1, kind: input, shape index: {}]   ;;  %s3750_s2 = inlined_call_operand.vmem [shape: bf16[32,96], index: 2, kind: input, shape index: {}]   ;;  %s3751_s3 = inlined_call_operand.vmem [shape: f32[1,96], index: 3, kind: input, shape index: {}]   ;;  %s3752_s4 = inlined_call_operand.vmem [shape: bf16[32,32], index: 4, kind: input, shape index: {}]   ;;  %s3753_s5 = inlined_call_operand.hbm [shape: bf16[32,64], index: 5, kind: input, shape index: {}]   ;;  %s3754_s6 = inlined_call_operand.vmem [shape: f32[1,64], index: 6, kind: input, shape index: {}]   ;;  %s3755_s7 = inlined_call_operand.vmem [shape: bf16[64,32], index: 7, kind: input, shape index: {}]   ;;  %s3756_s8 = inlined_call_operand.vmem [shape: f32[7,32], index: 8, kind: input, shape index: {}]   ;;  %s3757_s9 = inlined_call_operand.hbm [shape: f32[4,8,32], index: 9, kind: output, shape index: {}]  }
   0x1   :  { %15 = vsyncpa [#allocation6], 0 }
   0x2   :  { %16 = vsyncpa [#allocation4], 0  ;;  %s3100_s30 = smov [#allocation2]  }
   0x3   :  { %s24_s10 = sshll.u32 %s3100_s30, 4  ;;  %s25_s10 = int_to_ptr.vmem [resolvable:$true] %s24_s10 }
   0x4   :  { %s3042_s11 = scalar_lea.vmem %s25_s10, 128  ;;  %p3047_p1 = scmp.lt.s32.totalorder %s25_s10, %s25_s10 }
   0x5   :  { %p3043_p0 = scmp.ne.s32.totalorder %s25_s10, %s3042_s11  ;;  %p3048_p2 = scmp.lt.s32.totalorder %s3042_s11, %s3042_s11 }
   0x7   :  { %p3049_p3 = por %p3048_p2, %p3047_p1 }
   0x9   :  { %p3050_p4 = pnand %p3049_p3, %p3043_p0 }
   0xb   :  { %3053 = shalt.err (!%p3050_p4)
}
   0xc   :  { %s3101_s12 = smov 64   ;;  %s3102_s13 = smov 4  }
   0xd   :  { %30 = dma.hbm_to_vmem [thread:$0]  %s3749_s1, 128, %s25_s10, [#allocation3], %s3101_s12, %s3101_s12, %s3102_s13  }
   0xe   :  { %s3103_s16 = smov [#allocation5]  }
   0xf   :  { %s42_s17 = sshll.u32 %s3103_s16, 4  ;;  %s43_s17 = int_to_ptr.vmem [resolvable:$true] %s42_s17 }
  0x10   :  { %s3062_s18 = scalar_lea.vmem %s43_s17, 256  ;;  %p3067_p6 = scmp.lt.s32.totalorder %s43_s17, %s43_s17 }
  0x11   :  { %p3063_p5 = scmp.ne.s32.totalorder %s43_s17, %s3062_s18  ;;  %p3068_p7 = scmp.lt.s32.totalorder %s3062_s18, %s3062_s18 }
  0x13   :  { %p3069_p8 = por %p3068_p7, %p3067_p6 }
  0x15   :  { %p3070_p9 = pnand %p3069_p8, %p3063_p5 }
  0x17   :  { %3073 = shalt.err (!%p3070_p9)
}
  0x18   :  { %48 = dma.hbm_to_vmem [thread:$0]  %s3753_s5, 256, %s43_s17, [#allocation6], %s3101_s12, %s3101_s12, %s3102_s13  }
  0x19   :  { %3094 = dma.done.wait [#allocation3], 128  }
  0x1a   :  { %3095 = vsyncadd [#allocation3], 4294967168 }
  0x1b   :  { %3096 = dma.done.wait [#allocation6], 256  }
  0x1c   :  { %3097 = vsyncadd [#allocation6], 4294967040  ;;  %v2941_v0 = vld [vmem:[#allocation2] sm:$0xff]   ;;  %vm95_vm0 = vcmask 130048   ;;  %v2943_v2 = vld [vmem:[%s3748_s0 + $0x8] sm:$0xff]   ;;  %vm176_vm1 = vcmask 261120  }
  0x1d   :  { %v2942_v1 = vld [vmem:[%s3748_s0] sm:$0xff]   ;;  %2662 = vmatprep.subr.bf16.mxu1 %v2941_v0  ;;  %v2944_v3 = vld [vmem:[%s3750_s2 + $0x8] sm:$0xff]   ;;  %v3104_v25 = vmov 0.0   ;;  %s3105_s29 = smov 112   ;;  %s3106_s30 = smov 120   ;;  %vm3107_vm2 = vmmov 0  }
  0x1e   :  { %2663 = vmatpush3.bf16.msra.mxu1 %v2941_v0  ;;  %2664 = vmatprep.mubr.msk.bf16.mxu1 %vm95_vm0, %v2942_v1  ;;  %v2945_v4 = vld [vmem:[%s3750_s2] sm:$0xff]   ;;  %s3109_s10 = smov 96   ;;  %vm282_vm3 = vcmask 64512   ;;  %vm1246_vm4 = vcmask 1043456   ;;  %s3110_s11 = smov 8   ;;  %vm2066_vm5 = vcmask 195584  }
  0x1f   :  { %2668 = vmatprep.subr.bf16.mxu1 %v2944_v3  ;;  %v2493_v8 = vld [vmem:[%s3756_s8] ss:$0 sm:$0xff]  ;;  %2676 = vmatprep.subr.bf16.mxu0 %v3104_v25  ;;  %s3112_s17 = smov 24   ;;  %vm2343_vm6 = vcmask 523264  }
  0x20   :  { %v2499_v19 = vld [vmem:[%s3751_s3] ss:$0 sm:$0xff]  ;;  %2678 = vmatprep.mubr.msk.bf16.mxu0 %vm3107_vm2, %v3104_v25  ;;  %s3108_s3 = smov 104  }
  0x21   :  { %2665 = vmatmul.mubr.msk.bf16.vlgmr.msra.gmra.mxu1 %vm95_vm0, %v2943_v2 }
  0x22   :  { %2669 = vmatpush3.bf16.msra.mxu1 %v2944_v3 }
  0x23   :  { %2670 = vmatprep.subr.bf16.mxu1 %v2945_v4 }
  0x26   :  { %2671 = vmatpush3.bf16.msra.mxu1 %v2945_v4 }
  0x27   :  { %2682 = vmatprep.subr.bf16.mxu1 %v3104_v25 }
  0xe1   :  { %v2666_v5 = vpop.f32.mrf.mxu1 }
  0xe2   :  { %v3198_v13 = vadd.f32 %v2666_v5, %v2493_v8 }
  0xe3   :  { %v136_v6 = vpop.f32.mrf.mxu1 }
  0xe4   :  { %v3194_v11 = vadd.f32 %v2493_v8, %v136_v6 }
  0xe5   :  { %v2667_v7 = vpop.f32.mrf.mxu1 }
  0xe6   :  { %v3192_v9 = vadd.f32 %v2667_v7, %v2493_v8 }
  0xe7   :  { %v139_v10 = vpop.f32.mrf.mxu1 }
  0xe8   :  { %v3196_v12 = vadd.f32 %v2493_v8, %v139_v10  ;;  %v152_v15 = vpack.c.bf16 %v3192_v9, %v3198_v13 }
  0xea   :  { %v151_v14 = vpack.c.bf16 %v3196_v12, %v3194_v11 }
  0xec   :  { %2672 = vmatprep.mubr.msk.bf16.mxu1 %vm176_vm1, %v151_v14 }
  0xed   :  { %2673 = vmatmul.mubr.msk.bf16.vlgmr.msra.gmra.mxu1 %vm176_vm1, %v152_v15 }
  0xee   :  { %2684 = vmatprep.mubr.msk.bf16.mxu1 %vm3107_vm2, %v3104_v25 }
 0x1ad   :  { %v2674_v16 = vpop.f32.mrf.mxu1 }
 0x1ae   :  { %v226_v26 = vadd.f32 %v2674_v16, %v2499_v19 }
 0x1af   :  { %v217_v17 = vpop.f32.mrf.mxu1 }
 0x1b0   :  { %v218_v21 = vadd.f32 %v2499_v19, %v217_v17  ;;  %v2575_v30 = vpack.c.bf16 %v226_v26, %v226_v26 }
 0x1b1   :  { %v2675_v18 = vpop.f32.mrf.mxu1 }
 0x1b2   :  { %v229_v23 = vadd.f32 %v2675_v18, %v2499_v19  ;;  %v2573_v28 = vpack.c.bf16 %v218_v21, %v218_v21 }
 0x1b3   :  { %v220_v20 = vpop.f32.mrf.mxu1 }
 0x1b4   :  { %v221_v22 = vadd.f32 %v2499_v19, %v220_v20  ;;  %v233_v27 = vpack.c.bf16 %v229_v23, %v226_v26  ;;  %v2576_v31 = vpack.c.bf16 %v229_v23, %v229_v23 }
 0x1b6   :  { %v232_v24 = vpack.c.bf16 %v221_v22, %v218_v21  ;;  %v2574_v29 = vpack.c.bf16 %v221_v22, %v221_v22 }
 0x1b8   :  { %240 = vrot.lane.b32.xlu1 %v232_v24, %s3105_s29  ;;  %236 = vrot.lane.b32.xlu0 %v232_v24, %s3106_s30 }
 0x1bc   :  { %242 = vrot.lane.b32.xlu1 %v233_v27, %s3105_s29  ;;  %238 = vrot.lane.b32.xlu0 %v233_v27, %s3106_s30 }
 0x1c0   :  { %246 = vrot.lane.b32.xlu1 %v233_v27, %s3108_s3  ;;  %244 = vrot.lane.b32.xlu0 %v232_v24, %s3108_s3 }
 0x1c4   :  { %329 = vrot.lane.b32.xlu1 %v2574_v29, %s3109_s10  ;;  %280 = vrot.lane.b32.xlu0 %v2573_v28, %s3109_s10 }
 0x1c8   :  { %425 = vrot.lane.b32.xlu1 %v2576_v31, %s3109_s10  ;;  %377 = vrot.lane.b32.xlu0 %v2575_v30, %s3109_s10 }
 0x22a   :  { %v241_v32 = vpop.permute.xlu1 %240  ;;  %v237_v33 = vpop.permute.xlu0 %236 }
 0x22b   :  { %v3219_v34 = vcombine.low %v237_v33, %v237_v33  ;;  %v3221_v35 = vcombine.high %v237_v33, %v237_v33  ;;  %v3235_v42 = vcombine.low %v241_v32, %v241_v32  ;;  %v3237_v43 = vcombine.high %v241_v32, %v241_v32 }
 0x22d   :  { %521 = vrot.lane.b32.xlu1 %v3221_v35, %s3109_s10  ;;  %473 = vrot.lane.b32.xlu0 %v3219_v34, %s3109_s10 }
 0x22e   :  { %v243_v36 = vpop.permute.xlu1 %242  ;;  %v239_v37 = vpop.permute.xlu0 %238 }
 0x22f   :  { %v3227_v38 = vcombine.low %v239_v37, %v239_v37  ;;  %v3229_v39 = vcombine.high %v239_v37, %v239_v37  ;;  %v3243_v46 = vcombine.low %v243_v36, %v243_v36  ;;  %v3245_v47 = vcombine.high %v243_v36, %v243_v36 }
 0x231   :  { %617 = vrot.lane.b32.xlu1 %v3229_v39, %s3109_s10  ;;  %569 = vrot.lane.b32.xlu0 %v3227_v38, %s3109_s10 }
 0x232   :  { %v247_v40 = vpop.permute.xlu1 %246  ;;  %v245_v41 = vpop.permute.xlu0 %244 }
 0x233   :  { %v3255_v50 = vcombine.low %v245_v41, %v245_v41  ;;  %v3257_v51 = vcombine.high %v245_v41, %v245_v41  ;;  %v3263_v54 = vcombine.low %v247_v40, %v247_v40  ;;  %v3265_v55 = vcombine.high %v247_v40, %v247_v40 }
 0x235   :  { %713 = vrot.lane.b32.xlu1 %v3237_v43, %s3109_s10  ;;  %665 = vrot.lane.b32.xlu0 %v3235_v42, %s3109_s10 }
 0x236   :  { %v330_v44 = vpop.permute.xlu1 %329  ;;  %v281_v45 = vpop.permute.xlu0 %280 }
 0x237   :  { %v335_v48 = vsel %vm282_vm3, %v330_v44, 0  ;;  %v287_v49 = vsel %vm282_vm3, %v281_v45, 0 }
 0x238   :  { %2677 = vmatpush3.bf16.xpose.msra.mxu0 %v287_v49  ;;  %2683 = vmatpush3.bf16.xpose.msra.mxu1 %v335_v48 }
 0x239   :  { %809 = vrot.lane.b32.xlu1 %v3245_v47, %s3109_s10  ;;  %761 = vrot.lane.b32.xlu0 %v3243_v46, %s3109_s10 }
 0x23a   :  { %2688 = vmatprep.subr.bf16.mxu0 %v3104_v25  ;;  %2694 = vmatprep.subr.bf16.mxu1 %v3104_v25  ;;  %v426_v52 = vpop.permute.xlu1 %425  ;;  %v378_v53 = vpop.permute.xlu0 %377 }
 0x23b   :  { %v431_v56 = vsel %vm282_vm3, %v426_v52, 0  ;;  %v383_v57 = vsel %vm282_vm3, %v378_v53, 0 }
 0x23d   :  { %905 = vrot.lane.b32.xlu1 %v3257_v51, %s3109_s10  ;;  %857 = vrot.lane.b32.xlu0 %v3255_v50, %s3109_s10 }
 0x23f   :  { %2679 = vmatmul.mubr.msk.bf16.vlgmr.msra.gmra.mxu0 %vm282_vm3, %v2573_v28  ;;  %2685 = vmatmul.mubr.msk.bf16.vlgmr.msra.gmra.mxu1 %vm282_vm3, %v2574_v29 }
 0x240   :  { %2689 = vmatpush3.bf16.xpose.msra.mxu0 %v383_v57  ;;  %2695 = vmatpush3.bf16.xpose.msra.mxu1 %v431_v56 }
 0x241   :  { %1001 = vrot.lane.b32.xlu1 %v3265_v55, %s3109_s10  ;;  %953 = vrot.lane.b32.xlu0 %v3263_v54, %s3109_s10 }
 0x242   :  { %2690 = vmatprep.mubr.msk.bf16.mxu0 %vm3107_vm2, %v3104_v25  ;;  %2696 = vmatprep.mubr.msk.bf16.mxu1 %vm3107_vm2, %v3104_v25 }
 0x243   :  { %2700 = vmatprep.subr.bf16.mxu0 %v3104_v25  ;;  %2706 = vmatprep.subr.bf16.mxu1 %v3104_v25 }
 0x245   :  { %1241 = vrot.lane.b32.xlu1 %v2573_v28, %s3101_s12  ;;  %1290 = vrot.lane.b32.xlu0 %v2574_v29, %s3101_s12 }
 0x247   :  { %2691 = vmatmul.mubr.msk.bf16.vlgmr.msra.gmra.mxu0 %vm282_vm3, %v2575_v30  ;;  %2697 = vmatmul.mubr.msk.bf16.vlgmr.msra.gmra.mxu1 %vm282_vm3, %v2576_v31 }
 0x248   :  { %2708 = vmatprep.mubr.msk.bf16.mxu1 %vm3107_vm2, %v3104_v25  ;;  %2702 = vmatprep.mubr.msk.bf16.mxu0 %vm3107_vm2, %v3104_v25 }
 0x249   :  { %1338 = vrot.lane.b32.xlu1 %v2575_v30, %s3101_s12  ;;  %1386 = vrot.lane.b32.xlu0 %v2576_v31, %s3101_s12 }
 0x24d   :  { %1530 = vrot.lane.b32.xlu1 %v3227_v38, %s3101_s12  ;;  %1578 = vrot.lane.b32.xlu0 %v3229_v39, %s3101_s12 }
 0x251   :  { %1434 = vrot.lane.b32.xlu1 %v3219_v34, %s3101_s12  ;;  %1482 = vrot.lane.b32.xlu0 %v3221_v35, %s3101_s12 }
 0x255   :  { %1626 = vrot.lane.b32.xlu1 %v3235_v42, %s3101_s12 }
 0x29f   :  { %v522_v58 = vpop.permute.xlu1 %521  ;;  %v474_v59 = vpop.permute.xlu0 %473 }
 0x2a0   :  { %v527_v60 = vsel %vm282_vm3, %v522_v58, 0  ;;  %v479_v61 = vsel %vm282_vm3, %v474_v59, 0 }
 0x2a1   :  { %2701 = vmatpush3.bf16.xpose.msra.mxu0 %v479_v61  ;;  %2707 = vmatpush3.bf16.xpose.msra.mxu1 %v527_v60 }
 0x2a2   :  { %2712 = vmatprep.subr.bf16.mxu0 %v3104_v25  ;;  %2718 = vmatprep.subr.bf16.mxu1 %v3104_v25 }
 0x2a3   :  { %v618_v62 = vpop.permute.xlu1 %617  ;;  %v570_v63 = vpop.permute.xlu0 %569 }
 0x2a4   :  { %v623_v0 = vsel %vm282_vm3, %v618_v62, 0  ;;  %v575_v1 = vsel %vm282_vm3, %v570_v63, 0 }
 0x2a7   :  { %v714_v2 = vpop.permute.xlu1 %713  ;;  %v666_v3 = vpop.permute.xlu0 %665 }
 0x2a8   :  { %2703 = vmatmul.mubr.msk.bf16.vlgmr.msra.gmra.mxu0 %vm282_vm3, %v3219_v34  ;;  %2709 = vmatmul.mubr.msk.bf16.vlgmr.msra.gmra.mxu1 %vm282_vm3, %v3221_v35  ;;  %v719_v4 = vsel %vm282_vm3, %v714_v2, 0  ;;  %v671_v5 = vsel %vm282_vm3, %v666_v3, 0 }
 0x2a9   :  { %2713 = vmatpush3.bf16.xpose.msra.mxu0 %v575_v1  ;;  %2719 = vmatpush3.bf16.xpose.msra.mxu1 %v623_v0 }
 0x2aa   :  { %2720 = vmatprep.mubr.msk.bf16.mxu1 %vm3107_vm2, %v3104_v25  ;;  %2714 = vmatprep.mubr.msk.bf16.mxu0 %vm3107_vm2, %v3104_v25 }
 0x2ab   :  { %2724 = vmatprep.subr.bf16.mxu0 %v3104_v25  ;;  %2730 = vmatprep.subr.bf16.mxu1 %v3104_v25  ;;  %v810_v6 = vpop.permute.xlu1 %809  ;;  %v762_v7 = vpop.permute.xlu0 %761 }
 0x2ac   :  { %v815_v8 = vsel %vm282_vm3, %v810_v6, 0  ;;  %v767_v10 = vsel %vm282_vm3, %v762_v7, 0 }
 0x2af   :  { %v906_v14 = vpop.permute.xlu1 %905  ;;  %v858_v15 = vpop.permute.xlu0 %857 }
 0x2b0   :  { %2715 = vmatmul.mubr.msk.bf16.vlgmr.msra.gmra.mxu0 %vm282_vm3, %v3227_v38  ;;  %2721 = vmatmul.mubr.msk.bf16.vlgmr.msra.gmra.mxu1 %vm282_vm3, %v3229_v39  ;;  %v911_v16 = vsel %vm282_vm3, %v906_v14, 0  ;;  %v863_v17 = vsel %vm282_vm3, %v858_v15, 0 }
 0x2b1   :  { %2725 = vmatpush3.bf16.xpose.msra.mxu0 %v671_v5  ;;  %2731 = vmatpush3.bf16.xpose.msra.mxu1 %v719_v4 }
 0x2b2   :  { %2732 = vmatprep.mubr.msk.bf16.mxu1 %vm3107_vm2, %v3104_v25  ;;  %2726 = vmatprep.mubr.msk.bf16.mxu0 %vm3107_vm2, %v3104_v25 }
 0x2b3   :  { %2736 = vmatprep.subr.bf16.mxu0 %v3104_v25  ;;  %2742 = vmatprep.subr.bf16.mxu1 %v3104_v25  ;;  %v1002_v18 = vpop.permute.xlu1 %1001  ;;  %v954_v19 = vpop.permute.xlu0 %953 }
 0x2b4   :  { %v1007_v20 = vsel %vm282_vm3, %v1002_v18, 0  ;;  %v959_v21 = vsel %vm282_vm3, %v954_v19, 0 }
 0x2b7   :  { %v1242_v22 = vpop.permute.xlu1 %1241  ;;  %v1291_v23 = vpop.permute.xlu0 %1290 }
 0x2b8   :  { %2727 = vmatmul.mubr.msk.bf16.vlgmr.msra.gmra.mxu0 %vm282_vm3, %v3235_v42  ;;  %2733 = vmatmul.mubr.msk.bf16.vlgmr.msra.gmra.mxu1 %vm282_vm3, %v3237_v43  ;;  %v1248_v24 = vsel %vm1246_vm4, %v1242_v22, 0  ;;  %v1296_v26 = vsel %vm1246_vm4, %v1291_v23, 0 }
 0x2b9   :  { %2737 = vmatpush3.bf16.xpose.msra.mxu0 %v767_v10  ;;  %2743 = vmatpush3.bf16.xpose.msra.mxu1 %v815_v8 }
 0x2ba   :  { %2744 = vmatprep.mubr.msk.bf16.mxu1 %vm3107_vm2, %v3104_v25  ;;  %2738 = vmatprep.mubr.msk.bf16.mxu0 %vm3107_vm2, %v3104_v25 }
 0x2bb   :  { %2748 = vmatprep.subr.bf16.mxu0 %v3104_v25  ;;  %2754 = vmatprep.subr.bf16.mxu1 %v3104_v25 }
 0x2c0   :  { %2739 = vmatmul.mubr.msk.bf16.vlgmr.msra.gmra.mxu0 %vm282_vm3, %v3243_v46  ;;  %2745 = vmatmul.mubr.msk.bf16.vlgmr.msra.gmra.mxu1 %vm282_vm3, %v3245_v47 }
 0x2c1   :  { %2749 = vmatpush3.bf16.xpose.msra.mxu0 %v863_v17  ;;  %2755 = vmatpush3.bf16.xpose.msra.mxu1 %v911_v16 }
 0x2c2   :  { %2756 = vmatprep.mubr.msk.bf16.mxu1 %vm3107_vm2, %v3104_v25  ;;  %2750 = vmatprep.mubr.msk.bf16.mxu0 %vm3107_vm2, %v3104_v25 }
 0x2c3   :  { %2760 = vmatprep.subr.bf16.mxu0 %v3104_v25  ;;  %2766 = vmatprep.subr.bf16.mxu1 %v3104_v25 }
 0x2c8   :  { %2751 = vmatmul.mubr.msk.bf16.vlgmr.msra.gmra.mxu0 %vm282_vm3, %v3255_v50  ;;  %2757 = vmatmul.mubr.msk.bf16.vlgmr.msra.gmra.mxu1 %vm282_vm3, %v3257_v51 }
 0x2c9   :  { %2761 = vmatpush3.bf16.xpose.msra.mxu0 %v959_v21  ;;  %2767 = vmatpush3.bf16.xpose.msra.mxu1 %v1007_v20  ;;  %v3417_v20 = vpop.permute.xlu0 %1386 }
 0x2ca   :  { %2762 = vmatprep.mubr.msk.bf16.mxu0 %vm3107_vm2, %v3104_v25  ;;  %2768 = vmatprep.mubr.msk.bf16.mxu1 %vm3107_vm2, %v3104_v25 }
 0x2cb   :  { %2772 = vmatprep.subr.bf16.mxu0 %v3104_v25  ;;  %2778 = vmatprep.subr.bf16.mxu1 %v3104_v25 }
 0x2d0   :  { %2763 = vmatmul.mubr.msk.bf16.vlgmr.msra.gmra.mxu0 %vm282_vm3, %v3263_v54  ;;  %2769 = vmatmul.mubr.msk.bf16.vlgmr.msra.gmra.mxu1 %vm282_vm3, %v3265_v55 }
 0x2d1   :  { %2773 = vmatpush3.bf16.msra.mxu0 %v1248_v24  ;;  %2779 = vmatpush3.bf16.msra.mxu1 %v1296_v26 }
 0x2d2   :  { %2774 = vmatprep.mubr.msk.bf16.mxu0 %vm3107_vm2, %v3104_v25  ;;  %2784 = vmatprep.subr.bf16.mxu0 %v3104_v25 }
 0x2d3   :  { %2780 = vmatprep.mubr.msk.bf16.mxu1 %vm3107_vm2, %v3104_v25  ;;  %2790 = vmatprep.subr.bf16.mxu1 %v3104_v25 }
 0x2ff   :  { %v3377_v27 = vpop.f32.mrf.mxu0  ;;  %v3379_v28 = vpop.f32.mrf.mxu1 }
 0x300   :  { %v1052_v29 = vsel %vm282_vm3, %v3379_v28, -inf  ;;  %v1049_v30 = vsel %vm282_vm3, %v3377_v27, -inf }
 0x301   :  { %v2686_v31 = vpop.f32.mrf.mxu1  ;;  %1053 = vmax.xlane.f32.xlu1 %v1052_v29  ;;  %1050 = vmax.xlane.f32.xlu0 %v1049_v30  ;;  %v2680_v32 = vpop.f32.mrf.mxu0 }
 0x302   :  { %v3423_v30 = vpop.permute.xlu0 %1578 }
 0x303   :  { %v326_v33 = vpop.f32.mrf.mxu0  ;;  %v374_v34 = vpop.f32.mrf.mxu1 }
 0x305   :  { %v2681_v35 = vpop.f32.mrf.mxu0  ;;  %v2687_v36 = vpop.f32.mrf.mxu1 }
 0x307   :  { %v3385_v37 = vpop.f32.mrf.mxu0  ;;  %v3387_v38 = vpop.f32.mrf.mxu1 }
 0x308   :  { %v1055_v39 = vsel %vm282_vm3, %v3385_v37, -inf  ;;  %v1058_v45 = vsel %vm282_vm3, %v3387_v38, -inf }
 0x309   :  { %v2698_v40 = vpop.f32.mrf.mxu1  ;;  %1056 = vmax.xlane.f32.xlu0 %v1055_v39  ;;  %v2692_v41 = vpop.f32.mrf.mxu0 }
 0x30a   :  { %v3429_v41 = vpop.permute.xlu0 %1482 }
 0x30b   :  { %v422_v42 = vpop.f32.mrf.mxu0  ;;  %v470_v44 = vpop.f32.mrf.mxu1 }
 0x30d   :  { %v2699_v48 = vpop.f32.mrf.mxu1  ;;  %1059 = vmax.xlane.f32.xlu0 %v1058_v45  ;;  %v2693_v49 = vpop.f32.mrf.mxu0 }
 0x368   :  { %v3393_v52 = vpop.f32.mrf.mxu0  ;;  %v3395_v53 = vpop.f32.mrf.mxu1 }
 0x369   :  { %v1064_v56 = vsel %vm282_vm3, %v3395_v53, -inf  ;;  %v1061_v57 = vsel %vm282_vm3, %v3393_v52, -inf }
 0x36a   :  { %v2710_v58 = vpop.f32.mrf.mxu1  ;;  %1065 = vmax.xlane.f32.xlu0 %v1064_v56  ;;  %1062 = vmax.xlane.f32.xlu1 %v1061_v57  ;;  %v2704_v59 = vpop.f32.mrf.mxu0 }
 0x36c   :  { %v518_v60 = vpop.f32.mrf.mxu0  ;;  %v566_v61 = vpop.f32.mrf.mxu1 }
 0x36e   :  { %v2705_v62 = vpop.f32.mrf.mxu0  ;;  %v2711_v63 = vpop.f32.mrf.mxu1 }
 0x370   :  { %v3401_v0 = vpop.f32.mrf.mxu0  ;;  %v3403_v1 = vpop.f32.mrf.mxu1 }
 0x371   :  { %v1070_v2 = vsel %vm282_vm3, %v3403_v1, -inf  ;;  %v1067_v3 = vsel %vm282_vm3, %v3401_v0, -inf }
 0x372   :  { %v2722_v4 = vpop.f32.mrf.mxu1  ;;  %1071 = vmax.xlane.f32.xlu0 %v1070_v2  ;;  %1068 = vmax.xlane.f32.xlu1 %v1067_v3  ;;  %v2716_v5 = vpop.f32.mrf.mxu0 }
 0x374   :  { %v614_v6 = vpop.f32.mrf.mxu0  ;;  %v662_v7 = vpop.f32.mrf.mxu1 }
 0x376   :  { %v2717_v8 = vpop.f32.mrf.mxu0  ;;  %v2723_v10 = vpop.f32.mrf.mxu1 }
 0x377   :  { %v3446_v8 = vpop.permute.xlu1 %1338 }
 0x378   :  { %v3409_v14 = vpop.f32.mrf.mxu0  ;;  %v3411_v15 = vpop.f32.mrf.mxu1 }
 0x379   :  { %v1076_v16 = vsel %vm282_vm3, %v3411_v15, -inf  ;;  %v1073_v17 = vsel %vm282_vm3, %v3409_v14, -inf }
 0x37a   :  { %v2734_v18 = vpop.f32.mrf.mxu1  ;;  %1077 = vmax.xlane.f32.xlu0 %v1076_v16  ;;  %1074 = vmax.xlane.f32.xlu1 %v1073_v17  ;;  %v2728_v19 = vpop.f32.mrf.mxu0 }
 0x37b   :  { %v3448_v17 = vpop.permute.xlu1 %1530 }
 0x37c   :  { %v710_v21 = vpop.f32.mrf.mxu0  ;;  %v758_v22 = vpop.f32.mrf.mxu1 }
 0x37e   :  { %v2729_v23 = vpop.f32.mrf.mxu0  ;;  %v2735_v24 = vpop.f32.mrf.mxu1 }
 0x37f   :  { %v3454_v21 = vpop.permute.xlu1 %1434 }
 0x380   :  { %v3419_v26 = vpop.f32.mrf.mxu0  ;;  %v3421_v29 = vpop.f32.mrf.mxu1 }
 0x381   :  { %v1082_v31 = vsel %vm282_vm3, %v3421_v29, -inf  ;;  %v1079_v32 = vsel %vm282_vm3, %v3419_v26, -inf }
 0x382   :  { %v2746_v33 = vpop.f32.mrf.mxu1  ;;  %1083 = vmax.xlane.f32.xlu0 %v1082_v31  ;;  %1080 = vmax.xlane.f32.xlu1 %v1079_v32  ;;  %v2740_v34 = vpop.f32.mrf.mxu0 }
 0x383   :  { %v3458_v23 = vpop.permute.xlu1 %1626 }
 0x384   :  { %v806_v35 = vpop.f32.mrf.mxu0  ;;  %v854_v36 = vpop.f32.mrf.mxu1 }
 0x386   :  { %v2741_v39 = vpop.f32.mrf.mxu0  ;;  %v2747_v40 = vpop.f32.mrf.mxu1 }
 0x388   :  { %v3431_v42 = vpop.f32.mrf.mxu0  ;;  %v3433_v44 = vpop.f32.mrf.mxu1 }
 0x389   :  { %v1088_v45 = vsel %vm282_vm3, %v3433_v44, -inf  ;;  %v1085_v48 = vsel %vm282_vm3, %v3431_v42, -inf }
 0x38a   :  { %v2758_v49 = vpop.f32.mrf.mxu1  ;;  %1089 = vmax.xlane.f32.xlu0 %v1088_v45  ;;  %1086 = vmax.xlane.f32.xlu1 %v1085_v48  ;;  %v2752_v56 = vpop.f32.mrf.mxu0 }
 0x38b   :  { %v1051_v57 = vpop.xlane.xlu0 %1050  ;;  %v1054_v31 = vpop.xlane.xlu1 %1053 }
 0x38c   :  { %v1097_v58 = vsub.f32 %v3377_v27, %v1051_v57  ;;  %v950_v59 = vpop.f32.mrf.mxu1  ;;  %v902_v60 = vpop.f32.mrf.mxu0  ;;  %v1098_v32 = vsub.f32 %v3379_v28, %v1054_v31 }
 0x38e   :  { %v1113_v61 = vmul.f32 1.442695, %v1097_v58  ;;  %v2759_v62 = vpop.f32.mrf.mxu1  ;;  %v2753_v63 = vpop.f32.mrf.mxu0  ;;  %v1115_v34 = vmul.f32 1.442695, %v1098_v32 }
 0x390   :  { %2954 = vpow2.f32 %v1113_v61  ;;  %v3440_v2 = vpop.f32.mrf.mxu1  ;;  %v3442_v3 = vpop.f32.mrf.mxu0 }
 0x391   :  { %v1094_v4 = vsel %vm282_vm3, %v3440_v2, -inf  ;;  %v1091_v22 = vsel %vm282_vm3, %v3442_v3, -inf  ;;  %2956 = vpow2.f32 %v1115_v34 }
 0x392   :  { %v2770_v5 = vpop.f32.mrf.mxu1  ;;  %1095 = vmax.xlane.f32.xlu0 %v1094_v4  ;;  %v2764_v6 = vpop.f32.mrf.mxu0 }
 0x393   :  { %v1057_v24 = vpop.xlane.xlu0 %1056 }
 0x394   :  { %v1046_v7 = vpop.f32.mrf.mxu1  ;;  %v998_v27 = vpop.f32.mrf.mxu0 }
 0x396   :  { %v2771_v10 = vpop.f32.mrf.mxu1  ;;  %v2765_v16 = vpop.f32.mrf.mxu0 }
 0x397   :  { %v1060_v33 = vpop.xlane.xlu0 %1059 }
 0x398   :  { %v1100_v35 = vsub.f32 %v3387_v38, %v1060_v33 }
 0x39a   :  { %v1119_v36 = vmul.f32 1.442695, %v1100_v35 }
 0x39c   :  { %2958 = vpow2.f32 %v1119_v36 }
 0x39d   :  { %v3450_v18 = vpop.eup %2954 }
 0x39e   :  { %v1145_v19 = vsel %vm282_vm3, %v3450_v18, 0.0  ;;  %v3468_v39 = vpop.eup %2956 }
 0x39f   :  { %1146 = vadd.xlane.f32.xlu1 %v1145_v19  ;;  %v1148_v28 = vsel %vm282_vm3, %v3468_v39, 0.0 }
 0x3a3   :  { %1092 = vmax.xlane.f32.xlu1 %v1091_v22 }
 0x3a8   :  { %1674 = vrot.lane.b32.xlu0 %v3237_v43, %s3101_s12  ;;  %v1099_v43 = vsub.f32 %v3385_v37, %v1057_v24 }
 0x3a9   :  { %v3473_v40 = vpop.eup %2958 }
 0x3aa   :  { %v1117_v45 = vmul.f32 1.442695, %v1099_v43 }
 0x3ac   :  { %2960 = vpow2.f32 %v1117_v45 }
 0x3b4   :  { %1722 = vrot.lane.b32.xlu1 %v3243_v46, %s3101_s12  ;;  %v1154_v46 = vsel %vm282_vm3, %v3473_v40, 0.0 }
 0x3b8   :  { %1770 = vrot.lane.b32.xlu1 %v3245_v47, %s3101_s12 }
 0x3b9   :  { %v3477_v38 = vpop.eup %2960 }
 0x3ba   :  { %v1151_v47 = vsel %vm282_vm3, %v3477_v38, 0.0 }
 0x3c7   :  { %1149 = vadd.xlane.f32.xlu0 %v1148_v28 }
 0x3cb   :  { %1155 = vadd.xlane.f32.xlu0 %v1154_v46 }
 0x3dc   :  { %1152 = vadd.xlane.f32.xlu1 %v1151_v47 }
 0x3f3   :  { %v1063_v48 = vpop.xlane.xlu1 %1062  ;;  %v1066_v37 = vpop.xlane.xlu0 %1065 }
 0x3f4   :  { %v1101_v49 = vsub.f32 %v3393_v52, %v1063_v48  ;;  %v1102_v56 = vsub.f32 %v3395_v53, %v1066_v37 }
 0x3f6   :  { %v1121_v57 = vmul.f32 1.442695, %v1101_v49  ;;  %v1123_v58 = vmul.f32 1.442695, %v1102_v56 }
 0x3f8   :  { %2962 = vpow2.f32 %v1121_v57 }
 0x3f9   :  { %2964 = vpow2.f32 %v1123_v58 }
 0x3fb   :  { %v1069_v59 = vpop.xlane.xlu1 %1068  ;;  %v1072_v60 = vpop.xlane.xlu0 %1071 }
 0x3fc   :  { %v1103_v61 = vsub.f32 %v3401_v0, %v1069_v59  ;;  %v1104_v62 = vsub.f32 %v3403_v1, %v1072_v60  ;;  %v1344_v59 = vsel %vm1246_vm4, %v3446_v8, 0 }
 0x3fe   :  { %v1125_v63 = vmul.f32 1.442695, %v1103_v61  ;;  %v1127_v4 = vmul.f32 1.442695, %v1104_v62 }
 0x400   :  { %2966 = vpow2.f32 %v1125_v63 }
 0x401   :  { %2968 = vpow2.f32 %v1127_v4 }
 0x403   :  { %v1075_v5 = vpop.xlane.xlu1 %1074  ;;  %v1078_v6 = vpop.xlane.xlu0 %1077 }
 0x404   :  { %v1105_v52 = vsub.f32 %v3409_v14, %v1075_v5  ;;  %v1106_v53 = vsub.f32 %v3411_v15, %v1078_v6 }
 0x405   :  { %v3487_v7 = vpop.eup %2962 }
 0x406   :  { %v3489_v27 = vpop.eup %2964  ;;  %v1129_v10 = vmul.f32 1.442695, %v1105_v52  ;;  %v1131_v16 = vmul.f32 1.442695, %v1106_v53  ;;  %v1157_v0 = vsel %vm282_vm3, %v3487_v7, 0.0 }
 0x407   :  { %1158 = vadd.xlane.f32.xlu1 %v1157_v0  ;;  %v1160_v1 = vsel %vm282_vm3, %v3489_v27, 0.0 }
 0x408   :  { %2970 = vpow2.f32 %v1129_v10  ;;  %1161 = vadd.xlane.f32.xlu0 %v1160_v1 }
 0x409   :  { %2972 = vpow2.f32 %v1131_v16 }
 0x40b   :  { %v1081_v19 = vpop.xlane.xlu1 %1080  ;;  %v1084_v14 = vpop.xlane.xlu0 %1083 }
 0x40c   :  { %v1107_v15 = vsub.f32 %v3419_v26, %v1081_v19  ;;  %v1108_v22 = vsub.f32 %v3421_v29, %v1084_v14 }
 0x40d   :  { %v3497_v24 = vpop.eup %2966 }
 0x40e   :  { %v3499_v31 = vpop.eup %2968  ;;  %v1133_v32 = vmul.f32 1.442695, %v1107_v15  ;;  %v1135_v33 = vmul.f32 1.442695, %v1108_v22  ;;  %v1163_v34 = vsel %vm282_vm3, %v3497_v24, 0.0 }
 0x40f   :  { %1164 = vadd.xlane.f32.xlu1 %v1163_v34  ;;  %v1166_v35 = vsel %vm282_vm3, %v3499_v31, 0.0  ;;  %v1392_v34 = vsel %vm1246_vm4, %v3417_v20, 0 }
 0x410   :  { %2974 = vpow2.f32 %v1133_v32  ;;  %1167 = vadd.xlane.f32.xlu0 %v1166_v35 }
 0x411   :  { %2976 = vpow2.f32 %v1135_v33 }
 0x413   :  { %v1087_v48 = vpop.xlane.xlu1 %1086  ;;  %v1090_v57 = vpop.xlane.xlu0 %1089 }
 0x414   :  { %v1109_v60 = vsub.f32 %v3431_v42, %v1087_v48  ;;  %v1110_v61 = vsub.f32 %v3433_v44, %v1090_v57 }
 0x415   :  { %v3505_v36 = vpop.eup %2970 }
 0x416   :  { %v3507_v26 = vpop.eup %2972  ;;  %v1169_v29 = vsel %vm282_vm3, %v3505_v36, 0.0  ;;  %v1139_v63 = vmul.f32 1.442695, %v1110_v61  ;;  %v1584_v61 = vsel %vm1246_vm4, %v3423_v30, 0 }
 0x417   :  { %1170 = vadd.xlane.f32.xlu1 %v1169_v29  ;;  %v1172_v43 = vsel %vm282_vm3, %v3507_v26, 0.0 }
 0x418   :  { %1173 = vadd.xlane.f32.xlu0 %v1172_v43  ;;  %v1488_v43 = vsel %vm1246_vm4, %v3429_v41, 0 }
 0x41d   :  { %v3513_v28 = vpop.eup %2974 }
 0x41e   :  { %v3515_v45 = vpop.eup %2976  ;;  %v1175_v46 = vsel %vm282_vm3, %v3513_v28, 0.0 }
 0x41f   :  { %1176 = vadd.xlane.f32.xlu1 %v1175_v46  ;;  %v1178_v47 = vsel %vm282_vm3, %v3515_v45, 0.0 }
 0x420   :  { %1179 = vadd.xlane.f32.xlu0 %v1178_v47 }
 0x428   :  { %v1147_v37 = vpop.xlane.xlu1 %1146 }
 0x429   :  { %2978 = vrcp.f32 %v1147_v37 }
 0x42c   :  { %v1093_v62 = vpop.xlane.xlu1 %1092 }
 0x430   :  { %1866 = vrot.lane.b32.xlu1 %v3257_v51, %s3101_s12  ;;  %v1096_v51 = vpop.xlane.xlu0 %1095  ;;  %v3554_v19 = vpop.permute.xlu1 %1722 }
 0x431   :  { %v1112_v8 = vsub.f32 %v3440_v2, %v1096_v51 }
 0x433   :  { %v1143_v4 = vmul.f32 1.442695, %v1112_v8 }
 0x434   :  { %v3536_v44 = vpop.permute.xlu0 %1674  ;;  %v3557_v22 = vpop.permute.xlu1 %1770 }
 0x435   :  { %v1680_v8 = vsel %vm1246_vm4, %v3536_v44, 0 }
 0x436   :  { %v2979_v49 = vpop.eup %2978  ;;  %1818 = vrot.lane.b32.xlu0 %v3255_v50, %s3101_s12  ;;  %v1137_v50 = vmul.f32 1.442695, %v1109_v60  ;;  %v1536_v60 = vsel %vm1246_vm4, %v3448_v17, 0 }
 0x437   :  { %v1209_v56 = vmul.f32 %v2979_v49, %v3450_v18  ;;  %v1111_v18 = vsub.f32 %v3442_v3, %v1093_v62 }
 0x438   :  { %2980 = vpow2.f32 %v1137_v50 }
 0x439   :  { %v1225_v58 = vpack.c.bf16 %v1209_v56, %v1209_v56  ;;  %v1141_v42 = vmul.f32 1.442695, %v1111_v18  ;;  %2982 = vpow2.f32 %v1139_v63  ;;  %v1632_v63 = vsel %vm1246_vm4, %v3458_v23, 0 }
 0x43b   :  { %2775 = vmatmul.mubr.msk.bf16.vlgmr.msra.gmra.mxu0 %vm282_vm3, %v1225_v58  ;;  %2984 = vpow2.f32 %v1141_v42 }
 0x43c   :  { %2785 = vmatpush3.bf16.msra.mxu0 %v1344_v59  ;;  %2786 = vmatprep.mubr.msk.bf16.mxu0 %vm3107_vm2, %v3104_v25  ;;  %2986 = vpow2.f32 %v1143_v4 }
 0x43d   :  { %2796 = vmatprep.subr.bf16.mxu0 %v3104_v25 }
 0x445   :  { %v3538_v5 = vpop.eup %2980 }
 0x446   :  { %v3540_v52 = vpop.eup %2982  ;;  %v1181_v3 = vsel %vm282_vm3, %v3538_v5, 0.0 }
 0x447   :  { %v1184_v2 = vsel %vm282_vm3, %v3540_v52, 0.0 }
 0x448   :  { %v3544_v53 = vpop.eup %2984 }
 0x449   :  { %v3548_v16 = vpop.eup %2986  ;;  %v1187_v0 = vsel %vm282_vm3, %v3544_v53, 0.0 }
 0x44a   :  { %v1190_v1 = vsel %vm282_vm3, %v3548_v16, 0.0 }
 0x450   :  { %v1150_v6 = vpop.xlane.xlu0 %1149 }
 0x451   :  { %2988 = vrcp.f32 %v1150_v6  ;;  %v1728_v6 = vsel %vm1246_vm4, %v3554_v19, 0 }
 0x454   :  { %1182 = vadd.xlane.f32.xlu1 %v1181_v3  ;;  %v1156_v10 = vpop.xlane.xlu0 %1155  ;;  %v1776_v3 = vsel %vm1246_vm4, %v3557_v22, 0 }
 0x455   :  { %1185 = vadd.xlane.f32.xlu0 %v1184_v2  ;;  %2990 = vrcp.f32 %v1156_v10 }
 0x458   :  { %1188 = vadd.xlane.f32.xlu1 %v1187_v0 }
 0x459   :  { %1191 = vadd.xlane.f32.xlu0 %v1190_v1 }
 0x45e   :  { %v2989_v14 = vpop.eup %2988 }
 0x45f   :  { %v1210_v15 = vmul.f32 %v2989_v14, %v3468_v39 }
 0x461   :  { %v1226_v32 = vpack.c.bf16 %v1210_v15, %v1210_v15 }
 0x462   :  { %v2991_v33 = vpop.eup %2990 }
 0x463   :  { %2781 = vmatmul.mubr.msk.bf16.vlgmr.msra.gmra.mxu1 %vm282_vm3, %v1226_v32  ;;  %v1212_v29 = vmul.f32 %v2991_v33, %v3473_v40 }
 0x464   :  { %2791 = vmatpush3.bf16.msra.mxu1 %v1392_v34  ;;  %2792 = vmatprep.mubr.msk.bf16.mxu1 %vm3107_vm2, %v3104_v25 }
 0x465   :  { %v1153_v35 = vpop.xlane.xlu1 %1152  ;;  %2802 = vmatprep.subr.bf16.mxu1 %v3104_v25  ;;  %v1228_v39 = vpack.c.bf16 %v1212_v29, %v1212_v29 }
 0x466   :  { %2992 = vrcp.f32 %v1153_v35 }
 0x469   :  { %1962 = vrot.lane.b32.xlu1 %v3265_v55, %s3101_s12  ;;  %v1440_v55 = vsel %vm1246_vm4, %v3454_v21, 0 }
 0x46b   :  { %2793 = vmatmul.mubr.msk.bf16.vlgmr.msra.gmra.mxu1 %vm282_vm3, %v1228_v39 }
 0x46c   :  { %2803 = vmatpush3.bf16.msra.mxu1 %v1488_v43  ;;  %2804 = vmatprep.mubr.msk.bf16.mxu1 %vm3107_vm2, %v3104_v25 }
 0x46d   :  { %2814 = vmatprep.subr.bf16.mxu1 %v3104_v25 }
 0x46f   :  { %1914 = vrot.lane.b32.xlu0 %v3263_v54, %s3101_s12  ;;  %s3111_s12 = smov 16  }
 0x473   :  { %v2993_v20 = vpop.eup %2992 }
 0x474   :  { %v1211_v40 = vmul.f32 %v2993_v20, %v3477_v38 }
 0x476   :  { %v1227_v46 = vpack.c.bf16 %v1211_v40, %v1211_v40 }
 0x478   :  { %2787 = vmatmul.mubr.msk.bf16.vlgmr.msra.gmra.mxu0 %vm282_vm3, %v1227_v46 }
 0x479   :  { %2797 = vmatpush3.bf16.msra.mxu0 %v1440_v55  ;;  %2798 = vmatprep.mubr.msk.bf16.mxu0 %vm3107_vm2, %v3104_v25 }
 0x47a   :  { %2808 = vmatprep.subr.bf16.mxu0 %v3104_v25 }
 0x490   :  { %v1159_v41 = vpop.xlane.xlu1 %1158 }
 0x491   :  { %2994 = vrcp.f32 %v1159_v41  ;;  %v1162_v47 = vpop.xlane.xlu0 %1161 }
 0x492   :  { %2996 = vrcp.f32 %v1162_v47 }
 0x498   :  { %v1165_v54 = vpop.xlane.xlu1 %1164 }
 0x499   :  { %2998 = vrcp.f32 %v1165_v54  ;;  %v1168_v48 = vpop.xlane.xlu0 %1167 }
 0x49a   :  { %3000 = vrcp.f32 %v1168_v48 }
 0x49e   :  { %v2995_v38 = vpop.eup %2994 }
 0x49f   :  { %v2997_v37 = vpop.eup %2996  ;;  %v1213_v21 = vmul.f32 %v2995_v38, %v3487_v7 }
 0x4a0   :  { %v1171_v49 = vpop.xlane.xlu1 %1170  ;;  %v1214_v56 = vmul.f32 %v2997_v37, %v3489_v27 }
 0x4a1   :  { %3002 = vrcp.f32 %v1171_v49  ;;  %v1174_v57 = vpop.xlane.xlu0 %1173  ;;  %v1229_v58 = vpack.c.bf16 %v1213_v21, %v1213_v21 }
 0x4a2   :  { %3004 = vrcp.f32 %v1174_v57  ;;  %v1230_v59 = vpack.c.bf16 %v1214_v56, %v1214_v56 }
 0x4a3   :  { %2799 = vmatmul.mubr.msk.bf16.vlgmr.msra.gmra.mxu0 %vm282_vm3, %v1229_v58 }
 0x4a4   :  { %2805 = vmatmul.mubr.msk.bf16.vlgmr.msra.gmra.mxu1 %vm282_vm3, %v1230_v59  ;;  %2809 = vmatpush3.bf16.msra.mxu0 %v1536_v60 }
 0x4a5   :  { %2815 = vmatpush3.bf16.msra.mxu1 %v1584_v61  ;;  %2810 = vmatprep.mubr.msk.bf16.mxu0 %vm3107_vm2, %v3104_v25 }
 0x4a6   :  { %v2999_v7 = vpop.eup %2998  ;;  %2816 = vmatprep.mubr.msk.bf16.mxu1 %vm3107_vm2, %v3104_v25  ;;  %2820 = vmatprep.subr.bf16.mxu0 %v3104_v25 }
 0x4a7   :  { %v3001_v27 = vpop.eup %3000  ;;  %2826 = vmatprep.subr.bf16.mxu1 %v3104_v25  ;;  %v1215_v17 = vmul.f32 %v2999_v7, %v3497_v24 }
 0x4a8   :  { %v1177_v62 = vpop.xlane.xlu1 %1176  ;;  %v1216_v30 = vmul.f32 %v3001_v27, %v3499_v31 }
 0x4a9   :  { %3006 = vrcp.f32 %v1177_v62  ;;  %v1180_v51 = vpop.xlane.xlu0 %1179  ;;  %v1231_v50 = vpack.c.bf16 %v1215_v17, %v1215_v17 }
 0x4aa   :  { %3008 = vrcp.f32 %v1180_v51  ;;  %v1232_v18 = vpack.c.bf16 %v1216_v30, %v1216_v30 }
 0x4ab   :  { %2811 = vmatmul.mubr.msk.bf16.vlgmr.msra.gmra.mxu0 %vm282_vm3, %v1231_v50 }
 0x4ac   :  { %2817 = vmatmul.mubr.msk.bf16.vlgmr.msra.gmra.mxu1 %vm282_vm3, %v1232_v18  ;;  %2821 = vmatpush3.bf16.msra.mxu0 %v1632_v63  ;;  %v1867_v1 = vpop.permute.xlu1 %1866 }
 0x4ad   :  { %2827 = vmatpush3.bf16.msra.mxu1 %v1680_v8  ;;  %2822 = vmatprep.mubr.msk.bf16.mxu0 %vm3107_vm2, %v3104_v25  ;;  %v1819_v10 = vpop.permute.xlu0 %1818  ;;  %v1872_v22 = vsel %vm1246_vm4, %v1867_v1, 0 }
 0x4ae   :  { %v3003_v24 = vpop.eup %3002  ;;  %2828 = vmatprep.mubr.msk.bf16.mxu1 %vm3107_vm2, %v3104_v25  ;;  %2832 = vmatprep.subr.bf16.mxu0 %v3104_v25  ;;  %v1824_v15 = vsel %vm1246_vm4, %v1819_v10, 0 }
 0x4af   :  { %v3005_v31 = vpop.eup %3004  ;;  %2838 = vmatprep.subr.bf16.mxu1 %v3104_v25  ;;  %v1217_v23 = vmul.f32 %v3003_v24, %v3505_v36 }
 0x4b0   :  { %v1218_v42 = vmul.f32 %v3005_v31, %v3507_v26 }
 0x4b1   :  { %v1233_v4 = vpack.c.bf16 %v1217_v23, %v1217_v23 }
 0x4b2   :  { %v1234_v44 = vpack.c.bf16 %v1218_v42, %v1218_v42 }
 0x4b3   :  { %2823 = vmatmul.mubr.msk.bf16.vlgmr.msra.gmra.mxu0 %vm282_vm3, %v1233_v4 }
 0x4b4   :  { %2829 = vmatmul.mubr.msk.bf16.vlgmr.msra.gmra.mxu1 %vm282_vm3, %v1234_v44  ;;  %2833 = vmatpush3.bf16.msra.mxu0 %v1728_v6 }
 0x4b5   :  { %2839 = vmatpush3.bf16.msra.mxu1 %v1776_v3  ;;  %2834 = vmatprep.mubr.msk.bf16.mxu0 %vm3107_vm2, %v3104_v25 }
 0x4b6   :  { %v3007_v36 = vpop.eup %3006  ;;  %2840 = vmatprep.mubr.msk.bf16.mxu1 %vm3107_vm2, %v3104_v25  ;;  %2844 = vmatprep.subr.bf16.mxu0 %v3104_v25 }
 0x4b7   :  { %v3009_v26 = vpop.eup %3008  ;;  %2850 = vmatprep.subr.bf16.mxu1 %v3104_v25  ;;  %v1219_v2 = vmul.f32 %v3007_v36, %v3513_v28 }
 0x4b8   :  { %v1220_v0 = vmul.f32 %v3009_v26, %v3515_v45 }
 0x4b9   :  { %v1235_v19 = vpack.c.bf16 %v1219_v2, %v1219_v2 }
 0x4ba   :  { %v1236_v14 = vpack.c.bf16 %v1220_v0, %v1220_v0 }
 0x4bb   :  { %2835 = vmatmul.mubr.msk.bf16.vlgmr.msra.gmra.mxu0 %vm282_vm3, %v1235_v19 }
 0x4bc   :  { %2841 = vmatmul.mubr.msk.bf16.vlgmr.msra.gmra.mxu1 %vm282_vm3, %v1236_v14  ;;  %2845 = vmatpush3.bf16.msra.mxu0 %v1824_v15 }
 0x4bd   :  { %2851 = vmatpush3.bf16.msra.mxu1 %v1872_v22  ;;  %2846 = vmatprep.mubr.msk.bf16.mxu0 %vm3107_vm2, %v3104_v25 }
 0x4be   :  { %2852 = vmatprep.mubr.msk.bf16.mxu1 %vm3107_vm2, %v3104_v25  ;;  %2856 = vmatprep.subr.bf16.mxu0 %v3104_v25 }
 0x4bf   :  { %2862 = vmatprep.subr.bf16.mxu1 %v3104_v25 }
 0x4dd   :  { %v1183_v28 = vpop.xlane.xlu1 %1182 }
 0x4de   :  { %3010 = vrcp.f32 %v1183_v28  ;;  %v1186_v45 = vpop.xlane.xlu0 %1185 }
 0x4df   :  { %3012 = vrcp.f32 %v1186_v45 }
 0x4e1   :  { %v1189_v32 = vpop.xlane.xlu1 %1188 }
 0x4e2   :  { %3014 = vrcp.f32 %v1189_v32  ;;  %v1192_v33 = vpop.xlane.xlu0 %1191 }
 0x4e3   :  { %3016 = vrcp.f32 %v1192_v33 }
 0x4e5   :  { %v1963_v20 = vpop.permute.xlu1 %1962 }
 0x4e6   :  { %v1915_v39 = vpop.permute.xlu0 %1914  ;;  %v1968_v54 = vsel %vm1246_vm4, %v1963_v20, 0 }
 0x4e7   :  { %v1920_v47 = vsel %vm1246_vm4, %v1915_v39, 0 }
 0x4eb   :  { %v3011_v34 = vpop.eup %3010 }
 0x4ec   :  { %v3013_v35 = vpop.eup %3012  ;;  %v1221_v29 = vmul.f32 %v3011_v34, %v3538_v5 }
 0x4ed   :  { %v1222_v43 = vmul.f32 %v3013_v35, %v3540_v52 }
 0x4ee   :  { %v1237_v40 = vpack.c.bf16 %v1221_v29, %v1221_v29 }
 0x4ef   :  { %v3015_v46 = vpop.eup %3014  ;;  %v1238_v55 = vpack.c.bf16 %v1222_v43, %v1222_v43 }
 0x4f0   :  { %v3017_v41 = vpop.eup %3016  ;;  %2847 = vmatmul.mubr.msk.bf16.vlgmr.msra.gmra.mxu0 %vm282_vm3, %v1237_v40  ;;  %v1223_v5 = vmul.f32 %v3015_v46, %v3544_v53 }
 0x4f1   :  { %2853 = vmatmul.mubr.msk.bf16.vlgmr.msra.gmra.mxu1 %vm282_vm3, %v1238_v55  ;;  %2857 = vmatpush3.bf16.msra.mxu0 %v1920_v47  ;;  %v1224_v52 = vmul.f32 %v3017_v41, %v3548_v16  ;;  %v2946_v55 = vld [vmem:[%s3752_s4 + $0x8] sm:$0xff]   ;;  %v2947_v41 = vld [vmem:[%s3752_s4] sm:$0xff]  }
 0x4f2   :  { %2863 = vmatpush3.bf16.msra.mxu1 %v1968_v54  ;;  %2858 = vmatprep.mubr.msk.bf16.mxu0 %vm3107_vm2, %v3104_v25  ;;  %v1239_v48 = vpack.c.bf16 %v1223_v5, %v1223_v5 }
 0x4f3   :  { %2864 = vmatprep.mubr.msk.bf16.mxu1 %vm3107_vm2, %v3104_v25  ;;  %v1240_v38 = vpack.c.bf16 %v1224_v52, %v1224_v52  ;;  %2868 = vmatprep.subr.bf16.mxu0 %v2946_v55 }
 0x4f8   :  { %2859 = vmatmul.mubr.msk.bf16.vlgmr.msra.gmra.mxu0 %vm282_vm3, %v1239_v48 }
 0x4f9   :  { %2865 = vmatmul.mubr.msk.bf16.vlgmr.msra.gmra.mxu1 %vm282_vm3, %v1240_v38  ;;  %2869 = vmatpush3.bf16.msra.mxu0 %v2946_v55 }
 0x4fa   :  { %2870 = vmatprep.subr.bf16.mxu0 %v2947_v41 }
 0x4fb   :  { %v3651_v37 = vpop.f32.mrf.mxu0 }
 0x4fd   :  { %v2776_v21 = vpop.f32.mrf.mxu0  ;;  %2871 = vmatpush3.bf16.msra.mxu0 %v2947_v41 }
 0x4ff   :  { %v1287_v49 = vpop.f32.mrf.mxu0 }
 0x501   :  { %v2777_v56 = vpop.f32.mrf.mxu0 }
 0x523   :  { %v3653_v57 = vpop.f32.mrf.mxu1 }
 0x525   :  { %v2782_v58 = vpop.f32.mrf.mxu1 }
 0x527   :  { %v1335_v53 = vpop.f32.mrf.mxu1 }
 0x529   :  { %v2783_v59 = vpop.f32.mrf.mxu1 }
 0x52b   :  { %v3655_v60 = vpop.f32.mrf.mxu1 }
 0x52d   :  { %v2794_v25 = vpop.f32.mrf.mxu1 }
 0x52f   :  { %v1431_v16 = vpop.f32.mrf.mxu1 }
 0x531   :  { %v2795_v61 = vpop.f32.mrf.mxu1 }
 0x538   :  { %v3657_v7 = vpop.f32.mrf.mxu0 }
 0x53a   :  { %v2788_v27 = vpop.f32.mrf.mxu0 }
 0x53c   :  { %v1383_v17 = vpop.f32.mrf.mxu0 }
 0x53e   :  { %v2789_v62 = vpop.f32.mrf.mxu0 }
 0x563   :  { %v1476_v30 = vpop.f32.mrf.mxu0 }
 0x564   :  { %v1524_v51 = vpop.f32.mrf.mxu1 }
 0x565   :  { %v2911_v50 = vpack.i.bf16 %v1524_v51, %v1476_v30  ;;  %v2800_v18 = vpop.f32.mrf.mxu0 }
 0x566   :  { %v2806_v63 = vpop.f32.mrf.mxu1 }
 0x567   :  { %2912 = vrot.lane.b32.xlu0 %v2911_v50, %s3110_s11  ;;  %v1479_v8 = vpop.f32.mrf.mxu0 }
 0x568   :  { %v1527_v24 = vpop.f32.mrf.mxu1 }
 0x569   :  { %v2801_v31 = vpop.f32.mrf.mxu0 }
 0x56a   :  { %v2807_v23 = vpop.f32.mrf.mxu1 }
 0x56b   :  { %v1572_v42 = vpop.f32.mrf.mxu0 }
 0x56c   :  { %v1620_v4 = vpop.f32.mrf.mxu1 }
 0x56d   :  { %v2916_v44 = vpack.i.bf16 %v1620_v4, %v1572_v42  ;;  %v2812_v6 = vpop.f32.mrf.mxu0 }
 0x56e   :  { %v2818_v3 = vpop.f32.mrf.mxu1 }
 0x56f   :  { %2917 = vrot.lane.b32.xlu1 %v2916_v44, %s3110_s11  ;;  %v1575_v36 = vpop.f32.mrf.mxu0 }
 0x570   :  { %v1623_v26 = vpop.f32.mrf.mxu1 }
 0x571   :  { %v2813_v2 = vpop.f32.mrf.mxu0 }
 0x572   :  { %v2819_v10 = vpop.f32.mrf.mxu1 }
 0x573   :  { %v1668_v0 = vpop.f32.mrf.mxu0 }
 0x574   :  { %v1716_v1 = vpop.f32.mrf.mxu1 }
 0x575   :  { %v2921_v19 = vpack.i.bf16 %v1716_v1, %v1668_v0  ;;  %v2824_v14 = vpop.f32.mrf.mxu0 }
 0x576   :  { %v2830_v15 = vpop.f32.mrf.mxu1 }
 0x577   :  { %2922 = vrot.lane.b32.xlu0 %v2921_v19, %s3111_s12  ;;  %v1671_v22 = vpop.f32.mrf.mxu0 }
 0x578   :  { %v1719_v28 = vpop.f32.mrf.mxu1 }
 0x579   :  { %v2825_v45 = vpop.f32.mrf.mxu0 }
 0x57a   :  { %v2831_v32 = vpop.f32.mrf.mxu1 }
 0x57b   :  { %v1764_v33 = vpop.f32.mrf.mxu0 }
 0x57c   :  { %v1812_v34 = vpop.f32.mrf.mxu1 }
 0x57d   :  { %v2926_v35 = vpack.i.bf16 %v1812_v34, %v1764_v33  ;;  %v2836_v29 = vpop.f32.mrf.mxu0 }
 0x57e   :  { %v2842_v39 = vpop.f32.mrf.mxu1 }
 0x57f   :  { %2927 = vrot.lane.b32.xlu1 %v2926_v35, %s3111_s12  ;;  %v1767_v43 = vpop.f32.mrf.mxu0  ;;  %s3113_s12 = smov [#allocation7]  }
 0x580   :  { %v1815_v20 = vpop.f32.mrf.mxu1  ;;  %s2480_s13 = sshll.u32 %s3113_s12, 4  ;;  %s2481_s13 = int_to_ptr.vmem [resolvable:$true] %s2480_s13 }
 0x581   :  { %v2837_v40 = vpop.f32.mrf.mxu0  ;;  %p3079_p11 = scmp.lt.s32.totalorder %s2481_s13, %s2481_s13 }
 0x582   :  { %v2843_v46 = vpop.f32.mrf.mxu1 }
 0x5b0   :  { %v1860_v47 = vpop.f32.mrf.mxu0 }
 0x5b1   :  { %v1908_v54 = vpop.f32.mrf.mxu1 }
 0x5b2   :  { %v2931_v5 = vpack.i.bf16 %v1908_v54, %v1860_v47  ;;  %v2848_v52 = vpop.f32.mrf.mxu0 }
 0x5b3   :  { %v2854_v48 = vpop.f32.mrf.mxu1 }
 0x5b4   :  { %2932 = vrot.lane.b32.xlu0 %v2931_v5, %s3112_s17  ;;  %v1863_v38 = vpop.f32.mrf.mxu0 }
 0x5b5   :  { %v1911_v21 = vpop.f32.mrf.mxu1 }
 0x5b6   :  { %v2849_v49 = vpop.f32.mrf.mxu0 }
 0x5b7   :  { %v2855_v56 = vpop.f32.mrf.mxu1 }
 0x5b8   :  { %v1956_v58 = vpop.f32.mrf.mxu0 }
 0x5b9   :  { %v2004_v53 = vpop.f32.mrf.mxu1 }
 0x5ba   :  { %v2936_v59 = vpack.i.bf16 %v2004_v53, %v1956_v58  ;;  %v2860_v25 = vpop.f32.mrf.mxu0 }
 0x5bb   :  { %v2866_v16 = vpop.f32.mrf.mxu1 }
 0x5bc   :  { %2937 = vrot.lane.b32.xlu1 %v2936_v59, %s3112_s17  ;;  %v1959_v61 = vpop.f32.mrf.mxu0 }
 0x5bd   :  { %v2007_v27 = vpop.f32.mrf.mxu1 }
 0x5be   :  { %v2861_v17 = vpop.f32.mrf.mxu0 }
 0x5bf   :  { %v2867_v62 = vpop.f32.mrf.mxu1 }
 0x5d9   :  { %v2913_v30 = vpop.permute.xlu0 %2912 }
 0x5da   :  { %v2915_v50 = vunpack.i.h.bf16 %v2913_v30  ;;  %v2914_v18 = vunpack.i.l.bf16 %v2913_v30 }
 0x5dc   :  { %v2059_v23 = vsel %vm282_vm3, %v3653_v57, %v2915_v50  ;;  %v2058_v42 = vsel %vm282_vm3, %v3651_v37, %v2914_v18 }
 0x5e1   :  { %v2918_v24 = vpop.permute.xlu1 %2917 }
 0x5e2   :  { %v2920_v0 = vunpack.i.h.bf16 %v2918_v24  ;;  %v2919_v1 = vunpack.i.l.bf16 %v2918_v24  ;;  %v2949_v24 = vld [vmem:[#allocation5] sm:$0xff]  }
 0x5e4   :  { %v2061_v37 = vsel %vm282_vm3, %v3655_v60, %v2920_v0  ;;  %v2060_v15 = vsel %vm282_vm3, %v3657_v7, %v2919_v1  ;;  %v2552_v60 = vld [vmem:[%s3756_s8 + $0x1] ss:$0 sm:$0xff] }
 0x5e9   :  { %v2923_v51 = vpop.permute.xlu0 %2922 }
 0x5ea   :  { %v2925_v63 = vunpack.i.h.bf16 %v2923_v51  ;;  %v2924_v8 = vunpack.i.l.bf16 %v2923_v51 }
 0x5ec   :  { %v2062_v6 = vsel %vm95_vm0, %v2058_v42, %v2924_v8  ;;  %v2063_v3 = vsel %vm95_vm0, %v2059_v23, %v2925_v63  ;;  %v2948_v8 = vld [vmem:[#allocation5 + $0x8] sm:$0xff]  }
 0x5ed   :  { %2876 = vmatprep.subr.bf16.mxu1 %v2948_v8 }
 0x5ee   :  { %2877 = vmatpush3.bf16.msra.mxu1 %v2948_v8 }
 0x5ef   :  { %2878 = vmatprep.subr.bf16.mxu1 %v2949_v24 }
 0x5f1   :  { %v2928_v36 = vpop.permute.xlu1 %2927 }
 0x5f2   :  { %v2930_v19 = vunpack.i.h.bf16 %v2928_v36  ;;  %v2929_v14 = vunpack.i.l.bf16 %v2928_v36  ;;  %2879 = vmatpush3.bf16.msra.mxu1 %v2949_v24 }
 0x5f4   :  { %v2065_v45 = vsel %vm95_vm0, %v2061_v37, %v2930_v19  ;;  %v2064_v32 = vsel %vm95_vm0, %v2060_v15, %v2929_v14 }
 0x626   :  { %v2933_v31 = vpop.permute.xlu0 %2932 }
 0x627   :  { %v2935_v4 = vunpack.i.h.bf16 %v2933_v31  ;;  %v2934_v44 = vunpack.i.l.bf16 %v2933_v31  ;;  %v2950_v31 = vld [vmem:[%s3755_s7 + $0x18] sm:$0xff]  }
 0x628   :  { %2884 = vmatprep.subr.bf16.mxu0 %v2950_v31 }
 0x629   :  { %v2067_v26 = vsel %vm2066_vm5, %v2062_v6, %v2934_v44  ;;  %v2068_v2 = vsel %vm2066_vm5, %v2063_v3, %v2935_v4 }
 0x62a   :  { %v2071_v10 = vpack.c.bf16 %v2068_v2, %v2067_v26 }
 0x62c   :  { %2872 = vmatprep.mubr.msk.bf16.mxu0 %vm176_vm1, %v2071_v10 }
 0x62e   :  { %v2938_v57 = vpop.permute.xlu1 %2937 }
 0x62f   :  { %v2940_v22 = vunpack.i.h.bf16 %v2938_v57  ;;  %v2939_v28 = vunpack.i.l.bf16 %v2938_v57  ;;  %v2557_v57 = vld [vmem:[%s3756_s8 + $0x2] ss:$0 sm:$0xff] }
 0x631   :  { %v2070_v33 = vsel %vm2066_vm5, %v2065_v45, %v2940_v22  ;;  %v2069_v34 = vsel %vm2066_vm5, %v2064_v32, %v2939_v28  ;;  %v2558_v32 = vld [vmem:[%s3756_s8 + $0x3] ss:$0 sm:$0xff] }
 0x632   :  { %v2072_v35 = vpack.c.bf16 %v2070_v33, %v2069_v34 }
 0x634   :  { %2873 = vmatmul.mubr.msk.bf16.vlgmr.msra.gmra.mxu0 %vm176_vm1, %v2072_v35 }
 0x635   :  { %2885 = vmatpush3.bf16.msra.mxu0 %v2950_v31 }
 0x6f4   :  { %v2874_v29 = vpop.f32.mrf.mxu0 }
 0x6f5   :  { %v2142_v7 = vadd.f32 %v2874_v29, %v2552_v60 }
 0x6f6   :  { %v2133_v39 = vpop.f32.mrf.mxu0 }
 0x6f7   :  { %v2134_v43 = vadd.f32 %v2552_v60, %v2133_v39  ;;  %v2150_v54 = vadd.f32 %v2142_v7, %v3198_v13 }
 0x6f8   :  { %v2875_v20 = vpop.f32.mrf.mxu0 }
 0x6f9   :  { %v2148_v40 = vadd.f32 %v2134_v43, %v3194_v11  ;;  %v2145_v55 = vadd.f32 %v2875_v20, %v2552_v60  ;;  %v2158_v48 = vsel %vm176_vm1, %v2150_v54, 0.0 }
 0x6fa   :  { %v2136_v46 = vpop.f32.mrf.mxu0 }
 0x6fb   :  { %v2137_v41 = vadd.f32 %v2552_v60, %v2136_v46  ;;  %v2152_v47 = vsel %vm176_vm1, %v2148_v40, 0.0  ;;  %v2151_v38 = vadd.f32 %v2145_v55, %v3192_v9  ;;  %v2951_v55 = vld [vmem:[%s3755_s7 + $0x10] sm:$0xff]  }
 0x6fc   :  { %2153 = vadd.xlane.f32.xlu0 %v2152_v47  ;;  %2886 = vmatprep.subr.bf16.mxu0 %v2951_v55  ;;  %v2953_v47 = vld [vmem:[%s3755_s7] sm:$0xff]  }
 0x6fd   :  { %v2149_v5 = vadd.f32 %v2137_v41, %v3196_v12  ;;  %v2161_v11 = vsel %vm176_vm1, %v2151_v38, 0.0  ;;  %2887 = vmatpush3.bf16.msra.mxu0 %v2951_v55  ;;  %v2952_v41 = vld [vmem:[%s3755_s7 + $0x8] sm:$0xff]  }
 0x6fe   :  { %2888 = vmatprep.subr.bf16.mxu0 %v2952_v41 }
 0x6ff   :  { %v2155_v52 = vsel %vm176_vm1, %v2149_v5, 0.0 }
 0x700   :  { %2156 = vadd.xlane.f32.xlu1 %v2155_v52  ;;  %2159 = vadd.xlane.f32.xlu0 %v2158_v48  ;;  %v2559_v52 = vld [vmem:[%s3754_s6] ss:$0 sm:$0xff] }
 0x701   :  { %2889 = vmatpush3.bf16.msra.mxu0 %v2952_v41 }
 0x702   :  { %2890 = vmatprep.subr.bf16.mxu0 %v2953_v47 }
 0x704   :  { %2162 = vadd.xlane.f32.xlu0 %v2161_v11 }
 0x705   :  { %2891 = vmatpush3.bf16.msra.mxu0 %v2953_v47 }
 0x785   :  { %v2154_v21 = vpop.xlane.xlu0 %2153 }
 0x786   :  { %v2165_v49 = vmul.f32 0.03125, %v2154_v21 }
 0x788   :  { %v2169_v56 = vsub.f32 %v2148_v40, %v2165_v49 }
 0x789   :  { %v2157_v58 = vpop.xlane.xlu1 %2156  ;;  %v2160_v53 = vpop.xlane.xlu0 %2159 }
 0x78a   :  { %v2166_v13 = vmul.f32 0.03125, %v2157_v58  ;;  %v2167_v59 = vmul.f32 0.03125, %v2160_v53  ;;  %v2173_v25 = vmul.f32 %v2169_v56, %v2169_v56 }
 0x78c   :  { %v2170_v12 = vsub.f32 %v2149_v5, %v2166_v13  ;;  %v2171_v16 = vsub.f32 %v2150_v54, %v2167_v59  ;;  %v2177_v61 = vsel %vm176_vm1, %v2173_v25, 0.0 }
 0x78d   :  { %2178 = vadd.xlane.f32.xlu1 %v2177_v61  ;;  %v2163_v27 = vpop.xlane.xlu0 %2162  ;;  %v2564_v61 = vld [vmem:[%s3756_s8 + $0x4] ss:$0 sm:$0xff] }
 0x78e   :  { %v2168_v9 = vmul.f32 0.03125, %v2163_v27  ;;  %v2174_v17 = vmul.f32 %v2170_v12, %v2170_v12  ;;  %v2175_v62 = vmul.f32 %v2171_v16, %v2171_v16 }
 0x790   :  { %v2172_v30 = vsub.f32 %v2151_v38, %v2168_v9  ;;  %v2180_v51 = vsel %vm176_vm1, %v2174_v17, 0.0  ;;  %v2183_v50 = vsel %vm176_vm1, %v2175_v62, 0.0 }
 0x791   :  { %2181 = vadd.xlane.f32.xlu0 %v2180_v51  ;;  %2184 = vadd.xlane.f32.xlu1 %v2183_v50 }
 0x792   :  { %v2176_v18 = vmul.f32 %v2172_v30, %v2172_v30 }
 0x794   :  { %v2186_v63 = vsel %vm176_vm1, %v2176_v18, 0.0 }
 0x795   :  { %2187 = vadd.xlane.f32.xlu0 %v2186_v63 }
 0x816   :  { %v2179_v23 = vpop.xlane.xlu1 %2178 }
 0x817   :  { %v2189_v42 = vmul.f32 0.03125, %v2179_v23 }
 0x819   :  { %v2193_v4 = vadd.f32 1e-05, %v2189_v42 }
 0x81a   :  { %v2185_v44 = vpop.xlane.xlu1 %2184  ;;  %v2182_v6 = vpop.xlane.xlu0 %2181 }
 0x81b   :  { %3018 = vrsqrt.f32 %v2193_v4  ;;  %v2191_v3 = vmul.f32 0.03125, %v2185_v44  ;;  %v2190_v36 = vmul.f32 0.03125, %v2182_v6 }
 0x81d   :  { %v2195_v26 = vadd.f32 1e-05, %v2191_v3  ;;  %v2194_v2 = vadd.f32 1e-05, %v2190_v36 }
 0x81e   :  { %v2188_v10 = vpop.xlane.xlu0 %2187 }
 0x81f   :  { %3020 = vrsqrt.f32 %v2195_v26  ;;  %v2192_v0 = vmul.f32 0.03125, %v2188_v10 }
 0x820   :  { %3022 = vrsqrt.f32 %v2194_v2 }
 0x821   :  { %v2196_v1 = vadd.f32 1e-05, %v2192_v0 }
 0x823   :  { %3024 = vrsqrt.f32 %v2196_v1 }
 0x828   :  { %v3019_v19 = vpop.eup %3018 }
 0x829   :  { %v2201_v14 = vmul.f32 %v3019_v19, %v2169_v56 }
 0x82b   :  { %v2209_v45 = vmul.f32 %v2557_v57, %v2201_v14 }
 0x82c   :  { %v3021_v37 = vpop.eup %3020 }
 0x82d   :  { %v3023_v15 = vpop.eup %3022  ;;  %v2203_v22 = vmul.f32 %v3021_v37, %v2171_v16  ;;  %v2217_v60 = vadd.f32 %v2558_v32, %v2209_v45 }
 0x82e   :  { %v2202_v28 = vmul.f32 %v3023_v15, %v2170_v12 }
 0x82f   :  { %v2211_v29 = vmul.f32 %v2557_v57, %v2203_v22 }
 0x830   :  { %v3025_v33 = vpop.eup %3024  ;;  %v2210_v34 = vmul.f32 %v2557_v57, %v2202_v28 }
 0x831   :  { %v2204_v35 = vmul.f32 %v3025_v33, %v2172_v30  ;;  %v2219_v20 = vadd.f32 %v2558_v32, %v2211_v29 }
 0x832   :  { %v2218_v39 = vadd.f32 %v2558_v32, %v2210_v34 }
 0x833   :  { %v2212_v7 = vmul.f32 %v2557_v57, %v2204_v35 }
 0x834   :  { %v2221_v43 = vpack.c.bf16 %v2218_v39, %v2217_v60 }
 0x835   :  { %v2220_v40 = vadd.f32 %v2558_v32, %v2212_v7 }
 0x836   :  { %2880 = vmatprep.mubr.msk.bf16.mxu1 %vm176_vm1, %v2221_v43 }
 0x837   :  { %v2222_v46 = vpack.c.bf16 %v2220_v40, %v2219_v20 }
 0x839   :  { %2881 = vmatmul.mubr.msk.bf16.vlgmr.msra.gmra.mxu1 %vm176_vm1, %v2222_v46 }
 0x8f9   :  { %v2882_v54 = vpop.f32.mrf.mxu1 }
 0x8fa   :  { %v2295_v21 = vadd.f32 %v2882_v54, %v2559_v52 }
 0x8fb   :  { %v2286_v5 = vpop.f32.mrf.mxu1 }
 0x8fc   :  { %v2287_v38 = vadd.f32 %v2559_v52, %v2286_v5  ;;  %v2303_v59 = vmax.f32 %v2295_v21, 0.0  ;;  %v2571_v5 = vld [vmem:[%s3756_s8 + $0x5] ss:$0 sm:$0xff] }
 0x8fd   :  { %v2883_v48 = vpop.f32.mrf.mxu1 }
 0x8fe   :  { %v2298_v11 = vadd.f32 %v2883_v48, %v2559_v52  ;;  %v2301_v53 = vmax.f32 %v2287_v38, 0.0  ;;  %v2572_v48 = vld [vmem:[%s3756_s8 + $0x6] ss:$0 sm:$0xff]  ;;  %s3074_s8 = scalar_lea.vmem %s2481_s13, 512 }
 0x8ff   :  { %v2289_v49 = vpop.f32.mrf.mxu1  ;;  %p3075_p10 = scmp.ne.s32.totalorder %s2481_s13, %s3074_s8  ;;  %p3080_p12 = scmp.lt.s32.totalorder %s3074_s8, %s3074_s8 }
 0x900   :  { %v2290_v56 = vadd.f32 %v2559_v52, %v2289_v49  ;;  %v2304_v58 = vmax.f32 %v2298_v11, 0.0 }
 0x901   :  { %p3081_p13 = por %p3080_p12, %p3079_p11 }
 0x902   :  { %v2302_v13 = vmax.f32 %v2290_v56, 0.0  ;;  %v2306_v12 = vpack.c.bf16 %v2304_v58, %v2303_v59 }
 0x903   :  { %p3082_p0 = pnand %p3081_p13, %p3075_p10 }
 0x904   :  { %v2305_v25 = vpack.c.bf16 %v2302_v13, %v2301_v53 }
 0x906   :  { %2892 = vmatprep.mubr.msk.bf16.mxu0 %vm2343_vm6, %v2305_v25 }
 0x907   :  { %2893 = vmatmul.mubr.msk.bf16.vlgmr.msra.gmra.mxu0 %vm2343_vm6, %v2306_v12 }
 0x9c7   :  { %v2894_v16 = vpop.f32.mrf.mxu0 }
 0x9c8   :  { %v2393_v9 = vadd.f32 %v2894_v16, %v2564_v61 }
 0x9c9   :  { %v2384_v27 = vpop.f32.mrf.mxu0 }
 0x9ca   :  { %v2385_v17 = vadd.f32 %v2564_v61, %v2384_v27  ;;  %v2401_v8 = vadd.f32 %v2393_v9, %v2219_v20 }
 0x9cb   :  { %v2895_v62 = vpop.f32.mrf.mxu0 }
 0x9cc   :  { %v2399_v30 = vadd.f32 %v2385_v17, %v2217_v60  ;;  %v2396_v50 = vadd.f32 %v2895_v62, %v2564_v61  ;;  %v2409_v23 = vsel %vm176_vm1, %v2401_v8, 0.0 }
 0x9cd   :  { %v2387_v51 = vpop.f32.mrf.mxu0 }
 0x9ce   :  { %v2388_v18 = vadd.f32 %v2564_v61, %v2387_v51  ;;  %v2403_v63 = vsel %vm176_vm1, %v2399_v30, 0.0  ;;  %v2402_v42 = vadd.f32 %v2396_v50, %v2220_v40 }
 0x9cf   :  { %2404 = vadd.xlane.f32.xlu1 %v2403_v63 }
 0x9d0   :  { %v2400_v24 = vadd.f32 %v2388_v18, %v2218_v39  ;;  %v2412_v4 = vsel %vm176_vm1, %v2402_v42, 0.0 }
 0x9d2   :  { %v2406_v31 = vsel %vm176_vm1, %v2400_v24, 0.0 }
 0x9d3   :  { %2407 = vadd.xlane.f32.xlu0 %v2406_v31  ;;  %2410 = vadd.xlane.f32.xlu1 %v2409_v23 }
 0x9d7   :  { %2413 = vadd.xlane.f32.xlu0 %v2412_v4 }
 0xa58   :  { %v2405_v44 = vpop.xlane.xlu1 %2404 }
 0xa59   :  { %v2415_v6 = vmul.f32 0.03125, %v2405_v44 }
 0xa5b   :  { %v2419_v3 = vsub.f32 %v2399_v30, %v2415_v6 }
 0xa5c   :  { %v2408_v36 = vpop.xlane.xlu0 %2407  ;;  %v2411_v26 = vpop.xlane.xlu1 %2410 }
 0xa5d   :  { %v2416_v2 = vmul.f32 0.03125, %v2408_v36  ;;  %v2417_v10 = vmul.f32 0.03125, %v2411_v26  ;;  %v2423_v0 = vmul.f32 %v2419_v3, %v2419_v3 }
 0xa5f   :  { %v2420_v1 = vsub.f32 %v2400_v24, %v2416_v2  ;;  %v2421_v19 = vsub.f32 %v2401_v8, %v2417_v10  ;;  %v2427_v14 = vsel %vm176_vm1, %v2423_v0, 0.0 }
 0xa60   :  { %v2414_v57 = vpop.xlane.xlu0 %2413  ;;  %2428 = vadd.xlane.f32.xlu1 %v2427_v14 }
 0xa61   :  { %v2418_v37 = vmul.f32 0.03125, %v2414_v57  ;;  %v2424_v15 = vmul.f32 %v2420_v1, %v2420_v1  ;;  %v2425_v22 = vmul.f32 %v2421_v19, %v2421_v19 }
 0xa63   :  { %v2422_v28 = vsub.f32 %v2402_v42, %v2418_v37  ;;  %v2430_v45 = vsel %vm176_vm1, %v2424_v15, 0.0  ;;  %v2433_v32 = vsel %vm176_vm1, %v2425_v22, 0.0 }
 0xa64   :  { %2431 = vadd.xlane.f32.xlu0 %v2430_v45  ;;  %2434 = vadd.xlane.f32.xlu1 %v2433_v32 }
 0xa65   :  { %v2426_v33 = vmul.f32 %v2422_v28, %v2422_v28 }
 0xa67   :  { %v2436_v34 = vsel %vm176_vm1, %v2426_v33, 0.0 }
 0xa68   :  { %2437 = vadd.xlane.f32.xlu0 %v2436_v34 }
 0xae9   :  { %v2429_v35 = vpop.xlane.xlu1 %2428 }
 0xaea   :  { %v2439_v29 = vmul.f32 0.03125, %v2429_v35 }
 0xaec   :  { %v2443_v60 = vadd.f32 1e-05, %v2439_v29 }
 0xaed   :  { %v2432_v39 = vpop.xlane.xlu0 %2431  ;;  %v2435_v7 = vpop.xlane.xlu1 %2434 }
 0xaee   :  { %3026 = vrsqrt.f32 %v2443_v60  ;;  %v2440_v43 = vmul.f32 0.03125, %v2432_v39  ;;  %v2441_v20 = vmul.f32 0.03125, %v2435_v7 }
 0xaf0   :  { %v2444_v40 = vadd.f32 1e-05, %v2440_v43  ;;  %v2445_v46 = vadd.f32 1e-05, %v2441_v20 }
 0xaf1   :  { %v2438_v55 = vpop.xlane.xlu0 %2437 }
 0xaf2   :  { %3028 = vrsqrt.f32 %v2444_v40  ;;  %v2442_v41 = vmul.f32 0.03125, %v2438_v55 }
 0xaf3   :  { %3030 = vrsqrt.f32 %v2445_v46 }
 0xaf4   :  { %v2446_v47 = vadd.f32 1e-05, %v2442_v41 }
 0xaf6   :  { %3032 = vrsqrt.f32 %v2446_v47 }
 0xafb   :  { %v3027_v54 = vpop.eup %3026 }
 0xafc   :  { %v2451_v52 = vmul.f32 %v3027_v54, %v2419_v3 }
 0xafe   :  { %v2459_v38 = vmul.f32 %v2571_v5, %v2451_v52 }
 0xaff   :  { %v3029_v11 = vpop.eup %3028 }
 0xb00   :  { %v3031_v21 = vpop.eup %3030  ;;  %v2467_v49 = vadd.f32 %v2572_v48, %v2459_v38  ;;  %v2452_v56 = vmul.f32 %v3029_v11, %v2420_v1 }
 0xb01   :  { %v2453_v58 = vmul.f32 %v3031_v21, %v2421_v19 }
 0xb02   :  { %2471 = vst.msk [vmem:[#allocation7] sm:$0xff] %vm176_vm1, %v2467_v49  ;;  %v2460_v53 = vmul.f32 %v2571_v5, %v2452_v56 }
 0xb03   :  { %v3033_v13 = vpop.eup %3032  ;;  %v2461_v59 = vmul.f32 %v2571_v5, %v2453_v58 }
 0xb04   :  { %v2468_v25 = vadd.f32 %v2572_v48, %v2460_v53  ;;  %v2454_v12 = vmul.f32 %v3033_v13, %v2422_v28 }
 0xb05   :  { %v2469_v16 = vadd.f32 %v2572_v48, %v2461_v59 }
 0xb06   :  { %2472 = vst.msk [vmem:[#allocation7 + $0x8] sm:$0xff] %vm176_vm1, %v2468_v25  ;;  %v2462_v61 = vmul.f32 %v2571_v5, %v2454_v12 }
 0xb07   :  { %2473 = vst.msk [vmem:[#allocation7 + $0x10] sm:$0xff] %vm176_vm1, %v2469_v16 }
 0xb08   :  { %v2470_v27 = vadd.f32 %v2572_v48, %v2462_v61 }
 0xb0a   :  { %2474 = vst.msk [vmem:[#allocation7 + $0x18] sm:$0xff] %vm176_vm1, %v2470_v27 }
 0xb0b   :  { %3085 = shalt.err (!%p3082_p0)
}
 0xb0c   :  { %s3114_s14 = smov 128  }
 0xb0d   :  { %2486 = dma.vmem_to_hbm [thread:$0]  %s2481_s13, 512, %s3757_s9, [#allocation4], %s3114_s14, %s3114_s14, %s3110_s11  }
 0xb0e   :  { %3098 = dma.done.wait [#allocation4], 512  }
 0xb0f   :  { %3099 = vsyncadd [#allocation4], 4294966784 }
 0xb10   :  { %2490 = vsyncpa [#allocation3], 1 }
 0xb11   :  { %2491 = vsyncpa [#allocation6], 1 }
 0xb12   :  { %2492 = vsyncpa [#allocation4], 1 }

</bundles_post_ra>
